<compile_context>
chip_gen: v7x
topology: tpu7x:2x2x1
jax: 0.10.0
libtpu: 0.0.40
codegen_flags: <defaults>
</compile_context>

<pallas_src>
import functools

import jax
import jax.numpy as jnp
from jax import lax
from jax.experimental import pallas as pl
from jax.experimental.pallas import tpu as pltpu


def _silu_eup(x):
    # SiLU = x * sigmoid(x) with both transcendentals on the EUP: exp plus the
    # approximate reciprocal (frees VALU slots).  Clamp the exponent argument
    # so exp never overflows to inf.
    return x * pl.reciprocal(1.0 + jnp.exp(jnp.minimum(-x, 60.0)), approx=True)


# ---------------------------------------------------------------------------
# Fused kernel: one grid step = one (batch, row-tile) block.  The hidden
# (expanded) activation lives only in a VMEM scratch.
# ---------------------------------------------------------------------------
def _mv2_fused_kernel(*refs, TH, W, T, stride, has_expand, use_res, manual_x):
    # ---- unpack refs: inputs..., output, scratch... --------------------------
    i = 0
    x_in = refs[i]; i += 1
    if has_expand:
        w1_ref, b1_ref = refs[i], refs[i + 1]; i += 2
    wdw_ref, b2_ref, w3_ref, b3_ref = refs[i:i + 4]; i += 4
    o_ref = refs[i]; i += 1
    scratch = refs[i:]
    s = 0
    if manual_x:
        x_vmem, copy_sem = scratch[s], scratch[s + 1]; s += 2
    if has_expand:
        h_ref = scratch[s]; s += 1

    t = pl.program_id(1)
    THp = TH + 2
    THo, Wo = TH // stride, W // stride
    Ch = wdw_ref.shape[1]
    Cout = w3_ref.shape[1]

    # ---- bring the haloed input row-window into VMEM -------------------------
    if manual_x:
        b = pl.program_id(0)
        cp = pltpu.make_async_copy(x_in.at[b, pl.ds(t * TH, THp)],
                                   x_vmem, copy_sem.at[0])
        cp.start()
        cp.wait()
        # TODO(synk): double-buffer this copy across grid steps to hide the
        # input DMA latency for very tall images.

    def x_block(r0, nr, c0, nc):
        if manual_x:
            return x_vmem[pl.ds(r0, nr), pl.ds(c0, nc), :]
        return x_in[0, pl.ds(r0, nr), pl.ds(c0, nc), :]

    Wp = x_vmem.shape[1] if manual_x else x_in.shape[2]

    # ---- 1x1 expansion conv + folded-BN bias + SiLU (MXU, bf16 operands) -----
    if has_expand:
        xin = x_block(0, THp, 0, Wp)                       # (THp, Wp, Cin) f32
        Cin = xin.shape[-1]
        hlin = jnp.dot(xin.reshape(THp * Wp, Cin).astype(jnp.bfloat16),
                       w1_ref[...],                        # (Cin, Ch), BN folded
                       preferred_element_type=jnp.float32)
        h_ref[...] = _silu_eup(hlin + b1_ref[...]).reshape(THp, Wp, Ch)

        # Structural zeroing of the depthwise halo that corresponds to the
        # image border; interior halo rows keep their recomputed values.
        zcol = jnp.zeros((THp, 1, Ch), jnp.float32)
        h_ref[:, 0:1, :] = zcol                            # left padding column
        h_ref[:, W + 1:W + 2, :] = zcol                    # right padding column
        zrow = jnp.zeros((1, Wp, Ch), jnp.float32)

        @pl.when(t == 0)
        def _():
            h_ref[0:1, :, :] = zrow                        # top image border

        @pl.when(t == T - 1)
        def _():
            h_ref[THp - 1:THp, :, :] = zrow                # bottom image border

        def tap(di, dj):                                   # ref-slice tap reads
            return h_ref[pl.ds(di, TH), pl.ds(dj, W), :]
    else:
        # No expansion: the depthwise runs straight on the (already
        # zero-padded) input block / scratch.
        def tap(di, dj):
            return x_block(di, TH, dj, W)

    # ---- 3x3 depthwise conv + folded-BN bias + SiLU (VPU, f32) ---------------
    wdw = wdw_ref[...]                                     # (9, Ch), BN folded
    acc = jnp.zeros((TH, W, Ch), jnp.float32)
    for di in range(3):
        for dj in range(3):
            acc = acc + tap(di, dj) * wdw[3 * di + dj]
    dw = _silu_eup(acc + b2_ref[...])                      # (TH, W, Ch)

    if stride == 2:
        # Subsample BEFORE the projection matmul and the HBM store so only the
        # strided outputs pay MXU / store cost.
        # TODO(synk): strided ref taps (pl.ds(..., stride=2)) would also cut
        # the depthwise VPU work above ~4x.
        dw = dw[::2, ::2, :]                               # (THo, Wo, Ch)

    # ---- 1x1 projection conv + folded-BN bias (+ residual) (MXU, bf16) -------
    y = jnp.dot(dw.reshape(THo * Wo, Ch).astype(jnp.bfloat16),
                w3_ref[...],                               # (Ch, Cout), BN folded
                preferred_element_type=jnp.float32)
    y = y + b3_ref[...]
    if use_res:                                            # stride==1, Cin==Cout
        res = x_block(1, TH, 1, W)                         # interior of the input
        y = y + res.reshape(TH * W, Cout)

    # TODO(synk): for tiny Cout (test config Cout=4) this store is lane-sparse;
    # production channel counts (multiples of 128) or a (Cout, THo*Wo)
    # transposed output layout would make it a dense vst.
    o_ref[0] = y.reshape(THo, Wo, Cout).astype(o_ref.dtype)


# ---------------------------------------------------------------------------
# Spec / tiling helpers
# ---------------------------------------------------------------------------
def _wspec(a):
    """Whole-array (broadcast) BlockSpec for a 2-D weight/bias operand."""
    return pl.BlockSpec(a.shape, lambda b, t: (0, 0))


def _vmem_capacity_bytes():
    try:
        return int(pltpu.get_tpu_info().vmem_capacity_bytes)
    except Exception:
        return 64 * 1024 * 1024            # conservative default (v7x per-TC)


def _tile_working_set_bytes(TH, Wp, Cin, Ch, Cout, stride):
    THp = TH + 2
    THo = max(TH // stride, 1)
    Wo = max(Wp // stride, 1)
    return (2 * THp * Wp * Cin * 4         # input block (double-buffered) / scratch
            + THp * Wp * Ch * 4            # hidden VMEM scratch
            + 4 * TH * Wp * Ch * 4         # live depthwise intermediates (rough)
            + 2 * THo * Wo * Cout * 4)     # output block (double-buffered)


def _select_row_tile(H, Wp, Cin, Ch, Cout, stride, max_tile_rows, budget):
    cands = [d for d in range(H, 0, -1) if H % d == 0]
    if stride == 2:
        cands = [d for d in cands if d % 2 == 0]           # keep output tiling uniform
    if max_tile_rows is not None:
        cands = [d for d in cands if d <= max_tile_rows] or [cands[-1]]
    for th in cands:
        if _tile_working_set_bytes(th, Wp, Cin, Ch, Cout, stride) <= budget:
            return th
    return cands[-1]


# ---------------------------------------------------------------------------
# Parameter construction (deterministic, synthetic) with BN folded in.
# ---------------------------------------------------------------------------
def _fold_bn(gamma, beta, mean, var, eps=1e-5):
    scale = gamma / jnp.sqrt(var + eps)
    bias = beta - mean * scale
    return scale, bias


def make_mv2block_params(inputs, outputs, expansion=4, seed=42):
    hidden = int(inputs * expansion)
    keys = jax.random.split(jax.random.PRNGKey(seed), 6)

    def bn_params(k, c):
        k1, k2, k3, k4 = jax.random.split(k, 4)
        gamma = 1.0 + 0.1 * jax.random.normal(k1, (c,), jnp.float32)
        beta = 0.1 * jax.random.normal(k2, (c,), jnp.float32)
        mean = 0.05 * jax.random.normal(k3, (c,), jnp.float32)
        var = 1.0 + 0.1 * jnp.abs(jax.random.normal(k4, (c,), jnp.float32))
        return _fold_bn(gamma, beta, mean, var)

    params = {}
    if expansion != 1:
        w1 = 0.2 * jax.random.normal(keys[0], (inputs, hidden), jnp.float32)
        s1, b1 = bn_params(keys[1], hidden)
        params["w1"] = (w1 * s1[None, :]).astype(jnp.bfloat16)   # MXU operand
        params["b1"] = b1.reshape(1, hidden).astype(jnp.float32)
    w_dw = 0.2 * jax.random.normal(keys[2], (3, 3, hidden), jnp.float32)
    s2, b2 = bn_params(keys[3], hidden)
    params["w_dw"] = (w_dw * s2[None, None, :]).reshape(9, hidden).astype(jnp.float32)
    params["b2"] = b2.reshape(1, hidden).astype(jnp.float32)
    w3 = 0.2 * jax.random.normal(keys[4], (hidden, outputs), jnp.float32)
    s3, b3 = bn_params(keys[5], outputs)
    params["w3"] = (w3 * s3[None, :]).astype(jnp.bfloat16)       # MXU operand
    params["b3"] = b3.reshape(1, outputs).astype(jnp.float32)
    return params


# ---------------------------------------------------------------------------
# Forward pass (public wrapper; NCHW in / NCHW out to match Conv2d convention)
# ---------------------------------------------------------------------------
def mv2block_forward(params, x_nchw, *, stride=1, expansion=4, max_tile_rows=None):
    assert stride in (1, 2)
    x = jnp.transpose(x_nchw, (0, 2, 3, 1)).astype(jnp.float32)      # NHWC
    B, H, W, Cin = x.shape
    has_expand = expansion != 1
    Ch, Cout = (int(d) for d in params["w3"].shape)
    use_res = (stride == 1) and (Cin == Cout)
    if stride == 2:
        assert H % 2 == 0 and W % 2 == 0, "stride-2 path assumes even H, W"

    # Pad once: 1 zero halo row top/bottom, 1 zero halo col left, and pad the
    # width to a multiple of 8 so in-kernel (rows, W, C) <-> (rows*W, C)
    # reshapes around the matmuls are layout-trivial.  This pad typically fuses
    # with the NCHW->NHWC transpose above; no overlapping tiles are ever
    # materialized in HBM.
    Wp = -(-(W + 2) // 8) * 8
    xp = jnp.pad(x, ((0, 0), (1, 1), (1, Wp - W - 1), (0, 0)))

    # Generation-aware row tiling: largest tile (whole image when possible)
    # whose working set fits the per-core VMEM budget.
    vmem_cap = _vmem_capacity_bytes()
    TH = _select_row_tile(H, Wp, Cin, Ch, Cout, stride, max_tile_rows,
                          budget=int(0.45 * vmem_cap))
    T = H // TH
    # Keep >= 2 grid steps when possible so v7x can balance its 2 TensorCores.
    if B * T < 2 and H % 2 == 0 and (stride == 1 or (H // 2) % 2 == 0):
        TH = H // 2
        T = 2
    THp, THo, Wo, Ho = TH + 2, TH // stride, W // stride, H // stride
    manual_x = T > 1            # haloed row windows are DMA'd in-kernel

    kernel = functools.partial(
        _mv2_fused_kernel, TH=TH, W=W, T=T, stride=stride,
        has_expand=has_expand, use_res=use_res, manual_x=manual_x)

    if manual_x:
        x_spec = pl.BlockSpec(memory_space=pl.ANY)        # raw HBM ref, manual DMA
    else:
        x_spec = pl.BlockSpec((1, THp, Wp, Cin), lambda b, t: (b, 0, 0, 0))
    in_specs, args = [x_spec], [xp]
    if has_expand:
        in_specs += [_wspec(params["w1"]), _wspec(params["b1"])]
        args += [params["w1"], params["b1"]]
    in_specs += [_wspec(params["w_dw"]), _wspec(params["b2"]),
                 _wspec(params["w3"]), _wspec(params["b3"])]
    args += [params["w_dw"], params["b2"], params["w3"], params["b3"]]
    # TODO(synk): weight specs could be single-buffered
    # (pipeline_mode=pl.Buffered(1)) to trim resident VMEM on v7x.

    scratch_shapes = []
    if manual_x:
        scratch_shapes += [pltpu.VMEM((THp, Wp, Cin), jnp.float32),
                           pltpu.SemaphoreType.DMA((1,))]
    if has_expand:
        scratch_shapes += [pltpu.VMEM((THp, Wp, Ch), jnp.float32)]

    ws = _tile_working_set_bytes(TH, Wp, Cin, Ch, Cout, stride)
    wbytes = sum(int(a.nbytes) for a in args[1:])
    vmem_limit = int(max(32 * 1024 * 1024,
                         min(int(1.5 * (ws + 2 * wbytes)) + (8 << 20),
                             int(0.9 * vmem_cap))))

    # Advisory cost estimate (sigmoid = exp + reciprocal -> 2 transcendentals
    # per SiLU element).
    flops = 2 * 9 * B * T * TH * W * Ch + 2 * B * Ho * Wo * Ch * Cout
    transc = 2 * B * T * TH * W * Ch
    if has_expand:
        flops += 2 * B * T * THp * Wp * Cin * Ch
        transc += 2 * B * T * THp * Wp * Ch
    bytes_accessed = int(xp.nbytes) + B * Ho * Wo * Cout * 4 + wbytes

    out = pl.pallas_call(
        kernel,
        out_shape=jax.ShapeDtypeStruct((B, Ho, Wo, Cout), jnp.float32),
        grid=(B, T),
        in_specs=in_specs,
        out_specs=pl.BlockSpec((1, THo, Wo, Cout), lambda b, t: (b, t, 0, 0)),
        scratch_shapes=scratch_shapes,
        compiler_params=pltpu.CompilerParams(
            dimension_semantics=("parallel", "parallel"),
            vmem_limit_bytes=vmem_limit),
        cost_estimate=pl.CostEstimate(flops=int(flops),
                                      transcendentals=int(transc),
                                      bytes_accessed=int(bytes_accessed)),
    )(*args)
    return jnp.transpose(out, (0, 3, 1, 2))               # NHWC -> NCHW


# ---------------------------------------------------------------------------
# Pure-JAX reference (independent check of the fused Pallas kernel)
# ---------------------------------------------------------------------------
def mv2block_reference(params, x_nchw, *, stride=1, expansion=4):
    x = jnp.transpose(x_nchw, (0, 2, 3, 1)).astype(jnp.float32)
    B, H, W, Cin = x.shape
    h = x
    if expansion != 1:
        w1 = params["w1"]
        Ch = w1.shape[1]
        h = jnp.dot(x.reshape(-1, Cin).astype(jnp.bfloat16), w1,
                    preferred_element_type=jnp.float32).reshape(B, H, W, Ch)
        h = h + params["b1"].reshape(1, 1, 1, Ch)
        h = h * jax.nn.sigmoid(h)
    Ch = h.shape[-1]
    dw = lax.conv_general_dilated(
        h, params["w_dw"].reshape(3, 3, 1, Ch),
        window_strides=(stride, stride), padding=((1, 1), (1, 1)),
        dimension_numbers=("NHWC", "HWIO", "NHWC"),
        feature_group_count=Ch,
        precision=lax.Precision.HIGHEST)
    dw = dw + params["b2"].reshape(1, 1, 1, Ch)
    dw = dw * jax.nn.sigmoid(dw)
    Ho, Wo = dw.shape[1], dw.shape[2]
    w3 = params["w3"]
    Cout = w3.shape[1]
    out = jnp.dot(dw.reshape(-1, Ch).astype(jnp.bfloat16), w3,
                  preferred_element_type=jnp.float32).reshape(B, Ho, Wo, Cout)
    out = out + params["b3"].reshape(1, 1, 1, Cout)
    if stride == 1 and Cin == Cout:
        out = out + x
    return jnp.transpose(out, (0, 3, 1, 2))


if __name__ == "__main__":
    def _check(name, B, Cin, Hs, Ws, Cout, *, stride, expansion, **kw):
        x = jax.random.normal(jax.random.PRNGKey(0), (B, Cin, Hs, Ws), jnp.float32)
        params = make_mv2block_params(Cin, Cout, expansion=expansion, seed=42)
        y = jax.block_until_ready(
            mv2block_forward(params, x, stride=stride, expansion=expansion, **kw))
        y_ref = jax.block_until_ready(
            mv2block_reference(params, x, stride=stride, expansion=expansion))
        assert y.shape == (B, Cout, Hs // stride, Ws // stride), (name, y.shape)
        err = float(jnp.max(jnp.abs(y - y_ref)))
        # bf16 MXU operands + approx-reciprocal SiLU (EUP) in the kernel vs the
        # exact-sigmoid reference -> compare at the ~1e-2 level.
        assert jnp.allclose(y, y_ref, atol=2e-2, rtol=2e-2), (name, err)
        return err

    _check("expand_residual", 2, 4, 16, 16, 4, stride=1, expansion=4)
    _check("expand_stride2", 2, 4, 16, 16, 8, stride=2, expansion=4)
    _check("no_expand", 2, 4, 16, 16, 4, stride=1, expansion=1)
    _check("row_tiled_halo_dma", 2, 4, 16, 16, 4, stride=1, expansion=4,
           max_tile_rows=8)
    print("KERNEL_OK")
</pallas_src>

<mosaic_0001>
module attributes {stable_mosaic.version = 11 : i64} {
  func.func @_mv2_fused_kernel(%arg0: i32, %arg1: i32, %arg2: memref<1x18x24x4xf32, #tpu.memory_space<vmem>>, %arg3: memref<4x16xbf16, #tpu.memory_space<vmem>>, %arg4: memref<1x16xf32, #tpu.memory_space<vmem>>, %arg5: memref<9x16xf32, #tpu.memory_space<vmem>>, %arg6: memref<1x16xf32, #tpu.memory_space<vmem>>, %arg7: memref<16x4xbf16, #tpu.memory_space<vmem>>, %arg8: memref<1x4xf32, #tpu.memory_space<vmem>>, %arg9: memref<1x16x16x4xf32, #tpu.memory_space<vmem>>, %arg10: memref<18x24x16xf32, #tpu.memory_space<vmem>>) attributes {dimension_semantics = [#tpu.dimension_semantics<parallel>, #tpu.dimension_semantics<parallel>], iteration_bounds = array<i64: 2, 1>, scalar_prefetch = 0 : i64, scratch_operands = 1 : i64, tpu.core_type = #tpu.core_type<tc>, window_params = [{transform_indices = @transform_0, window_bounds = array<i64: 1, 18, 24, 4>}, {pipeline_mode = #tpu.pipeline_mode<synchronous>, transform_indices = @transform_1, window_bounds = array<i64: 4, 16>}, {pipeline_mode = #tpu.pipeline_mode<synchronous>, transform_indices = @transform_2, window_bounds = array<i64: 1, 16>}, {pipeline_mode = #tpu.pipeline_mode<synchronous>, transform_indices = @transform_3, window_bounds = array<i64: 9, 16>}, {pipeline_mode = #tpu.pipeline_mode<synchronous>, transform_indices = @transform_4, window_bounds = array<i64: 1, 16>}, {pipeline_mode = #tpu.pipeline_mode<synchronous>, transform_indices = @transform_5, window_bounds = array<i64: 16, 4>}, {pipeline_mode = #tpu.pipeline_mode<synchronous>, transform_indices = @transform_6, window_bounds = array<i64: 1, 4>}, {transform_indices = @transform_7, window_bounds = array<i64: 1, 16, 16, 4>}]} {
    %c0 = arith.constant 0 : index
    %c0_0 = arith.constant 0 : index
    %c0_1 = arith.constant 0 : index
    %c0_2 = arith.constant 0 : index
    %0 = vector.load %arg2[%c0, %c0_0, %c0_1, %c0_2] : memref<1x18x24x4xf32, #tpu.memory_space<vmem>>, vector<1x18x24x4xf32>
    %1 = vector.shape_cast %0 : vector<1x18x24x4xf32> to vector<18x24x4xf32>
    %2 = vector.shape_cast %1 : vector<18x24x4xf32> to vector<432x4xf32>
    %3 = arith.truncf %2 : vector<432x4xf32> to vector<432x4xbf16>
    %c0_3 = arith.constant 0 : index
    %c0_4 = arith.constant 0 : index
    %4 = vector.load %arg3[%c0_3, %c0_4] : memref<4x16xbf16, #tpu.memory_space<vmem>>, vector<4x16xbf16>
    %cst = arith.constant dense<0.000000e+00> : vector<432x16xf32>
    %5 = tpu.matmul %3, %4, %cst {dimension_numbers = #tpu.dot_dimension_numbers<[1], [0], [0], [1], [0, 0, 1, 1], [], []>} : vector<432x4xbf16>, vector<4x16xbf16>, vector<432x16xf32> -> vector<432x16xf32>
    %c0_5 = arith.constant 0 : index
    %c0_6 = arith.constant 0 : index
    %6 = vector.load %arg4[%c0_5, %c0_6] : memref<1x16xf32, #tpu.memory_space<vmem>>, vector<1x16xf32>
    %7 = vector.broadcast %6 : vector<1x16xf32> to vector<432x16xf32>
    %8 = arith.addf %5, %7 : vector<432x16xf32>
    %cst_7 = arith.constant 0.000000e+00 : f32
    %9 = vector.broadcast %cst_7 : f32 to vector<432x16xf32>
    %10 = arith.subf %9, %8 : vector<432x16xf32>
    %cst_8 = arith.constant 6.000000e+01 : f32
    %11 = vector.broadcast %cst_8 : f32 to vector<432x16xf32>
    %12 = arith.minimumf %10, %11 : vector<432x16xf32>
    %13 = math.exp %12 : vector<432x16xf32>
    %cst_9 = arith.constant 1.000000e+00 : f32
    %14 = vector.broadcast %cst_9 : f32 to vector<432x16xf32>
    %15 = arith.addf %14, %13 : vector<432x16xf32>
    %16 = tpu.reciprocal %15 {approx = true} : vector<432x16xf32> -> vector<432x16xf32>
    %17 = arith.mulf %8, %16 : vector<432x16xf32>
    %18 = vector.shape_cast %17 : vector<432x16xf32> to vector<18x24x16xf32>
    %c0_10 = arith.constant 0 : index
    %c0_11 = arith.constant 0 : index
    %c0_12 = arith.constant 0 : index
    %19 = vector.load %arg10[%c0_10, %c0_11, %c0_12] : memref<18x24x16xf32, #tpu.memory_space<vmem>>, vector<18x24x16xf32>
    tpu.vector_store %arg10[%c0_10, %c0_11, %c0_12], %18 {strides = array<i32>} : memref<18x24x16xf32, #tpu.memory_space<vmem>>, vector<18x24x16xf32>,
    %cst_13 = arith.constant 0.000000e+00 : f32
    %20 = vector.broadcast %cst_13 : f32 to vector<18x1x16xf32>
    %c0_14 = arith.constant 0 : index
    %c0_15 = arith.constant 0 : index
    %c0_16 = arith.constant 0 : index
    %21 = vector.load %arg10[%c0_14, %c0_15, %c0_16] : memref<18x24x16xf32, #tpu.memory_space<vmem>>, vector<18x1x16xf32>
    tpu.vector_store %arg10[%c0_14, %c0_15, %c0_16], %20 {strides = array<i32>} : memref<18x24x16xf32, #tpu.memory_space<vmem>>, vector<18x1x16xf32>,
    %c0_17 = arith.constant 0 : index
    %c17 = arith.constant 17 : index
    %c0_18 = arith.constant 0 : index
    %22 = vector.load %arg10[%c0_17, %c17, %c0_18] : memref<18x24x16xf32, #tpu.memory_space<vmem>>, vector<18x1x16xf32>
    tpu.vector_store %arg10[%c0_17, %c17, %c0_18], %20 {strides = array<i32>} : memref<18x24x16xf32, #tpu.memory_space<vmem>>, vector<18x1x16xf32>,
    %cst_19 = arith.constant 0.000000e+00 : f32
    %23 = vector.broadcast %cst_19 : f32 to vector<1x24x16xf32>
    %c0_i32 = arith.constant 0 : i32
    %24 = arith.cmpi eq, %arg1, %c0_i32 : i32
    %25 = arith.extui %24 : i1 to i32
    %c0_i32_20 = arith.constant 0 : i32
    %26 = arith.cmpi ne, %25, %c0_i32_20 : i32
    scf.if %26 {
      %c0_69 = arith.constant 0 : index
      %c0_70 = arith.constant 0 : index
      %c0_71 = arith.constant 0 : index
      %123 = vector.load %arg10[%c0_69, %c0_70, %c0_71] : memref<18x24x16xf32, #tpu.memory_space<vmem>>, vector<1x24x16xf32>
      tpu.vector_store %arg10[%c0_69, %c0_70, %c0_71], %23 {strides = array<i32>} : memref<18x24x16xf32, #tpu.memory_space<vmem>>, vector<1x24x16xf32>,
    } else {
    }
    %c0_i32_21 = arith.constant 0 : i32
    %27 = arith.cmpi eq, %arg1, %c0_i32_21 : i32
    %28 = arith.extui %27 : i1 to i32
    %c0_i32_22 = arith.constant 0 : i32
    %29 = arith.cmpi ne, %28, %c0_i32_22 : i32
    scf.if %29 {
      %c17_69 = arith.constant 17 : index
      %c0_70 = arith.constant 0 : index
      %c0_71 = arith.constant 0 : index
      %123 = vector.load %arg10[%c17_69, %c0_70, %c0_71] : memref<18x24x16xf32, #tpu.memory_space<vmem>>, vector<1x24x16xf32>
      tpu.vector_store %arg10[%c17_69, %c0_70, %c0_71], %23 {strides = array<i32>} : memref<18x24x16xf32, #tpu.memory_space<vmem>>, vector<1x24x16xf32>,
    } else {
    }
    %c0_23 = arith.constant 0 : index
    %c0_24 = arith.constant 0 : index
    %30 = vector.load %arg5[%c0_23, %c0_24] : memref<9x16xf32, #tpu.memory_space<vmem>>, vector<9x16xf32>
    %cst_25 = arith.constant 0.000000e+00 : f32
    %31 = vector.broadcast %cst_25 : f32 to vector<16x16x16xf32>
    %c0_26 = arith.constant 0 : index
    %c0_27 = arith.constant 0 : index
    %c0_28 = arith.constant 0 : index
    %32 = vector.load %arg10[%c0_26, %c0_27, %c0_28] : memref<18x24x16xf32, #tpu.memory_space<vmem>>, vector<16x16x16xf32>
    %33 = vector.extract_strided_slice %30 {offsets = [0, 0], sizes = [1, 16], strides = [1, 1]} : vector<9x16xf32> to vector<1x16xf32>
    %34 = vector.shape_cast %33 : vector<1x16xf32> to vector<16xf32>
    %35 = vector.shape_cast %34 : vector<16xf32> to vector<1x1x16xf32>
    %36 = vector.broadcast %35 : vector<1x1x16xf32> to vector<16x16x16xf32>
    %37 = arith.mulf %32, %36 : vector<16x16x16xf32>
    %38 = arith.addf %31, %37 : vector<16x16x16xf32>
    %c0_29 = arith.constant 0 : index
    %c1 = arith.constant 1 : index
    %c0_30 = arith.constant 0 : index
    %39 = vector.load %arg10[%c0_29, %c1, %c0_30] : memref<18x24x16xf32, #tpu.memory_space<vmem>>, vector<16x16x16xf32>
    %40 = vector.extract_strided_slice %30 {offsets = [1, 0], sizes = [1, 16], strides = [1, 1]} : vector<9x16xf32> to vector<1x16xf32>
    %41 = vector.shape_cast %40 : vector<1x16xf32> to vector<16xf32>
    %42 = vector.shape_cast %41 : vector<16xf32> to vector<1x1x16xf32>
    %43 = vector.broadcast %42 : vector<1x1x16xf32> to vector<16x16x16xf32>
    %44 = arith.mulf %39, %43 : vector<16x16x16xf32>
    %45 = arith.addf %38, %44 : vector<16x16x16xf32>
    %c0_31 = arith.constant 0 : index
    %c2 = arith.constant 2 : index
    %c0_32 = arith.constant 0 : index
    %46 = vector.load %arg10[%c0_31, %c2, %c0_32] : memref<18x24x16xf32, #tpu.memory_space<vmem>>, vector<16x16x16xf32>
    %47 = vector.extract_strided_slice %30 {offsets = [2, 0], sizes = [1, 16], strides = [1, 1]} : vector<9x16xf32> to vector<1x16xf32>
    %48 = vector.shape_cast %47 : vector<1x16xf32> to vector<16xf32>
    %49 = vector.shape_cast %48 : vector<16xf32> to vector<1x1x16xf32>
    %50 = vector.broadcast %49 : vector<1x1x16xf32> to vector<16x16x16xf32>
    %51 = arith.mulf %46, %50 : vector<16x16x16xf32>
    %52 = arith.addf %45, %51 : vector<16x16x16xf32>
    %c1_33 = arith.constant 1 : index
    %c0_34 = arith.constant 0 : index
    %c0_35 = arith.constant 0 : index
    %53 = vector.load %arg10[%c1_33, %c0_34, %c0_35] : memref<18x24x16xf32, #tpu.memory_space<vmem>>, vector<16x16x16xf32>
    %54 = vector.extract_strided_slice %30 {offsets = [3, 0], sizes = [1, 16], strides = [1, 1]} : vector<9x16xf32> to vector<1x16xf32>
    %55 = vector.shape_cast %54 : vector<1x16xf32> to vector<16xf32>
    %56 = vector.shape_cast %55 : vector<16xf32> to vector<1x1x16xf32>
    %57 = vector.broadcast %56 : vector<1x1x16xf32> to vector<16x16x16xf32>
    %58 = arith.mulf %53, %57 : vector<16x16x16xf32>
    %59 = arith.addf %52, %58 : vector<16x16x16xf32>
    %c1_36 = arith.constant 1 : index
    %c1_37 = arith.constant 1 : index
    %c0_38 = arith.constant 0 : index
    %60 = vector.load %arg10[%c1_36, %c1_37, %c0_38] : memref<18x24x16xf32, #tpu.memory_space<vmem>>, vector<16x16x16xf32>
    %61 = vector.extract_strided_slice %30 {offsets = [4, 0], sizes = [1, 16], strides = [1, 1]} : vector<9x16xf32> to vector<1x16xf32>
    %62 = vector.shape_cast %61 : vector<1x16xf32> to vector<16xf32>
    %63 = vector.shape_cast %62 : vector<16xf32> to vector<1x1x16xf32>
    %64 = vector.broadcast %63 : vector<1x1x16xf32> to vector<16x16x16xf32>
    %65 = arith.mulf %60, %64 : vector<16x16x16xf32>
    %66 = arith.addf %59, %65 : vector<16x16x16xf32>
    %c1_39 = arith.constant 1 : index
    %c2_40 = arith.constant 2 : index
    %c0_41 = arith.constant 0 : index
    %67 = vector.load %arg10[%c1_39, %c2_40, %c0_41] : memref<18x24x16xf32, #tpu.memory_space<vmem>>, vector<16x16x16xf32>
    %68 = vector.extract_strided_slice %30 {offsets = [5, 0], sizes = [1, 16], strides = [1, 1]} : vector<9x16xf32> to vector<1x16xf32>
    %69 = vector.shape_cast %68 : vector<1x16xf32> to vector<16xf32>
    %70 = vector.shape_cast %69 : vector<16xf32> to vector<1x1x16xf32>
    %71 = vector.broadcast %70 : vector<1x1x16xf32> to vector<16x16x16xf32>
    %72 = arith.mulf %67, %71 : vector<16x16x16xf32>
    %73 = arith.addf %66, %72 : vector<16x16x16xf32>
    %c2_42 = arith.constant 2 : index
    %c0_43 = arith.constant 0 : index
    %c0_44 = arith.constant 0 : index
    %74 = vector.load %arg10[%c2_42, %c0_43, %c0_44] : memref<18x24x16xf32, #tpu.memory_space<vmem>>, vector<16x16x16xf32>
    %75 = vector.extract_strided_slice %30 {offsets = [6, 0], sizes = [1, 16], strides = [1, 1]} : vector<9x16xf32> to vector<1x16xf32>
    %76 = vector.shape_cast %75 : vector<1x16xf32> to vector<16xf32>
    %77 = vector.shape_cast %76 : vector<16xf32> to vector<1x1x16xf32>
    %78 = vector.broadcast %77 : vector<1x1x16xf32> to vector<16x16x16xf32>
    %79 = arith.mulf %74, %78 : vector<16x16x16xf32>
    %80 = arith.addf %73, %79 : vector<16x16x16xf32>
    %c2_45 = arith.constant 2 : index
    %c1_46 = arith.constant 1 : index
    %c0_47 = arith.constant 0 : index
    %81 = vector.load %arg10[%c2_45, %c1_46, %c0_47] : memref<18x24x16xf32, #tpu.memory_space<vmem>>, vector<16x16x16xf32>
    %82 = vector.extract_strided_slice %30 {offsets = [7, 0], sizes = [1, 16], strides = [1, 1]} : vector<9x16xf32> to vector<1x16xf32>
    %83 = vector.shape_cast %82 : vector<1x16xf32> to vector<16xf32>
    %84 = vector.shape_cast %83 : vector<16xf32> to vector<1x1x16xf32>
    %85 = vector.broadcast %84 : vector<1x1x16xf32> to vector<16x16x16xf32>
    %86 = arith.mulf %81, %85 : vector<16x16x16xf32>
    %87 = arith.addf %80, %86 : vector<16x16x16xf32>
    %c2_48 = arith.constant 2 : index
    %c2_49 = arith.constant 2 : index
    %c0_50 = arith.constant 0 : index
    %88 = vector.load %arg10[%c2_48, %c2_49, %c0_50] : memref<18x24x16xf32, #tpu.memory_space<vmem>>, vector<16x16x16xf32>
    %89 = vector.extract_strided_slice %30 {offsets = [8, 0], sizes = [1, 16], strides = [1, 1]} : vector<9x16xf32> to vector<1x16xf32>
    %90 = vector.shape_cast %89 : vector<1x16xf32> to vector<16xf32>
    %91 = vector.shape_cast %90 : vector<16xf32> to vector<1x1x16xf32>
    %92 = vector.broadcast %91 : vector<1x1x16xf32> to vector<16x16x16xf32>
    %93 = arith.mulf %88, %92 : vector<16x16x16xf32>
    %94 = arith.addf %87, %93 : vector<16x16x16xf32>
    %c0_51 = arith.constant 0 : index
    %c0_52 = arith.constant 0 : index
    %95 = vector.load %arg6[%c0_51, %c0_52] : memref<1x16xf32, #tpu.memory_space<vmem>>, vector<1x16xf32>
    %96 = vector.shape_cast %95 : vector<1x16xf32> to vector<1x1x16xf32>
    %97 = vector.broadcast %96 : vector<1x1x16xf32> to vector<16x16x16xf32>
    %98 = arith.addf %94, %97 : vector<16x16x16xf32>
    %cst_53 = arith.constant 0.000000e+00 : f32
    %99 = vector.broadcast %cst_53 : f32 to vector<16x16x16xf32>
    %100 = arith.subf %99, %98 : vector<16x16x16xf32>
    %cst_54 = arith.constant 6.000000e+01 : f32
    %101 = vector.broadcast %cst_54 : f32 to vector<16x16x16xf32>
    %102 = arith.minimumf %100, %101 : vector<16x16x16xf32>
    %103 = math.exp %102 : vector<16x16x16xf32>
    %cst_55 = arith.constant 1.000000e+00 : f32
    %104 = vector.broadcast %cst_55 : f32 to vector<16x16x16xf32>
    %105 = arith.addf %104, %103 : vector<16x16x16xf32>
    %106 = tpu.reciprocal %105 {approx = true} : vector<16x16x16xf32> -> vector<16x16x16xf32>
    %107 = arith.mulf %98, %106 : vector<16x16x16xf32>
    %108 = vector.shape_cast %107 : vector<16x16x16xf32> to vector<256x16xf32>
    %109 = arith.truncf %108 : vector<256x16xf32> to vector<256x16xbf16>
    %c0_56 = arith.constant 0 : index
    %c0_57 = arith.constant 0 : index
    %110 = vector.load %arg7[%c0_56, %c0_57] : memref<16x4xbf16, #tpu.memory_space<vmem>>, vector<16x4xbf16>
    %cst_58 = arith.constant dense<0.000000e+00> : vector<256x4xf32>
    %111 = tpu.matmul %109, %110, %cst_58 {dimension_numbers = #tpu.dot_dimension_numbers<[1], [0], [0], [1], [0, 0, 1, 1], [], []>} : vector<256x16xbf16>, vector<16x4xbf16>, vector<256x4xf32> -> vector<256x4xf32>
    %c0_59 = arith.constant 0 : index
    %c0_60 = arith.constant 0 : index
    %112 = vector.load %arg8[%c0_59, %c0_60] : memref<1x4xf32, #tpu.memory_space<vmem>>, vector<1x4xf32>
    %113 = vector.broadcast %112 : vector<1x4xf32> to vector<256x4xf32>
    %114 = arith.addf %111, %113 : vector<256x4xf32>
    %c0_61 = arith.constant 0 : index
    %c1_62 = arith.constant 1 : index
    %c1_63 = arith.constant 1 : index
    %c0_64 = arith.constant 0 : index
    %115 = vector.load %arg2[%c0_61, %c1_62, %c1_63, %c0_64] : memref<1x18x24x4xf32, #tpu.memory_space<vmem>>, vector<1x16x16x4xf32>
    %116 = vector.shape_cast %115 : vector<1x16x16x4xf32> to vector<16x16x4xf32>
    %117 = vector.shape_cast %116 : vector<16x16x4xf32> to vector<256x4xf32>
    %118 = arith.addf %114, %117 : vector<256x4xf32>
    %119 = vector.shape_cast %118 : vector<256x4xf32> to vector<16x16x4xf32>
    %c0_65 = arith.constant 0 : index
    %c0_66 = arith.constant 0 : index
    %c0_67 = arith.constant 0 : index
    %c0_68 = arith.constant 0 : index
    %120 = vector.load %arg9[%c0_65, %c0_66, %c0_67, %c0_68] : memref<1x16x16x4xf32, #tpu.memory_space<vmem>>, vector<1x16x16x4xf32>
    %121 = vector.shape_cast %120 : vector<1x16x16x4xf32> to vector<16x16x4xf32>
    %122 = vector.shape_cast %119 : vector<16x16x4xf32> to vector<1x16x16x4xf32>
    tpu.vector_store %arg9[%c0_65, %c0_66, %c0_67, %c0_68], %122 {strides = array<i32>} : memref<1x16x16x4xf32, #tpu.memory_space<vmem>>, vector<1x16x16x4xf32>,
    return
  }
  func.func @transform_0(%arg0: i32, %arg1: i32) -> (i32, i32, i32, i32) {
    %c0_i32 = arith.constant 0 : i32
    %c0_i32_0 = arith.constant 0 : i32
    %c0_i32_1 = arith.constant 0 : i32
    %c0_i32_2 = arith.constant 0 : i32
    return %arg0, %c0_i32, %c0_i32_0, %c0_i32_1 : i32, i32, i32, i32
  }
  func.func @transform_1(%arg0: i32, %arg1: i32) -> (i32, i32) {
    %c0_i32 = arith.constant 0 : i32
    %c0_i32_0 = arith.constant 0 : i32
    %c0_i32_1 = arith.constant 0 : i32
    return %c0_i32, %c0_i32_0 : i32, i32
  }
  func.func @transform_2(%arg0: i32, %arg1: i32) -> (i32, i32) {
    %c0_i32 = arith.constant 0 : i32
    %c0_i32_0 = arith.constant 0 : i32
    %c0_i32_1 = arith.constant 0 : i32
    return %c0_i32, %c0_i32_0 : i32, i32
  }
  func.func @transform_3(%arg0: i32, %arg1: i32) -> (i32, i32) {
    %c0_i32 = arith.constant 0 : i32
    %c0_i32_0 = arith.constant 0 : i32
    %c0_i32_1 = arith.constant 0 : i32
    return %c0_i32, %c0_i32_0 : i32, i32
  }
  func.func @transform_4(%arg0: i32, %arg1: i32) -> (i32, i32) {
    %c0_i32 = arith.constant 0 : i32
    %c0_i32_0 = arith.constant 0 : i32
    %c0_i32_1 = arith.constant 0 : i32
    return %c0_i32, %c0_i32_0 : i32, i32
  }
  func.func @transform_5(%arg0: i32, %arg1: i32) -> (i32, i32) {
    %c0_i32 = arith.constant 0 : i32
    %c0_i32_0 = arith.constant 0 : i32
    %c0_i32_1 = arith.constant 0 : i32
    return %c0_i32, %c0_i32_0 : i32, i32
  }
  func.func @transform_6(%arg0: i32, %arg1: i32) -> (i32, i32) {
    %c0_i32 = arith.constant 0 : i32
    %c0_i32_0 = arith.constant 0 : i32
    %c0_i32_1 = arith.constant 0 : i32
    return %c0_i32, %c0_i32_0 : i32, i32
  }
  func.func @transform_7(%arg0: i32, %arg1: i32) -> (i32, i32, i32, i32) {
    %c0_i32 = arith.constant 0 : i32
    %c0_i32_0 = arith.constant 0 : i32
    %c0_i32_1 = arith.constant 0 : i32
    return %arg0, %arg1, %c0_i32, %c0_i32_0 : i32, i32, i32, i32
  }
}

</mosaic_0001>

<bundles_post_ra>
// kernel: tpu_custom_call.1
= control target key start
LH: loop header
LB: loop body
LE: loop exit
PB: predicated region body
PF: predicated region fallthrough
CT: control target
= control target key end

     0   :  { %s3526_s24 = smov 0   ;;  %s3528_s25 = smov 0   ;;  %s5221_s0 = inlined_call_operand.vmem [shape: f32[2,18,24,4], index: 0, kind: input, shape index: {}]   ;;  %s5222_s1 = inlined_call_operand.vmem [shape: bf16[4,16], index: 1, kind: input, shape index: {}]   ;;  %s5223_s2 = inlined_call_operand.vmem [shape: f32[1,16], index: 2, kind: input, shape index: {}]   ;;  %s5224_s3 = inlined_call_operand.vmem [shape: f32[9,16], index: 3, kind: input, shape index: {}]   ;;  %s5225_s4 = inlined_call_operand.vmem [shape: f32[1,16], index: 4, kind: input, shape index: {}]   ;;  %s5226_s5 = inlined_call_operand.vmem [shape: bf16[16,4], index: 5, kind: input, shape index: {}]   ;;  %s5227_s6 = inlined_call_operand.vmem [shape: f32[1,4], index: 6, kind: input, shape index: {}]   ;;  %s5228_s7 = inlined_call_operand.vmem [shape: f32[2,16,16,4], index: 7, kind: output, shape index: {}]  }
   0x1   :  { %s3530_s26 = smov 0  }
   0x2 LB: > { %s29_s27 = sadd.s32 1, %s3478_s25  ;;  %p2805_p0 = scmp.ge.s32.totalorder %s3482_s26, 1  ;;  %s3482_s26 = sphi %s3530_s26, %s17_s26   ;;  %s3478_s25 = sphi %s3528_s25, %s5230_s25   ;;  %s3474_s24 = sphi %s3526_s24, %s5229_s24  }
   0x3   : > { %p31_p1 = scmp.ge.s32.totalorder %s29_s27, 2  ;;  %p251_p2 = scmp.lt.s32.totalorder %s3482_s26, 3 }
   0x5   : > { %s5232_s27 = smov (%p31_p1, %s29_s27), 0  ;;  %p252_p3 = pnand %p2805_p0, %p251_p2 }
   0x6   : > { %v386_v0 = vld [vmem:[%s5222_s1] sm:$0x3] (!%p252_p3)  ;;  %vm476_vm0 = vcmask (!%p252_p3), 1041408   ;;  %p288_p4 = scmp.lt.s32.totalorder (!%p252_p3), %s3474_s24, 1  ;;  %v3484_v1 = vmov (!%p252_p3), 0.0   ;;  %vm3485_vm1 = vmmov (!%p252_p3), 0  }
   0x7   : > { %255 = sbr.rel (%p252_p3) target bundleno = 813 (0x32d), region = 48  ;;  %2937 = vmatprep.subr.bf16.mxu0 (!%p252_p3), %v3484_v1  ;;  %v478_v2 = vsel (!%p252_p3), %vm476_vm0, %v386_v0, 0  ;;  %2939 = vmatprep.mubr.msk.bf16.mxu0 (!%p252_p3), %vm3485_vm1, %v3484_v1  ;;  %vm394_vm2 = vcmask (!%p252_p3), 31744   ;;  %vm1107_vm3 = vcmask (!%p252_p3), 130048   ;;  %vm1162_vm4 = vcmask (!%p252_p3), 122880  }
   0x8   : > { %2938 = vmatpush3.bf16.msra.mxu0 (!%p252_p3), %v478_v2  ;;  %3081 = vmatprep.subr.bf16.mxu1 (!%p252_p3), %v3484_v1 }
   0x9   : > { %3082 = vmatpush3.bf16.msra.mxu1 (!%p252_p3), %v478_v2  ;;  %3011 = vmatprep.mubr.msk.bf16.mxu1 (!%p252_p3), %vm3485_vm1, %v3484_v1 }
   0xe   : > { %s5234_s24 = smov (!%p288_p4, %s3474_s24), 1 }
   0xf   : > { %s3083_s30 = smul.u32 432, %s5234_s24  ;;  %s2891_s15 = sshll.u32 %s5234_s24, 8 }
  0x10   : > { %s5085_s18 = scalar_lea.vmem %s5228_s7, %s2891_s15 }
  0x11   : > { %s3559_s10 = scalar_lea.vmem %s5221_s0, %s3083_s30 }
  0x12   : > { %v305_v3 = vld [vmem:[%s3559_s10] sm:$0xff]  ;;  %v306_v4 = vld [vmem:[%s3559_s10 + $0x8] sm:$0xff]  ;;  %v307_v9 = vld [vmem:[%s3559_s10 + $0x10] sm:$0xff] }
  0x13   : > { %v359_v5 = vpack.c.bf16 %v306_v4, %v305_v3  ;;  %v341_v6 = vld [vmem:[%s3559_s10 + $0x120] sm:$0xff]  ;;  %v342_v7 = vld [vmem:[%s3559_s10 + $0x128] sm:$0xff]  ;;  %v308_v10 = vld [vmem:[%s3559_s10 + $0x18] sm:$0xff] }
  0x14   : > { %v377_v8 = vpack.c.bf16 %v342_v7, %v341_v6  ;;  %v343_v11 = vld [vmem:[%s3559_s10 + $0x130] sm:$0xff]  ;;  %v344_v12 = vld [vmem:[%s3559_s10 + $0x138] sm:$0xff]  ;;  %v360_v13 = vpack.c.bf16 %v308_v10, %v307_v9  ;;  %v309_v15 = vld [vmem:[%s3559_s10 + $0x20] sm:$0xff] }
  0x15   : > { %2940 = vmatmul.mubr.msk.bf16.vlgmr.msra.gmra.mrb[0].mxu0 %vm394_vm2, %v359_v5  ;;  %v378_v14 = vpack.c.bf16 %v344_v12, %v343_v11  ;;  %v310_v16 = vld [vmem:[%s3559_s10 + $0x28] sm:$0xff]  ;;  %v345_v17 = vld [vmem:[%s3559_s10 + $0x140] sm:$0xff]  ;;  %v311_v21 = vld [vmem:[%s3559_s10 + $0x30] sm:$0xff] }
  0x16   : > { %2943 = vmatprep.mubr.msk.bf16.mxu0 %vm3485_vm1, %v3484_v1  ;;  %3012 = vmatmul.mubr.msk.bf16.vlgmr.msra.gmra.mrb[0].mxu1 %vm394_vm2, %v377_v8  ;;  %v346_v18 = vld [vmem:[%s3559_s10 + $0x148] sm:$0xff]  ;;  %v361_v19 = vpack.c.bf16 %v310_v16, %v309_v15  ;;  %v312_v22 = vld [vmem:[%s3559_s10 + $0x38] sm:$0xff]  ;;  %v347_v23 = vld [vmem:[%s3559_s10 + $0x150] sm:$0xff] }
  0x17   : > { %3015 = vmatprep.mubr.msk.bf16.mxu1 %vm3485_vm1, %v3484_v1  ;;  %v379_v20 = vpack.c.bf16 %v346_v18, %v345_v17  ;;  %v348_v24 = vld [vmem:[%s3559_s10 + $0x158] sm:$0xff]  ;;  %v362_v25 = vpack.c.bf16 %v312_v22, %v311_v21  ;;  %v313_v27 = vld [vmem:[%s3559_s10 + $0x40] sm:$0xff]  ;;  %v314_v28 = vld [vmem:[%s3559_s10 + $0x48] sm:$0xff] }
  0x18   : > { %v380_v26 = vpack.c.bf16 %v348_v24, %v347_v23  ;;  %v349_v29 = vld [vmem:[%s3559_s10 + $0x160] sm:$0xff]  ;;  %v350_v30 = vld [vmem:[%s3559_s10 + $0x168] sm:$0xff]  ;;  %v363_v31 = vpack.c.bf16 %v314_v28, %v313_v27  ;;  %v315_v33 = vld [vmem:[%s3559_s10 + $0x50] sm:$0xff] }
  0x19   : > { %v381_v32 = vpack.c.bf16 %v350_v30, %v349_v29  ;;  %v316_v34 = vld [vmem:[%s3559_s10 + $0x58] sm:$0xff]  ;;  %v351_v35 = vld [vmem:[%s3559_s10 + $0x170] sm:$0xff]  ;;  %v317_v39 = vld [vmem:[%s3559_s10 + $0x60] sm:$0xff] }
  0x1a   : > { %v352_v36 = vld [vmem:[%s3559_s10 + $0x178] sm:$0xff]  ;;  %v364_v37 = vpack.c.bf16 %v316_v34, %v315_v33  ;;  %v318_v40 = vld [vmem:[%s3559_s10 + $0x68] sm:$0xff]  ;;  %v353_v41 = vld [vmem:[%s3559_s10 + $0x180] sm:$0xff] }
  0x1b   : > { %v382_v38 = vpack.c.bf16 %v352_v36, %v351_v35  ;;  %v354_v42 = vld [vmem:[%s3559_s10 + $0x188] sm:$0xff]  ;;  %v365_v43 = vpack.c.bf16 %v318_v40, %v317_v39  ;;  %v319_v45 = vld [vmem:[%s3559_s10 + $0x70] sm:$0xff]  ;;  %v320_v46 = vld [vmem:[%s3559_s10 + $0x78] sm:$0xff] }
  0x1c   : > { %v383_v44 = vpack.c.bf16 %v354_v42, %v353_v41  ;;  %v355_v47 = vld [vmem:[%s3559_s10 + $0x190] sm:$0xff]  ;;  %v356_v48 = vld [vmem:[%s3559_s10 + $0x198] sm:$0xff]  ;;  %v366_v49 = vpack.c.bf16 %v320_v46, %v319_v45  ;;  %v321_v51 = vld [vmem:[%s3559_s10 + $0x80] sm:$0xff] }
  0x1d   : > { %2944 = vmatmul.mubr.msk.bf16.gmra.mrb[4].mxu0 %vm394_vm2, %v360_v13  ;;  %v384_v50 = vpack.c.bf16 %v356_v48, %v355_v47  ;;  %v322_v52 = vld [vmem:[%s3559_s10 + $0x88] sm:$0xff]  ;;  %v357_v53 = vld [vmem:[%s3559_s10 + $0x1a0] sm:$0xff]  ;;  %v323_v57 = vld [vmem:[%s3559_s10 + $0x90] sm:$0xff] }
  0x1e   : > { %2947 = vmatprep.mubr.msk.bf16.mxu0 %vm3485_vm1, %v3484_v1  ;;  %3016 = vmatmul.mubr.msk.bf16.gmra.mrb[4].mxu1 %vm394_vm2, %v378_v14  ;;  %v358_v54 = vld [vmem:[%s3559_s10 + $0x1a8] sm:$0xff]  ;;  %v367_v55 = vpack.c.bf16 %v322_v52, %v321_v51  ;;  %v324_v58 = vld [vmem:[%s3559_s10 + $0x98] sm:$0xff]  ;;  %v325_v60 = vld [vmem:[%s3559_s10 + $0xa0] sm:$0xff] }
  0x1f   : > { %3019 = vmatprep.mubr.msk.bf16.mxu1 %vm3485_vm1, %v3484_v1  ;;  %v385_v56 = vpack.c.bf16 %v358_v54, %v357_v53  ;;  %v368_v59 = vpack.c.bf16 %v324_v58, %v323_v57  ;;  %v326_v61 = vld [vmem:[%s3559_s10 + $0xa8] sm:$0xff]  ;;  %v327_v63 = vld [vmem:[%s3559_s10 + $0xb0] sm:$0xff]  ;;  %v328_v0 = vld [vmem:[%s3559_s10 + $0xb8] sm:$0xff] }
  0x20   : > { %v369_v62 = vpack.c.bf16 %v326_v61, %v325_v60  ;;  %v370_v2 = vpack.c.bf16 %v328_v0, %v327_v63  ;;  %v329_v3 = vld [vmem:[%s3559_s10 + $0xc0] sm:$0xff]  ;;  %v330_v4 = vld [vmem:[%s3559_s10 + $0xc8] sm:$0xff]  ;;  %v331_v6 = vld [vmem:[%s3559_s10 + $0xd0] sm:$0xff] }
  0x21   : > { %v371_v5 = vpack.c.bf16 %v330_v4, %v329_v3  ;;  %v332_v7 = vld [vmem:[%s3559_s10 + $0xd8] sm:$0xff]  ;;  %v333_v9 = vld [vmem:[%s3559_s10 + $0xe0] sm:$0xff]  ;;  %v334_v10 = vld [vmem:[%s3559_s10 + $0xe8] sm:$0xff] }
  0x22   : > { %v372_v8 = vpack.c.bf16 %v332_v7, %v331_v6  ;;  %v373_v11 = vpack.c.bf16 %v334_v10, %v333_v9  ;;  %v335_v12 = vld [vmem:[%s3559_s10 + $0xf0] sm:$0xff]  ;;  %v336_v13 = vld [vmem:[%s3559_s10 + $0xf8] sm:$0xff]  ;;  %v337_v15 = vld [vmem:[%s3559_s10 + $0x100] sm:$0xff] }
  0x23   : > { %v374_v14 = vpack.c.bf16 %v336_v13, %v335_v12  ;;  %v338_v16 = vld [vmem:[%s3559_s10 + $0x108] sm:$0xff]  ;;  %v339_v18 = vld [vmem:[%s3559_s10 + $0x110] sm:$0xff]  ;;  %v3695_v21 = vld [vmem:[%s5223_s2] ss:$0 sm:$0xff] }
  0x24   : > { %v375_v17 = vpack.c.bf16 %v338_v16, %v337_v15  ;;  %v3735_v3 = vld [vmem:[%s5224_s3] sm:$0xff] }
  0x25   : > { %2948 = vmatmul.mubr.msk.bf16.gmra.mrb[8].mxu0 %vm394_vm2, %v361_v19  ;;  %v340_v19 = vld [vmem:[%s3559_s10 + $0x118] sm:$0xff] }
  0x26   : > { %2951 = vmatprep.mubr.msk.bf16.mxu0 %vm3485_vm1, %v3484_v1  ;;  %3020 = vmatmul.mubr.msk.bf16.gmra.mrb[8].mxu1 %vm394_vm2, %v379_v20  ;;  %v376_v20 = vpack.c.bf16 %v340_v19, %v339_v18 }
  0x27   : > { %3023 = vmatprep.mubr.msk.bf16.mxu1 %vm3485_vm1, %v3484_v1 }
  0x2d   : > { %2952 = vmatmul.mubr.msk.bf16.gmra.mrb[12].mxu0 %vm394_vm2, %v362_v25 }
  0x2e   : > { %2955 = vmatprep.mubr.msk.bf16.mxu0 %vm3485_vm1, %v3484_v1  ;;  %3024 = vmatmul.mubr.msk.bf16.gmra.mrb[12].mxu1 %vm394_vm2, %v380_v26 }
  0x2f   : > { %3027 = vmatprep.mubr.msk.bf16.mxu1 %vm3485_vm1, %v3484_v1 }
  0x35   : > { %2956 = vmatmul.mubr.msk.bf16.gmra.mrb[16].mxu0 %vm394_vm2, %v363_v31 }
  0x36   : > { %2959 = vmatprep.mubr.msk.bf16.mxu0 %vm3485_vm1, %v3484_v1  ;;  %3028 = vmatmul.mubr.msk.bf16.gmra.mrb[16].mxu1 %vm394_vm2, %v381_v32  ;;  %v1244_v32 = vlaneseq }
  0x37   : > { %3031 = vmatprep.mubr.msk.bf16.mxu1 %vm3485_vm1, %v3484_v1 }
  0x3d   : > { %2960 = vmatmul.mubr.msk.bf16.gmra.mrb[20].mxu0 %vm394_vm2, %v364_v37 }
  0x3e   : > { %2963 = vmatprep.mubr.msk.bf16.mxu0 %vm3485_vm1, %v3484_v1  ;;  %3032 = vmatmul.mubr.msk.bf16.gmra.mrb[20].mxu1 %vm394_vm2, %v382_v38 }
  0x3f   : > { %3035 = vmatprep.mubr.msk.bf16.mxu1 %vm3485_vm1, %v3484_v1 }
  0x45   : > { %2964 = vmatmul.mubr.msk.bf16.gmra.mrb[24].mxu0 %vm394_vm2, %v365_v43  ;;  %v3713_v43 = vshrl.u32 %v1244_v32, 7 }
  0x46   : > { %2967 = vmatprep.mubr.msk.bf16.mxu0 %vm3485_vm1, %v3484_v1  ;;  %3036 = vmatmul.mubr.msk.bf16.gmra.mrb[24].mxu1 %vm394_vm2, %v383_v44 }
  0x47   : > { %3039 = vmatprep.mubr.msk.bf16.mxu1 %vm3485_vm1, %v3484_v1  ;;  %v1246_v57 = vsub.s32 0, %v3713_v43  ;;  %v1346_v60 = vsub.s32 1, %v3713_v43  ;;  %v1446_v4 = vsub.s32 2, %v3713_v43  ;;  %v1547_v7 = vsub.s32 3, %v3713_v43 }
  0x49   : > { %v3741_v10 = vrot.slane %v3735_v3, %v1246_v57  ;;  %v3744_v12 = vrot.slane %v3735_v3, %v1346_v60  ;;  %v3750_v19 = vrot.slane %v3735_v3, %v1446_v4 }
  0x4d   : > { %2968 = vmatmul.mubr.msk.bf16.gmra.mrb[28].mxu0 %vm394_vm2, %v366_v49 }
  0x4e   : > { %2971 = vmatprep.mubr.msk.bf16.mxu0 %vm3485_vm1, %v3484_v1  ;;  %3040 = vmatmul.mubr.msk.bf16.gmra.mrb[28].mxu1 %vm394_vm2, %v384_v50 }
  0x4f   : > { %3043 = vmatprep.mubr.msk.bf16.mxu1 %vm3485_vm1, %v3484_v1 }
  0x55   : > { %2972 = vmatmul.mubr.msk.bf16.gmra.mrb[32].mxu0 %vm394_vm2, %v367_v55 }
  0x56   : > { %2975 = vmatprep.mubr.msk.bf16.mxu0 %vm3485_vm1, %v3484_v1  ;;  %3044 = vmatmul.mubr.msk.bf16.gmra.mrb[32].mxu1 %vm394_vm2, %v385_v56 }
  0x5d   : > { %2976 = vmatmul.mubr.msk.bf16.gmra.mrb[36].mxu0 %vm394_vm2, %v368_v59 }
  0x5e   : > { %2979 = vmatprep.mubr.msk.bf16.mxu0 %vm3485_vm1, %v3484_v1 }
  0x65   : > { %2980 = vmatmul.mubr.msk.bf16.gmra.mrb[40].mxu0 %vm394_vm2, %v369_v62 }
  0x66   : > { %2983 = vmatprep.mubr.msk.bf16.mxu0 %vm3485_vm1, %v3484_v1 }
  0x6d   : > { %2984 = vmatmul.mubr.msk.bf16.gmra.mrb[44].mxu0 %vm394_vm2, %v370_v2 }
  0x6e   : > { %2987 = vmatprep.mubr.msk.bf16.mxu0 %vm3485_vm1, %v3484_v1 }
  0x75   : > { %2988 = vmatmul.mubr.msk.bf16.gmra.mrb[48].mxu0 %vm394_vm2, %v371_v5 }
  0x76   : > { %2991 = vmatprep.mubr.msk.bf16.mxu0 %vm3485_vm1, %v3484_v1 }
  0x7d   : > { %2992 = vmatmul.mubr.msk.bf16.gmra.mrb[52].mxu0 %vm394_vm2, %v372_v8 }
  0x7e   : > { %2995 = vmatprep.mubr.msk.bf16.mxu0 %vm3485_vm1, %v3484_v1 }
  0x85   : > { %2996 = vmatmul.mubr.msk.bf16.gmra.mrb[56].mxu0 %vm394_vm2, %v373_v11 }
  0x86   : > { %2999 = vmatprep.mubr.msk.bf16.mxu0 %vm3485_vm1, %v3484_v1 }
  0x8d   : > { %3000 = vmatmul.mubr.msk.bf16.gmra.mrb[60].mxu0 %vm394_vm2, %v374_v14 }
  0x8e   : > { %3003 = vmatprep.mubr.msk.bf16.mxu0 %vm3485_vm1, %v3484_v1 }
  0x95   : > { %3004 = vmatmul.mubr.msk.bf16.gmra.mrb[64].mxu0 %vm394_vm2, %v375_v17 }
  0x96   : > { %3007 = vmatprep.mubr.msk.bf16.mxu0 %vm3485_vm1, %v3484_v1 }
  0x9d   : > { %3008 = vmatmul.mubr.msk.bf16.gmra.mrb[68].mxu0 %vm394_vm2, %v376_v20 }
  0xe8   : > { %v514_v22 = vpop.f32.mrb[0].mxu0 }
  0xe9   : > { %v3698_v23 = vadd.f32 %v3695_v21, %v514_v22  ;;  %v2941_v24 = vpop.f32.mrb[1].mxu0  ;;  %v658_v25 = vpop.f32.mrb[0].mxu1 }
  0xea   : > { %v517_v26 = vpop.f32.mrb[2].mxu0  ;;  %v3701_v27 = vadd.f32 %v3695_v21, %v658_v25  ;;  %v3013_v28 = vpop.f32.mrb[1].mxu1 }
  0xeb   : > { %v729_v29 = vsub.f32 0.0, %v3698_v23  ;;  %v3705_v30 = vadd.f32 %v3695_v21, %v517_v26  ;;  %v2942_v31 = vpop.f32.mrb[3].mxu0  ;;  %v661_v33 = vpop.f32.mrb[2].mxu1  ;;  %v3756_v26 = vrot.slane %v3735_v3, %v1547_v7 }
  0xec   : > { %v765_v34 = vsub.f32 0.0, %v3701_v27  ;;  %v3709_v35 = vadd.f32 %v3695_v21, %v661_v33  ;;  %v3014_v36 = vpop.f32.mrb[3].mxu1 }
  0xed   : > { %v783_v37 = vmin.f32 %v729_v29, 60.0  ;;  %v730_v38 = vsub.f32 0.0, %v3705_v30 }
  0xee   : > { %v819_v39 = vmin.f32 %v765_v34, 60.0  ;;  %v766_v40 = vsub.f32 0.0, %v3709_v35  ;;  %v1647_v34 = vsub.s32 4, %v3713_v43 }
  0xef   : > { %v837_v41 = vmul.f32 1.442695, %v783_v37  ;;  %v784_v42 = vmin.f32 %v730_v38, 60.0 }
  0xf0   : > { %v522_v44 = vpop.f32.mrb[4].mxu0  ;;  %v909_v45 = vmul.f32 1.442695, %v819_v39  ;;  %v820_v46 = vmin.f32 %v766_v40, 60.0  ;;  %v3771_v60 = vrot.slane %v3735_v3, %v1647_v34 }
  0xf1   : > { %3111 = vpow2.f32 %v837_v41  ;;  %v839_v47 = vmul.f32 1.442695, %v784_v42  ;;  %v3716_v48 = vadd.f32 %v3695_v21, %v522_v44  ;;  %v2945_v49 = vpop.f32.mrb[5].mxu0  ;;  %v666_v50 = vpop.f32.mrb[4].mxu1 }
  0xf2   : > { %v525_v51 = vpop.f32.mrb[6].mxu0  ;;  %3113 = vpow2.f32 %v909_v45  ;;  %v911_v52 = vmul.f32 1.442695, %v820_v46  ;;  %v3719_v53 = vadd.f32 %v3695_v21, %v666_v50  ;;  %v3017_v54 = vpop.f32.mrb[5].mxu1  ;;  %v1747_v46 = vsub.s32 5, %v3713_v43 }
  0xf3   : > { %3115 = vpow2.f32 %v839_v47  ;;  %v731_v55 = vsub.f32 0.0, %v3716_v48  ;;  %v3723_v56 = vadd.f32 %v3695_v21, %v525_v51  ;;  %v2946_v58 = vpop.f32.mrb[7].mxu0  ;;  %v669_v59 = vpop.f32.mrb[6].mxu1 }
  0xf4   : > { %3117 = vpow2.f32 %v911_v52  ;;  %v767_v61 = vsub.f32 0.0, %v3719_v53  ;;  %v3729_v62 = vadd.f32 %v3695_v21, %v669_v59  ;;  %v3018_v63 = vpop.f32.mrb[7].mxu1 }
  0xf5   : > { %v785_v0 = vmin.f32 %v731_v55, 60.0  ;;  %v732_v2 = vsub.f32 0.0, %v3723_v56 }
  0xf6   : > { %v821_v5 = vmin.f32 %v767_v61, 60.0  ;;  %v768_v6 = vsub.f32 0.0, %v3729_v62  ;;  %v3110_v61 = vld [vmem:[%s5226_s5] sm:$0xff]  }
  0xf7   : > { %v841_v8 = vmul.f32 1.442695, %v785_v0  ;;  %v786_v9 = vmin.f32 %v732_v2, 60.0  ;;  %3047 = vmatprep.subr.bf16.mxu1 %v3110_v61 }
  0xf8   : > { %v530_v11 = vpop.f32.mrb[8].mxu0  ;;  %v913_v13 = vmul.f32 1.442695, %v821_v5  ;;  %v822_v14 = vmin.f32 %v768_v6, 60.0  ;;  %v3780_v5 = vrot.slane %v3735_v3, %v1747_v46  ;;  %3048 = vmatpush3.bf16.msra.mxu1 %v3110_v61 }
  0xf9   : > { %3119 = vpow2.f32 %v841_v8  ;;  %v843_v15 = vmul.f32 1.442695, %v786_v9  ;;  %v3747_v16 = vadd.f32 %v3695_v21, %v530_v11  ;;  %v2949_v17 = vpop.f32.mrb[9].mxu0  ;;  %v674_v18 = vpop.f32.mrb[8].mxu1  ;;  %v1848_v11 = vsub.s32 6, %v3713_v43 }
  0xfa   : > { %v533_v20 = vpop.f32.mrb[10].mxu0  ;;  %3121 = vpow2.f32 %v913_v13  ;;  %v915_v22 = vmul.f32 1.442695, %v822_v14  ;;  %v3753_v24 = vadd.f32 %v3695_v21, %v674_v18  ;;  %v3021_v25 = vpop.f32.mrb[9].mxu1 }
  0xfb   : > { %v3112_v28 = vpop.eup %3111  ;;  %3123 = vpow2.f32 %v843_v15  ;;  %v733_v29 = vsub.f32 0.0, %v3747_v16  ;;  %v3760_v31 = vadd.f32 %v3695_v21, %v533_v20  ;;  %v2950_v32 = vpop.f32.mrb[11].mxu0  ;;  %v1948_v20 = vsub.s32 7, %v3713_v43 }
  0xfc   : > { %v677_v33 = vpop.f32.mrb[10].mxu1  ;;  %v3114_v36 = vpop.eup %3113  ;;  %v945_v37 = vadd.f32 1.0, %v3112_v28  ;;  %3125 = vpow2.f32 %v915_v22  ;;  %v769_v38 = vsub.f32 0.0, %v3753_v24 }
  0xfd   : > { %v3765_v39 = vadd.f32 %v3695_v21, %v677_v33  ;;  %v3022_v40 = vpop.f32.mrb[11].mxu1  ;;  %v3116_v41 = vpop.eup %3115  ;;  %v787_v42 = vmin.f32 %v733_v29, 60.0  ;;  %v734_v44 = vsub.f32 0.0, %v3760_v31  ;;  %v981_v45 = vadd.f32 1.0, %v3114_v36 }
  0xfe   : > { %v3118_v47 = vpop.eup %3117  ;;  %3127 = vrcp.f32 %v945_v37  ;;  %v946_v49 = vadd.f32 1.0, %v3116_v41  ;;  %v823_v50 = vmin.f32 %v769_v38, 60.0 }
  0xff   : > { %v770_v51 = vsub.f32 0.0, %v3765_v39  ;;  %v845_v52 = vmul.f32 1.442695, %v787_v42  ;;  %v788_v54 = vmin.f32 %v734_v44, 60.0  ;;  %3129 = vrcp.f32 %v981_v45 }
 0x100   : > { %v982_v55 = vadd.f32 1.0, %v3118_v47  ;;  %3131 = vrcp.f32 %v946_v49  ;;  %v538_v57 = vpop.f32.mrb[12].mxu0  ;;  %v917_v58 = vmul.f32 1.442695, %v823_v50 }
 0x101   : > { %v824_v59 = vmin.f32 %v770_v51, 60.0  ;;  %3133 = vpow2.f32 %v845_v52  ;;  %v847_v63 = vmul.f32 1.442695, %v788_v54  ;;  %v3777_v0 = vadd.f32 %v3695_v21, %v538_v57  ;;  %v2953_v2 = vpop.f32.mrb[13].mxu0  ;;  %v682_v4 = vpop.f32.mrb[12].mxu1 }
 0x102   : > { %v541_v6 = vpop.f32.mrb[14].mxu0  ;;  %3135 = vrcp.f32 %v982_v55  ;;  %v3783_v8 = vadd.f32 %v3695_v21, %v682_v4  ;;  %v3025_v9 = vpop.f32.mrb[13].mxu1  ;;  %v3798_v52 = vrot.slane %v3735_v3, %v1848_v11 }
 0x103   : > { %v919_v7 = vmul.f32 1.442695, %v824_v59  ;;  %v3120_v13 = vpop.eup %3119  ;;  %3137 = vpow2.f32 %v847_v63  ;;  %v735_v14 = vsub.f32 0.0, %v3777_v0  ;;  %v3788_v15 = vadd.f32 %v3695_v21, %v541_v6  ;;  %v2954_v17 = vpop.f32.mrb[15].mxu0 }
 0x104   : > { %v685_v18 = vpop.f32.mrb[14].mxu1  ;;  %v3122_v22 = vpop.eup %3121  ;;  %v947_v25 = vadd.f32 1.0, %v3120_v13  ;;  %3139 = vpow2.f32 %v917_v58  ;;  %v771_v28 = vsub.f32 0.0, %v3783_v8 }
 0x105   : > { %v3793_v29 = vadd.f32 %v3695_v21, %v685_v18  ;;  %v3026_v32 = vpop.f32.mrb[15].mxu1  ;;  %v3124_v33 = vpop.eup %3123  ;;  %v789_v34 = vmin.f32 %v735_v14, 60.0  ;;  %v736_v36 = vsub.f32 0.0, %v3788_v15  ;;  %v983_v37 = vadd.f32 1.0, %v3122_v22 }
 0x106   : > { %3141 = vpow2.f32 %v919_v7  ;;  %v3126_v38 = vpop.eup %3125  ;;  %v948_v40 = vadd.f32 1.0, %v3124_v33  ;;  %v825_v41 = vmin.f32 %v771_v28, 60.0 }
 0x107   : > { %3143 = vrcp.f32 %v947_v25  ;;  %v772_v42 = vsub.f32 0.0, %v3793_v29  ;;  %v849_v44 = vmul.f32 1.442695, %v789_v34  ;;  %v790_v45 = vmin.f32 %v736_v36, 60.0 }
 0x108   : > { %3145 = vrcp.f32 %v983_v37  ;;  %v984_v46 = vadd.f32 1.0, %v3126_v38  ;;  %v3128_v47 = vpop.eup %3127  ;;  %v546_v49 = vpop.f32.mrb[16].mxu0  ;;  %v921_v50 = vmul.f32 1.442695, %v825_v41 }
 0x109   : > { %3147 = vrcp.f32 %v948_v40  ;;  %v826_v51 = vmin.f32 %v772_v42, 60.0  ;;  %v3130_v54 = vpop.eup %3129  ;;  %v1053_v55 = vmul.f32 %v3128_v47, %v3698_v23  ;;  %v851_v57 = vmul.f32 1.442695, %v790_v45  ;;  %v2957_v59 = vpop.f32.mrb[17].mxu0 }
 0x10a   : > { %3149 = vpow2.f32 %v849_v44  ;;  %v3802_v58 = vadd.f32 %v3695_v21, %v546_v49  ;;  %v690_v61 = vpop.f32.mrb[16].mxu1  ;;  %v3132_v63 = vpop.eup %3131  ;;  %v1089_v2 = vmul.f32 %v3130_v54, %v3701_v27 }
 0x10b   : > { %v549_v4 = vpop.f32.mrb[18].mxu0  ;;  %3151 = vrcp.f32 %v984_v46  ;;  %v923_v6 = vmul.f32 1.442695, %v826_v51  ;;  %v3806_v7 = vadd.f32 %v3695_v21, %v690_v61  ;;  %v3029_v9 = vpop.f32.mrb[17].mxu1  ;;  %1108 = vst.msk [vmem:[#allocation2] sm:$0xff] %vm1107_vm3, %v1053_v55  ;;  %v1054_v23 = vmul.f32 %v3132_v63, %v3705_v30 }
 0x10c   : > { %v3134_v11 = vpop.eup %3133  ;;  %3153 = vpow2.f32 %v851_v57  ;;  %v737_v13 = vsub.f32 0.0, %v3802_v58  ;;  %v3812_v14 = vadd.f32 %v3695_v21, %v549_v4  ;;  %v2958_v17 = vpop.f32.mrb[19].mxu0  ;;  %1163 = vst.msk [vmem:[#allocation2] sm:$0x1] %vm1162_vm4, %v3484_v1 }
 0x10d   : > { %v693_v27 = vpop.f32.mrb[18].mxu1  ;;  %v3136_v18 = vpop.eup %3135  ;;  %v949_v22 = vadd.f32 1.0, %v3134_v11  ;;  %1144 = vst.msk [vmem:[#allocation2 + $0x120] sm:$0xff] %vm1107_vm3, %v1089_v2  ;;  %3155 = vpow2.f32 %v921_v50  ;;  %v773_v25 = vsub.f32 0.0, %v3806_v7  ;;  %1203 = vst.msk [vmem:[#allocation2] sm:$0xff] %vm1107_vm3, %v3484_v1 }
 0x10e   : > { %v3819_v30 = vadd.f32 %v3695_v21, %v693_v27  ;;  %v3030_v28 = vpop.f32.mrb[19].mxu1  ;;  %v3138_v32 = vpop.eup %3137  ;;  %1109 = vst.msk [vmem:[#allocation2 + $0x8] sm:$0xff] %vm1107_vm3, %v1054_v23  ;;  %v791_v33 = vmin.f32 %v737_v13, 60.0  ;;  %v738_v34 = vsub.f32 0.0, %v3812_v14  ;;  %v1090_v36 = vmul.f32 %v3136_v18, %v3709_v35 }
 0x10f   : > { %1175 = vst.msk [vmem:[#allocation2 + $0x120] sm:$0x1] %vm1162_vm4, %v3484_v1  ;;  %3157 = vpow2.f32 %v923_v6  ;;  %v3140_v37 = vpop.eup %3139  ;;  %v950_v38 = vadd.f32 1.0, %v3138_v32  ;;  %v827_v40 = vmin.f32 %v773_v25, 60.0  ;;  %v3835_v35 = vrot.slane %v3735_v3, %v1948_v20 }
 0x110   : > { %1204 = vst.msk [vmem:[#allocation2 + $0x8] sm:$0xff] %vm1107_vm3, %v3484_v1  ;;  %3159 = vrcp.f32 %v949_v22  ;;  %v774_v41 = vsub.f32 0.0, %v3819_v30  ;;  %v3142_v42 = vpop.eup %3141  ;;  %v853_v44 = vmul.f32 1.442695, %v791_v33  ;;  %v792_v45 = vmin.f32 %v738_v34, 60.0  ;;  %1145 = vst.msk [vmem:[#allocation2 + $0x128] sm:$0xff] %vm1107_vm3, %v1090_v36 }
 0x111   : > { %v985_v46 = vadd.f32 1.0, %v3140_v37  ;;  %v3144_v47 = vpop.eup %3143  ;;  %3161 = vrcp.f32 %v950_v38  ;;  %v554_v49 = vpop.f32.mrb[20].mxu0  ;;  %v986_v50 = vadd.f32 1.0, %v3142_v42  ;;  %v925_v51 = vmul.f32 1.442695, %v827_v40 }
 0x112   : > { %v828_v54 = vmin.f32 %v774_v41, 60.0  ;;  %v3146_v55 = vpop.eup %3145  ;;  %v1055_v57 = vmul.f32 %v3144_v47, %v3716_v48  ;;  %3163 = vpow2.f32 %v853_v44  ;;  %v855_v59 = vmul.f32 1.442695, %v792_v45  ;;  %v2961_v63 = vpop.f32.mrb[21].mxu0 }
 0x113   : > { %v3839_v61 = vadd.f32 %v3695_v21, %v554_v49  ;;  %v698_v2 = vpop.f32.mrb[20].mxu1  ;;  %v3148_v43 = vpop.eup %3147  ;;  %v1091_v3 = vmul.f32 %v3146_v55, %v3719_v53  ;;  %3165 = vrcp.f32 %v985_v46 }
 0x114   : > { %v557_v20 = vpop.f32.mrb[22].mxu0  ;;  %v927_v4 = vmul.f32 1.442695, %v828_v54  ;;  %v3843_v6 = vadd.f32 %v3695_v21, %v698_v2  ;;  %v3033_v9 = vpop.f32.mrb[21].mxu1  ;;  %1110 = vst.msk [vmem:[#allocation2 + $0x10] sm:$0xff] %vm1107_vm3, %v1055_v57  ;;  %v1056_v48 = vmul.f32 %v3148_v43, %v3723_v56  ;;  %3167 = vpow2.f32 %v855_v59 }
 0x115   : > { %v3150_v11 = vpop.eup %3149  ;;  %v739_v23 = vsub.f32 0.0, %v3839_v61  ;;  %v3849_v13 = vadd.f32 %v3695_v21, %v557_v20  ;;  %v2962_v17 = vpop.f32.mrb[23].mxu0  ;;  %1181 = vst.msk [vmem:[#allocation2 + $0x11] sm:$0x1] %vm1162_vm4, %v3484_v1  ;;  %3169 = vrcp.f32 %v986_v50 }
 0x116   : > { %v701_v53 = vpop.f32.mrb[22].mxu1  ;;  %v3152_v27 = vpop.eup %3151  ;;  %v951_v18 = vadd.f32 1.0, %v3150_v11  ;;  %1146 = vst.msk [vmem:[#allocation2 + $0x130] sm:$0xff] %vm1107_vm3, %v1091_v3  ;;  %v775_v22 = vsub.f32 0.0, %v3843_v6  ;;  %1205 = vst.msk [vmem:[#allocation2 + $0x10] sm:$0xff] %vm1107_vm3, %v3484_v1  ;;  %3171 = vpow2.f32 %v925_v51 }
 0x117   : > { %v3856_v56 = vadd.f32 %v3695_v21, %v701_v53  ;;  %v3034_v25 = vpop.f32.mrb[23].mxu1  ;;  %v3154_v28 = vpop.eup %3153  ;;  %1111 = vst.msk [vmem:[#allocation2 + $0x18] sm:$0xff] %vm1107_vm3, %v1056_v48  ;;  %v1092_v32 = vmul.f32 %v3152_v27, %v3729_v62  ;;  %v793_v33 = vmin.f32 %v739_v23, 60.0  ;;  %v740_v34 = vsub.f32 0.0, %v3849_v13  ;;  %v1212_v62 = vld [vmem:[#allocation2] sm:$0xff] }
 0x118   : > { %1193 = vst.msk [vmem:[#allocation2 + $0x131] sm:$0x1] %vm1162_vm4, %v3484_v1  ;;  %v3156_v36 = vpop.eup %3155  ;;  %1164 = vst.msk [vmem:[#allocation2 + $0x18] sm:$0x1] %vm1162_vm4, %v3484_v1  ;;  %3173 = vrcp.f32 %v951_v18  ;;  %v952_v37 = vadd.f32 1.0, %v3154_v28  ;;  %v829_v38 = vmin.f32 %v775_v22, 60.0  ;;  %v3879_v9 = vmul.f32 %v3741_v10, %v1212_v62 }
 0x119   : > { %v776_v40 = vsub.f32 0.0, %v3856_v56  ;;  %v3158_v41 = vpop.eup %3157  ;;  %1147 = vst.msk [vmem:[#allocation2 + $0x138] sm:$0xff] %vm1107_vm3, %v1092_v32  ;;  %v857_v42 = vmul.f32 1.442695, %v793_v33  ;;  %v794_v44 = vmin.f32 %v740_v34, 60.0  ;;  %v987_v45 = vadd.f32 1.0, %v3156_v36 }
 0x11a   : > { %3175 = vpow2.f32 %v927_v4  ;;  %v3160_v46 = vpop.eup %3159  ;;  %1176 = vst.msk [vmem:[#allocation2 + $0x138] sm:$0x1] %vm1162_vm4, %v3484_v1  ;;  %v988_v47 = vadd.f32 1.0, %v3158_v41  ;;  %v562_v49 = vpop.f32.mrb[24].mxu0  ;;  %v929_v50 = vmul.f32 1.442695, %v829_v38 }
 0x11b   : > { %3177 = vrcp.f32 %v952_v37  ;;  %v830_v51 = vmin.f32 %v776_v40, 60.0  ;;  %v1057_v54 = vmul.f32 %v3160_v46, %v3747_v16  ;;  %v859_v55 = vmul.f32 1.442695, %v794_v44  ;;  %v2965_v59 = vpop.f32.mrb[25].mxu0  ;;  %v706_v63 = vpop.f32.mrb[24].mxu1 }
 0x11c   : > { %3179 = vpow2.f32 %v857_v42  ;;  %v3873_v57 = vadd.f32 %v3695_v21, %v562_v49  ;;  %v3162_v2 = vpop.eup %3161  ;;  %v565_v43 = vpop.f32.mrb[26].mxu0  ;;  %v3876_v20 = vadd.f32 %v3695_v21, %v706_v63 }
 0x11d   : > { %3181 = vrcp.f32 %v987_v45  ;;  %v931_v3 = vmul.f32 1.442695, %v830_v51  ;;  %v3037_v4 = vpop.f32.mrb[25].mxu1  ;;  %v3164_v11 = vpop.eup %3163  ;;  %1112 = vst.msk [vmem:[#allocation2 + $0x20] sm:$0xff] %vm1107_vm3, %v1057_v54  ;;  %v1058_v16 = vmul.f32 %v3162_v2, %v3760_v31  ;;  %v3885_v23 = vadd.f32 %v3695_v21, %v565_v43 }
 0x11e   : > { %3183 = vpow2.f32 %v859_v55  ;;  %v741_v48 = vsub.f32 0.0, %v3873_v57  ;;  %v2966_v17 = vpop.f32.mrb[27].mxu0  ;;  %v709_v53 = vpop.f32.mrb[26].mxu1  ;;  %v953_v18 = vadd.f32 1.0, %v3164_v11  ;;  %v777_v22 = vsub.f32 0.0, %v3876_v20 }
 0x11f   : > { %v3166_v27 = vpop.eup %3165  ;;  %3185 = vrcp.f32 %v988_v47  ;;  %v3889_v25 = vadd.f32 %v3695_v21, %v709_v53  ;;  %v3038_v28 = vpop.f32.mrb[27].mxu1  ;;  %v1214_v33 = vld [vmem:[#allocation2 + $0x18] sm:$0xff]  ;;  %1113 = vst.msk [vmem:[#allocation2 + $0x28] sm:$0xff] %vm1107_vm3, %v1058_v16  ;;  %v742_v36 = vsub.f32 0.0, %v3885_v23 }
 0x120   : > { %v3168_v32 = vpop.eup %3167  ;;  %v1093_v31 = vmul.f32 %v3166_v27, %v3753_v24  ;;  %v795_v34 = vmin.f32 %v741_v48, 60.0  ;;  %3187 = vpow2.f32 %v929_v50  ;;  %v3895_v38 = vmul.f32 %v3741_v10, %v1214_v33  ;;  %1182 = vst.msk [vmem:[#allocation2 + $0x29] sm:$0x1] %vm1162_vm4, %v3484_v1  ;;  %v570_v47 = vpop.f32.mrb[28].mxu0 }
 0x121   : > { %v3170_v37 = vpop.eup %3169  ;;  %3189 = vrcp.f32 %v953_v18  ;;  %v954_v40 = vadd.f32 1.0, %v3168_v32  ;;  %v831_v41 = vmin.f32 %v777_v22, 60.0  ;;  %v796_v45 = vmin.f32 %v742_v36, 60.0  ;;  %v714_v63 = vpop.f32.mrb[28].mxu1 }
 0x122   : > { %v3172_v42 = vpop.eup %3171  ;;  %1148 = vst.msk [vmem:[#allocation2 + $0x140] sm:$0xff] %vm1107_vm3, %v1093_v31  ;;  %v1094_v44 = vmul.f32 %v3170_v37, %v3765_v39  ;;  %v861_v24 = vmul.f32 1.442695, %v795_v34  ;;  %3191 = vpow2.f32 %v931_v3  ;;  %v778_v50 = vsub.f32 0.0, %v3889_v25  ;;  %v2969_v39 = vpop.f32.mrb[29].mxu0 }
 0x123   : > { %v3174_v62 = vpop.eup %3173  ;;  %3193 = vrcp.f32 %v954_v40  ;;  %v989_v46 = vadd.f32 1.0, %v3172_v42  ;;  %v933_v49 = vmul.f32 1.442695, %v831_v41  ;;  %v863_v55 = vmul.f32 1.442695, %v796_v45  ;;  %v573_v11 = vpop.f32.mrb[30].mxu0 }
 0x124   : > { %v3176_v51 = vpop.eup %3175  ;;  %v1059_v54 = vmul.f32 %v3174_v62, %v3777_v0  ;;  %1149 = vst.msk [vmem:[#allocation2 + $0x148] sm:$0xff] %vm1107_vm3, %v1094_v44  ;;  %3195 = vpow2.f32 %v861_v24  ;;  %v3905_v59 = vadd.f32 %v3695_v21, %v570_v47  ;;  %v1215_v43 = vld [vmem:[#allocation2 + $0x20] sm:$0xff]  ;;  %v832_v16 = vmin.f32 %v778_v50, 60.0  ;;  %v2970_v18 = vpop.f32.mrb[31].mxu0 }
 0x125   : > { %v3178_v2 = vpop.eup %3177  ;;  %v1314_v3 = vld [vmem:[#allocation2 + $0x19] sm:$0xff]  ;;  %1194 = vst.msk [vmem:[#allocation2 + $0x149] sm:$0x1] %vm1162_vm4, %v3484_v1  ;;  %3197 = vrcp.f32 %v989_v46  ;;  %v990_v4 = vadd.f32 1.0, %v3176_v51  ;;  %v3910_v0 = vadd.f32 %v3695_v21, %v714_v63  ;;  %v3913_v17 = vmul.f32 %v3741_v10, %v1215_v43  ;;  %v3041_v22 = vpop.f32.mrb[29].mxu1 }
 0x126   : > { %v3180_v48 = vpop.eup %3179  ;;  %v3916_v53 = vmul.f32 %v3744_v12, %v1314_v3  ;;  %1114 = vst.msk [vmem:[#allocation2 + $0x30] sm:$0xff] %vm1107_vm3, %v1059_v54  ;;  %v1060_v27 = vmul.f32 %v3178_v2, %v3788_v15  ;;  %3199 = vpow2.f32 %v863_v55  ;;  %v1315_v32 = vld [vmem:[#allocation2 + $0x21] sm:$0xff]  ;;  %v743_v31 = vsub.f32 0.0, %v3905_v59  ;;  %v717_v36 = vpop.f32.mrb[30].mxu1 }
 0x127   : > { %v3182_v28 = vpop.eup %3181  ;;  %1165 = vst.msk [vmem:[#allocation2 + $0x30] sm:$0x1] %vm1162_vm4, %v3484_v1  ;;  %v955_v33 = vadd.f32 1.0, %v3180_v48  ;;  %3201 = vrcp.f32 %v990_v4  ;;  %v3924_v34 = vadd.f32 %v3695_v21, %v573_v11  ;;  %v3927_v40 = vmul.f32 %v3744_v12, %v1315_v32  ;;  %v3042_v42 = vpop.f32.mrb[31].mxu1 }
 0x128   : > { %v3184_v37 = vpop.eup %3183  ;;  %1115 = vst.msk [vmem:[#allocation2 + $0x38] sm:$0xff] %vm1107_vm3, %v1060_v27  ;;  %v1095_v15 = vmul.f32 %v3182_v28, %v3783_v8  ;;  %3203 = vpow2.f32 %v933_v49  ;;  %v935_v41 = vmul.f32 1.442695, %v832_v16  ;;  %v797_v45 = vmin.f32 %v743_v31, 60.0  ;;  %v578_v39 = vpop.f32.mrb[32].mxu0 }
 0x129   : > { %v3186_v44 = vpop.eup %3185  ;;  %3205 = vrcp.f32 %v955_v33  ;;  %v956_v24 = vadd.f32 1.0, %v3184_v37  ;;  %v744_v62 = vsub.f32 0.0, %v3924_v34  ;;  %v779_v50 = vsub.f32 0.0, %v3910_v0  ;;  %v2973_v43 = vpop.f32.mrb[33].mxu0 }
 0x12a   : > { %v3188_v46 = vpop.eup %3187  ;;  %1150 = vst.msk [vmem:[#allocation2 + $0x150] sm:$0xff] %vm1107_vm3, %v1095_v15  ;;  %v1096_v47 = vmul.f32 %v3186_v44, %v3793_v29  ;;  %3207 = vpow2.f32 %v935_v41  ;;  %v3936_v51 = vadd.f32 %v3695_v21, %v717_v36  ;;  %v865_v54 = vmul.f32 1.442695, %v797_v45  ;;  %v722_v11 = vpop.f32.mrb[32].mxu1 }
 0x12b   : > { %v3190_v8 = vpop.eup %3189  ;;  %3209 = vrcp.f32 %v956_v24  ;;  %1177 = vst.msk [vmem:[#allocation2 + $0x150] sm:$0x1] %vm1162_vm4, %v3484_v1  ;;  %v991_v49 = vadd.f32 1.0, %v3188_v46  ;;  %v798_v55 = vmin.f32 %v744_v62, 60.0  ;;  %v3943_v29 = vadd.f32 %v3695_v21, %v578_v39  ;;  %v581_v18 = vpop.f32.mrb[34].mxu0 }
 0x12c   : > { %v3192_v63 = vpop.eup %3191  ;;  %v1061_v2 = vmul.f32 %v3190_v8, %v3802_v58  ;;  %1151 = vst.msk [vmem:[#allocation2 + $0x158] sm:$0xff] %vm1107_vm3, %v1096_v47  ;;  %v833_v3 = vmin.f32 %v779_v50, 60.0  ;;  %v780_v4 = vsub.f32 0.0, %v3936_v51  ;;  %v3947_v22 = vadd.f32 %v3695_v21, %v722_v11  ;;  %v3045_v28 = vpop.f32.mrb[33].mxu1 }
 0x12d   : > { %v3194_v16 = vpop.eup %3193  ;;  %3211 = vrcp.f32 %v991_v49  ;;  %v992_v48 = vadd.f32 1.0, %v3192_v63  ;;  %v867_v27 = vmul.f32 1.442695, %v798_v55  ;;  %v745_v33 = vsub.f32 0.0, %v3943_v29  ;;  %v2974_v36 = vpop.f32.mrb[35].mxu0  ;;  %v1312_v28 = vld [vmem:[#allocation2 + $0x1] sm:$0xff] }
 0x12e   : > { %v3196_v58 = vpop.eup %3195  ;;  %1116 = vst.msk [vmem:[#allocation2 + $0x40] sm:$0xff] %vm1107_vm3, %v1061_v2  ;;  %v1062_v32 = vmul.f32 %v3194_v16, %v3812_v14  ;;  %3213 = vpow2.f32 %v865_v54  ;;  %v3953_v31 = vadd.f32 %v3695_v21, %v581_v18  ;;  %v725_v37 = vpop.f32.mrb[34].mxu1  ;;  %v937_v42 = vmul.f32 1.442695, %v833_v3  ;;  %v1213_v18 = vld [vmem:[#allocation2 + $0x8] sm:$0xff] }
 0x12f   : > { %v3198_v15 = vpop.eup %3197  ;;  %1183 = vst.msk [vmem:[#allocation2 + $0x41] sm:$0x1] %vm1162_vm4, %v3484_v1  ;;  %v957_v41 = vadd.f32 1.0, %v3196_v58  ;;  %3215 = vrcp.f32 %v992_v48  ;;  %v834_v44 = vmin.f32 %v780_v4, 60.0  ;;  %v799_v45 = vmin.f32 %v745_v33, 60.0  ;;  %v3046_v46 = vpop.f32.mrb[35].mxu1 }
 0x130   : > { %v3200_v24 = vpop.eup %3199  ;;  %1117 = vst.msk [vmem:[#allocation2 + $0x48] sm:$0xff] %vm1107_vm3, %v1062_v32  ;;  %v1097_v14 = vmul.f32 %v3198_v15, %v3806_v7  ;;  %3217 = vpow2.f32 %v867_v27  ;;  %v746_v62 = vsub.f32 0.0, %v3953_v31  ;;  %v781_v49 = vsub.f32 0.0, %v3947_v22  ;;  %v586_v43 = vpop.f32.mrb[36].mxu0 }
 0x131   : > { %v3202_v47 = vpop.eup %3201  ;;  %1166 = vst.msk [vmem:[#allocation2 + $0x48] sm:$0x1] %vm1162_vm4, %v3484_v1  ;;  %3219 = vrcp.f32 %v957_v41  ;;  %v958_v50 = vadd.f32 1.0, %v3200_v24  ;;  %v939_v8 = vmul.f32 1.442695, %v834_v44  ;;  %v3968_v4 = vadd.f32 %v3695_v21, %v725_v37  ;;  %v2977_v27 = vpop.f32.mrb[37].mxu0 }
 0x132   : > { %v3204_v54 = vpop.eup %3203  ;;  %1152 = vst.msk [vmem:[#allocation2 + $0x160] sm:$0xff] %vm1107_vm3, %v1097_v14  ;;  %v1098_v55 = vmul.f32 %v3202_v47, %v3819_v30  ;;  %v869_v7 = vmul.f32 1.442695, %v799_v45  ;;  %v800_v39 = vmin.f32 %v746_v62, 60.0  ;;  %3221 = vpow2.f32 %v937_v42  ;;  %v589_v33 = vpop.f32.mrb[38].mxu0  ;;  %v1313_v44 = vld [vmem:[#allocation2 + $0x9] sm:$0xff] }
 0x133   : > { %v3206_v63 = vpop.eup %3205  ;;  %1195 = vst.msk [vmem:[#allocation2 + $0x161] sm:$0x1] %vm1162_vm4, %v3484_v1  ;;  %3223 = vrcp.f32 %v958_v50  ;;  %v993_v2 = vadd.f32 1.0, %v3204_v54  ;;  %v835_v3 = vmin.f32 %v781_v49, 60.0  ;;  %v3973_v48 = vadd.f32 %v3695_v21, %v586_v43  ;;  %v2978_v42 = vpop.f32.mrb[39].mxu0  ;;  %v1412_v49 = vld [vmem:[#allocation2 + $0x2] sm:$0xff] }
 0x134   : > { %v3208_v11 = vpop.eup %3207  ;;  %v1063_v16 = vmul.f32 %v3206_v63, %v3839_v61  ;;  %1153 = vst.msk [vmem:[#allocation2 + $0x168] sm:$0xff] %vm1107_vm3, %v1098_v55  ;;  %3225 = vpow2.f32 %v869_v7  ;;  %v871_v30 = vmul.f32 1.442695, %v800_v39  ;;  %v782_v61 = vsub.f32 0.0, %v3968_v4 }
 0x135   : > { %v3210_v58 = vpop.eup %3209  ;;  %1178 = vst.msk [vmem:[#allocation2 + $0x168] sm:$0x1] %vm1162_vm4, %v3484_v1  ;;  %3227 = vrcp.f32 %v993_v2  ;;  %v994_v32 = vadd.f32 1.0, %v3208_v11  ;;  %v941_v36 = vmul.f32 1.442695, %v835_v3  ;;  %v747_v15 = vsub.f32 0.0, %v3973_v48 }
 0x136   : > { %1118 = vst.msk [vmem:[#allocation2 + $0x50] sm:$0xff] %vm1107_vm3, %v1063_v16  ;;  %v1064_v37 = vmul.f32 %v3210_v58, %v3849_v13  ;;  %3229 = vpow2.f32 %v871_v30  ;;  %v3982_v41 = vadd.f32 %v3695_v21, %v589_v33  ;;  %v836_v14 = vmin.f32 %v782_v61, 60.0 }
 0x137   : > { %v3212_v24 = vpop.eup %3211  ;;  %3231 = vrcp.f32 %v994_v32  ;;  %v1249_v45 = vmul.f32 %v3741_v10, %v1213_v18  ;;  %v1348_v62 = vmul.f32 %v3744_v12, %v1312_v28  ;;  %v801_v47 = vmin.f32 %v747_v15, 60.0 }
 0x138   : > { %v3214_v46 = vpop.eup %3213  ;;  %1119 = vst.msk [vmem:[#allocation2 + $0x58] sm:$0xff] %vm1107_vm3, %v1064_v37  ;;  %v1099_v13 = vmul.f32 %v3212_v24, %v3843_v6  ;;  %v748_v50 = vsub.f32 0.0, %v3982_v41  ;;  %3233 = vpow2.f32 %v939_v8  ;;  %v943_v7 = vmul.f32 1.442695, %v836_v14  ;;  %v1413_v8 = vld [vmem:[#allocation2 + $0xa] sm:$0xff]  ;;  %v594_v30 = vpop.f32.mrb[40].mxu0 }
 0x139   : > { %v3216_v54 = vpop.eup %3215  ;;  %1184 = vst.msk [vmem:[#allocation2 + $0x59] sm:$0x1] %vm1162_vm4, %v3484_v1  ;;  %v959_v55 = vadd.f32 1.0, %v3214_v46  ;;  %3235 = vpow2.f32 %v941_v36  ;;  %v1349_v39 = vmul.f32 %v3744_v12, %v1313_v44  ;;  %v873_v6 = vmul.f32 1.442695, %v801_v47  ;;  %v2981_v33 = vpop.f32.mrb[41].mxu0 }
 0x13a   : > { %v3218_v63 = vpop.eup %3217  ;;  %1154 = vst.msk [vmem:[#allocation2 + $0x170] sm:$0xff] %vm1107_vm3, %v1099_v13  ;;  %v1100_v2 = vmul.f32 %v3216_v54, %v3856_v56  ;;  %v802_v43 = vmin.f32 %v748_v50, 60.0  ;;  %v1380_v3 = vadd.f32 %v1348_v62, %v3879_v9  ;;  %v1448_v18 = vmul.f32 %v3750_v19, %v1412_v49  ;;  %v1513_v9 = vld [vmem:[#allocation2 + $0x18] sm:$0xff]  ;;  %v597_v37 = vpop.f32.mrb[42].mxu0  ;;  %v1514_v62 = vld [vmem:[#allocation2 + $0x20] sm:$0xff] }
 0x13b   : > { %v3220_v11 = vpop.eup %3219  ;;  %3237 = vrcp.f32 %v959_v55  ;;  %v960_v16 = vadd.f32 1.0, %v3218_v63  ;;  %v1381_v27 = vadd.f32 %v1349_v39, %v1249_v45  ;;  %v3999_v56 = vadd.f32 %v3695_v21, %v594_v30  ;;  %v2982_v45 = vpop.f32.mrb[43].mxu0  ;;  %v1613_v49 = vld [vmem:[#allocation2 + $0x19] sm:$0xff]  ;;  %v1614_v39 = vld [vmem:[#allocation2 + $0x21] sm:$0xff] }
 0x13c   : > { %v3222_v28 = vpop.eup %3221  ;;  %v1065_v58 = vmul.f32 %v3220_v11, %v3873_v57  ;;  %1155 = vst.msk [vmem:[#allocation2 + $0x178] sm:$0xff] %vm1107_vm3, %v1100_v2  ;;  %3239 = vpow2.f32 %v873_v6  ;;  %v875_v32 = vmul.f32 1.442695, %v802_v43  ;;  %v1449_v15 = vmul.f32 %v3750_v19, %v1413_v8  ;;  %v4027_v33 = vld [vmem:[%s5223_s2] ss:$0 sm:$0xff] }
 0x13d   : > { %v3224_v36 = vpop.eup %3223  ;;  %1196 = vst.msk [vmem:[#allocation2 + $0x179] sm:$0x1] %vm1162_vm4, %v3484_v1  ;;  %3241 = vrcp.f32 %v960_v16  ;;  %v995_v61 = vadd.f32 1.0, %v3222_v28  ;;  %v1480_v42 = vadd.f32 %v1448_v18, %v1380_v3  ;;  %v749_v24 = vsub.f32 0.0, %v3999_v56 }
 0x13e   : > { %v3226_v57 = vpop.eup %3225  ;;  %1120 = vst.msk [vmem:[#allocation2 + $0x60] sm:$0xff] %vm1107_vm3, %v1065_v58  ;;  %v1066_v44 = vmul.f32 %v3224_v36, %v3885_v23  ;;  %3243 = vpow2.f32 %v875_v32  ;;  %v4008_v14 = vadd.f32 %v3695_v21, %v597_v37  ;;  %v1481_v47 = vadd.f32 %v1449_v15, %v1381_v27 }
 0x13f   : > { %v3228_v46 = vpop.eup %3227  ;;  %1167 = vst.msk [vmem:[#allocation2 + $0x60] sm:$0x1] %vm1162_vm4, %v3484_v1  ;;  %v961_v13 = vadd.f32 1.0, %v3226_v57  ;;  %3245 = vrcp.f32 %v995_v61  ;;  %v1549_v50 = vmul.f32 %v3756_v26, %v1513_v9  ;;  %v803_v21 = vmin.f32 %v749_v24, 60.0  ;;  %v1714_v61 = vld [vmem:[#allocation2 + $0x22] sm:$0xff]  ;;  %v4033_v24 = vld [vmem:[#allocation2 + $0x30] sm:$0xff] }
 0x140   : > { %v3230_v54 = vpop.eup %3229  ;;  %1121 = vst.msk [vmem:[#allocation2 + $0x68] sm:$0xff] %vm1107_vm3, %v1066_v44  ;;  %v1101_v23 = vmul.f32 %v3228_v46, %v3876_v20  ;;  %3247 = vpow2.f32 %v943_v7  ;;  %v750_v55 = vsub.f32 0.0, %v4008_v14  ;;  %v1550_v6 = vmul.f32 %v3756_v26, %v1514_v62  ;;  %v1713_v7 = vld [vmem:[#allocation2 + $0x1a] sm:$0xff]  ;;  %v602_v18 = vpop.f32.mrb[44].mxu0 }
 0x141   : > { %v3232_v63 = vpop.eup %3231  ;;  %3249 = vrcp.f32 %v961_v13  ;;  %v962_v2 = vadd.f32 1.0, %v3230_v54  ;;  %v1581_v43 = vadd.f32 %v1549_v50, %v1480_v42  ;;  %v877_v11 = vmul.f32 1.442695, %v803_v21  ;;  %v2985_v36 = vpop.f32.mrb[45].mxu0  ;;  %v4040_v50 = vld [vmem:[#allocation2 + $0x38] sm:$0xff] }
 0x142   : > { %v3234_v3 = vpop.eup %3233  ;;  %1156 = vst.msk [vmem:[#allocation2 + $0x180] sm:$0xff] %vm1107_vm3, %v1101_v23  ;;  %v1102_v8 = vmul.f32 %v3232_v63, %v3889_v25  ;;  %v804_v16 = vmin.f32 %v750_v55, 60.0  ;;  %v1649_v20 = vmul.f32 %v3771_v60, %v1613_v49  ;;  %v1582_v28 = vadd.f32 %v1550_v6, %v1481_v47  ;;  %v605_v15 = vpop.f32.mrb[46].mxu0  ;;  %v4048_v6 = vld [vmem:[#allocation2 + $0x31] sm:$0xff] }
 0x143   : > { %v3236_v30 = vpop.eup %3235  ;;  %3251 = vrcp.f32 %v962_v2  ;;  %1179 = vst.msk [vmem:[#allocation2 + $0x180] sm:$0x1] %vm1162_vm4, %v3484_v1  ;;  %v996_v27 = vadd.f32 1.0, %v3234_v3  ;;  %v1650_v58 = vmul.f32 %v3771_v60, %v1614_v39  ;;  %v4030_v9 = vadd.f32 %v4027_v33, %v602_v18  ;;  %v2986_v47 = vpop.f32.mrb[47].mxu0  ;;  %v4061_v18 = vld [vmem:[#allocation2 + $0x39] sm:$0xff] }
 0x144   : > { %1157 = vst.msk [vmem:[#allocation2 + $0x188] sm:$0xff] %vm1107_vm3, %v1102_v8  ;;  %v997_v32 = vadd.f32 1.0, %v3236_v30  ;;  %3253 = vpow2.f32 %v877_v11  ;;  %v879_v25 = vmul.f32 1.442695, %v804_v16  ;;  %v1681_v42 = vadd.f32 %v1649_v20, %v1581_v43  ;;  %v4055_v8 = vld [vmem:[%s5224_s3 + $0x8] ss:$0 sm:$0xff] }
 0x145   : > { %v3238_v37 = vpop.eup %3237  ;;  %3255 = vrcp.f32 %v996_v27  ;;  %v1682_v57 = vadd.f32 %v1650_v58, %v1582_v28  ;;  %v1749_v44 = vmul.f32 %v3780_v5, %v1713_v7  ;;  %v751_v46 = vsub.f32 0.0, %v4030_v9  ;;  %v4063_v28 = vld [vmem:[#allocation2 + $0x32] sm:$0xff] }
 0x146   : > { %v3240_v45 = vpop.eup %3239  ;;  %v1067_v62 = vmul.f32 %v3238_v37, %v3905_v59  ;;  %3257 = vrcp.f32 %v997_v32  ;;  %v4038_v13 = vadd.f32 %v4027_v33, %v605_v15  ;;  %v1750_v23 = vmul.f32 %v3780_v5, %v1714_v61 }
 0x147   : > { %v3242_v49 = vpop.eup %3241  ;;  %v963_v54 = vadd.f32 1.0, %v3240_v45  ;;  %3259 = vpow2.f32 %v879_v25  ;;  %v1781_v21 = vadd.f32 %v1749_v44, %v1681_v42  ;;  %v805_v39 = vmin.f32 %v751_v46, 60.0 }
 0x148   : > { %v3244_v55 = vpop.eup %3243  ;;  %1122 = vst.msk [vmem:[#allocation2 + $0x70] sm:$0xff] %vm1107_vm3, %v1067_v62  ;;  %v1068_v59 = vmul.f32 %v3242_v49, %v3924_v34  ;;  %v752_v63 = vsub.f32 0.0, %v4038_v13  ;;  %v1850_v2 = vmul.f32 %v3798_v52, %v4033_v24  ;;  %v1782_v34 = vadd.f32 %v1750_v23, %v1682_v57  ;;  %v610_v25 = vpop.f32.mrb[48].mxu0  ;;  %v4074_v57 = vld [vmem:[#allocation2 + $0x3a] sm:$0xff] }
 0x149   : > { %v3246_v43 = vpop.eup %3245  ;;  %1185 = vst.msk [vmem:[#allocation2 + $0x71] sm:$0x1] %vm1162_vm4, %v3484_v1  ;;  %3261 = vrcp.f32 %v963_v54  ;;  %v964_v3 = vadd.f32 1.0, %v3244_v55  ;;  %v1851_v11 = vmul.f32 %v3798_v52, %v4040_v50  ;;  %v881_v7 = vmul.f32 1.442695, %v805_v39  ;;  %v2989_v42 = vpop.f32.mrb[49].mxu0 }
 0x14a   : > { %v3248_v16 = vpop.eup %3247  ;;  %1123 = vst.msk [vmem:[#allocation2 + $0x78] sm:$0xff] %vm1107_vm3, %v1068_v59  ;;  %v1103_v20 = vmul.f32 %v3246_v43, %v3910_v0  ;;  %v806_v30 = vmin.f32 %v752_v63, 60.0  ;;  %v1882_v27 = vadd.f32 %v1850_v2, %v1781_v21  ;;  %v1950_v61 = vmul.f32 %v3835_v35, %v4048_v6  ;;  %v613_v45 = vpop.f32.mrb[50].mxu0  ;;  %v4091_v55 = vld [vmem:[%s5225_s4] ss:$0 sm:$0xff] }
 0x14b   : > { %v3250_v58 = vpop.eup %3249  ;;  %1168 = vst.msk [vmem:[#allocation2 + $0x78] sm:$0x1] %vm1162_vm4, %v3484_v1  ;;  %3263 = vrcp.f32 %v964_v3  ;;  %v998_v32 = vadd.f32 1.0, %v3248_v16  ;;  %v1883_v36 = vadd.f32 %v1851_v11, %v1782_v34  ;;  %v4072_v15 = vadd.f32 %v4027_v33, %v610_v25  ;;  %v2990_v21 = vpop.f32.mrb[51].mxu0  ;;  %v1414_v3 = vld [vmem:[#allocation2 + $0x1a] sm:$0xff]  ;;  %v1415_v34 = vld [vmem:[#allocation2 + $0x22] sm:$0xff] }
 0x14c   : > { %v1069_v0 = vmul.f32 %v3250_v58, %v3943_v29  ;;  %1158 = vst.msk [vmem:[#allocation2 + $0x190] sm:$0xff] %vm1107_vm3, %v1103_v20  ;;  %3265 = vpow2.f32 %v881_v7  ;;  %v883_v37 = vmul.f32 1.442695, %v806_v30  ;;  %v1951_v62 = vmul.f32 %v3835_v35, %v4061_v18 }
 0x14d   : > { %v3252_v44 = vpop.eup %3251  ;;  %1197 = vst.msk [vmem:[#allocation2 + $0x191] sm:$0x1] %vm1162_vm4, %v3484_v1  ;;  %3267 = vrcp.f32 %v998_v32  ;;  %v1982_v29 = vadd.f32 %v1950_v61, %v1882_v27  ;;  %v2050_v46 = vmul.f32 %v4055_v8, %v4063_v28  ;;  %v753_v54 = vsub.f32 0.0, %v4072_v15 }
 0x14e   : > { %v3254_v47 = vpop.eup %3253  ;;  %1124 = vst.msk [vmem:[#allocation2 + $0x80] sm:$0xff] %vm1107_vm3, %v1069_v0  ;;  %v1070_v49 = vmul.f32 %v3252_v44, %v3953_v31  ;;  %3269 = vpow2.f32 %v883_v37  ;;  %v4086_v23 = vadd.f32 %v4027_v33, %v613_v45  ;;  %v1983_v63 = vadd.f32 %v1951_v62, %v1883_v36 }
 0x14f   : > { %v3256_v59 = vpop.eup %3255  ;;  %v965_v39 = vadd.f32 1.0, %v3254_v47  ;;  %v2051_v2 = vmul.f32 %v4055_v8, %v4074_v57  ;;  %v2082_v43 = vadd.f32 %v2050_v46, %v1982_v29  ;;  %v807_v16 = vmin.f32 %v753_v54, 60.0 }
 0x150   : > { %v3258_v31 = vpop.eup %3257  ;;  %1125 = vst.msk [vmem:[#allocation2 + $0x88] sm:$0xff] %vm1107_vm3, %v1070_v49  ;;  %v1104_v11 = vmul.f32 %v3256_v59, %v3936_v51  ;;  %v754_v20 = vsub.f32 0.0, %v4086_v23  ;;  %v1382_v7 = vadd.f32 %v3916_v53, %v3895_v38  ;;  %v1383_v61 = vadd.f32 %v3927_v40, %v3913_v17  ;;  %v618_v53 = vpop.f32.mrb[52].mxu0 }
 0x151   : > { %v3260_v30 = vpop.eup %3259  ;;  %1186 = vst.msk [vmem:[#allocation2 + $0x89] sm:$0x1] %vm1162_vm4, %v3484_v1  ;;  %v1105_v27 = vmul.f32 %v3258_v31, %v3947_v22  ;;  %3271 = vrcp.f32 %v965_v39  ;;  %v2083_v58 = vadd.f32 %v2051_v2, %v1983_v63  ;;  %v4104_v32 = vadd.f32 %v4091_v55, %v2082_v43  ;;  %v2993_v45 = vpop.f32.mrb[53].mxu0 }
 0x152   : > { %1159 = vst.msk [vmem:[#allocation2 + $0x198] sm:$0xff] %vm1107_vm3, %v1104_v11  ;;  %v966_v51 = vadd.f32 1.0, %v3260_v30  ;;  %v885_v25 = vmul.f32 1.442695, %v807_v16  ;;  %v808_v36 = vmin.f32 %v754_v20, 60.0  ;;  %v1450_v37 = vmul.f32 %v3750_v19, %v1414_v3  ;;  %v621_v29 = vpop.f32.mrb[54].mxu0 }
 0x153   : > { %v3262_v38 = vpop.eup %3261  ;;  %1180 = vst.msk [vmem:[#allocation2 + $0x198] sm:$0x1] %vm1162_vm4, %v3484_v1  ;;  %v4113_v22 = vadd.f32 %v4091_v55, %v2083_v58  ;;  %v2153_v0 = vsub.f32 0.0, %v4104_v32  ;;  %v1451_v42 = vmul.f32 %v3750_v19, %v1415_v34  ;;  %v4124_v40 = vadd.f32 %v4027_v33, %v618_v53  ;;  %v2994_v39 = vpop.f32.mrb[55].mxu0  ;;  %v4157_v45 = vld [vmem:[#allocation2 + $0x50] sm:$0xff] }
 0x154   : > { %1160 = vst.msk [vmem:[#allocation2 + $0x1a0] sm:$0xff] %vm1107_vm3, %v1105_v27  ;;  %v1071_v44 = vmul.f32 %v3262_v38, %v3973_v48  ;;  %1207 = vst.msk [vmem:[#allocation2 + $0x198] sm:$0xff] %vm1107_vm3, %v3484_v1  ;;  %3273 = vrcp.f32 %v966_v51  ;;  %v887_v17 = vmul.f32 1.442695, %v808_v36  ;;  %v1482_v49 = vadd.f32 %v1450_v37, %v1382_v7  ;;  %v4168_v39 = vld [vmem:[#allocation2 + $0x49] sm:$0xff] }
 0x155   : > { %1208 = vst.msk [vmem:[#allocation2 + $0x1a0] sm:$0xff] %vm1107_vm3, %v3484_v1  ;;  %v3264_v62 = vpop.eup %3263  ;;  %3275 = vpow2.f32 %v885_v25  ;;  %v2154_v46 = vsub.f32 0.0, %v4113_v22  ;;  %v2185_v47 = vmin.f32 %v2153_v0, 60.0  ;;  %v755_v21 = vsub.f32 0.0, %v4124_v40 }
 0x156   : > { %v3266_v48 = vpop.eup %3265  ;;  %1126 = vst.msk [vmem:[#allocation2 + $0x90] sm:$0xff] %vm1107_vm3, %v1071_v44  ;;  %v1072_v54 = vmul.f32 %v3264_v62, %v3982_v41  ;;  %3277 = vpow2.f32 %v887_v17  ;;  %v4131_v59 = vadd.f32 %v4027_v33, %v621_v29  ;;  %v1483_v3 = vadd.f32 %v1451_v42, %v1383_v61  ;;  %v4155_v17 = vld [vmem:[#allocation2 + $0x48] sm:$0xff] }
 0x157   : > { %v3268_v63 = vpop.eup %3267  ;;  %1169 = vst.msk [vmem:[#allocation2 + $0x90] sm:$0x1] %vm1162_vm4, %v3484_v1  ;;  %v967_v2 = vadd.f32 1.0, %v3266_v48  ;;  %v2186_v43 = vmin.f32 %v2154_v46, 60.0  ;;  %v2217_v31 = vmul.f32 1.442695, %v2185_v47  ;;  %v1551_v20 = vmul.f32 %v4033_v24, %v3756_v26 }
 0x158   : > { %v3270_v34 = vpop.eup %3269  ;;  %1127 = vst.msk [vmem:[#allocation2 + $0x98] sm:$0xff] %vm1107_vm3, %v1072_v54  ;;  %v1106_v41 = vmul.f32 %v3268_v63, %v3968_v4  ;;  %v809_v11 = vmin.f32 %v755_v21, 60.0  ;;  %v756_v16 = vsub.f32 0.0, %v4131_v59  ;;  %v1552_v27 = vmul.f32 %v4040_v50, %v3756_v26  ;;  %v626_v4 = vpop.f32.mrb[56].mxu0  ;;  %v4170_v63 = vld [vmem:[#allocation2 + $0x51] sm:$0xff] }
 0x159   : > { %3279 = vrcp.f32 %v967_v2  ;;  %v968_v7 = vadd.f32 1.0, %v3270_v34  ;;  %v2219_v30 = vmul.f32 1.442695, %v2186_v43  ;;  %v1583_v25 = vadd.f32 %v1551_v20, %v1482_v49  ;;  %v2997_v44 = vpop.f32.mrb[57].mxu0 }
 0x15a   : > { %1161 = vst.msk [vmem:[#allocation2 + $0x1a8] sm:$0xff] %vm1107_vm3, %v1106_v41  ;;  %v889_v58 = vmul.f32 1.442695, %v809_v11  ;;  %v810_v51 = vmin.f32 %v756_v16, 60.0  ;;  %3281 = vpow2.f32 %v2217_v31  ;;  %v1584_v61 = vadd.f32 %v1552_v27, %v1483_v3  ;;  %v629_v62 = vpop.f32.mrb[58].mxu0  ;;  %v4182_v27 = vld [vmem:[#allocation2 + $0x52] sm:$0xff] }
 0x15b   : > { %v3272_v36 = vpop.eup %3271  ;;  %1198 = vst.msk [vmem:[#allocation2 + $0x1a9] sm:$0x1] %vm1162_vm4, %v3484_v1  ;;  %3283 = vrcp.f32 %v968_v7  ;;  %v1651_v38 = vmul.f32 %v4048_v6, %v3771_v60  ;;  %v1652_v53 = vmul.f32 %v4061_v18, %v3771_v60  ;;  %v4153_v42 = vadd.f32 %v4027_v33, %v626_v4  ;;  %v2998_v54 = vpop.f32.mrb[59].mxu0 }
 0x15c   : > { %1209 = vst.msk [vmem:[#allocation2 + $0x1a8] sm:$0xff] %vm1107_vm3, %v3484_v1  ;;  %v1073_v0 = vmul.f32 %v3272_v36, %v3999_v56  ;;  %3285 = vpow2.f32 %v889_v58  ;;  %v891_v37 = vmul.f32 1.442695, %v810_v51  ;;  %v1751_v47 = vmul.f32 %v4063_v28, %v3780_v5 }
 0x15d   : > { %3287 = vpow2.f32 %v2219_v30  ;;  %v1683_v29 = vadd.f32 %v1651_v38, %v1583_v25  ;;  %v1684_v46 = vadd.f32 %v1652_v53, %v1584_v61  ;;  %v757_v56 = vsub.f32 0.0, %v4153_v42  ;;  %v4180_v30 = vld [vmem:[#allocation2 + $0x4a] sm:$0xff] }
 0x15e   : > { %v3274_v49 = vpop.eup %3273  ;;  %1128 = vst.msk [vmem:[#allocation2 + $0xa0] sm:$0xff] %vm1107_vm3, %v1073_v0  ;;  %3289 = vpow2.f32 %v891_v37  ;;  %v4164_v48 = vadd.f32 %v4027_v33, %v629_v62  ;;  %v1752_v21 = vmul.f32 %v4074_v57, %v3780_v5  ;;  %v1852_v3 = vmul.f32 %v3798_v52, %v4155_v17 }
 0x15f   : > { %v3276_v2 = vpop.eup %3275  ;;  %1187 = vst.msk [vmem:[#allocation2 + $0xa1] sm:$0x1] %vm1162_vm4, %v3484_v1  ;;  %v1074_v43 = vmul.f32 %v3274_v49, %v4008_v14  ;;  %v1783_v31 = vadd.f32 %v1751_v47, %v1683_v29  ;;  %v1853_v34 = vmul.f32 %v3798_v52, %v4157_v45  ;;  %v811_v16 = vmin.f32 %v757_v56, 60.0 }
 0x160   : > { %v3278_v41 = vpop.eup %3277  ;;  %v969_v11 = vadd.f32 1.0, %v3276_v2  ;;  %v758_v20 = vsub.f32 0.0, %v4164_v48  ;;  %v1784_v7 = vadd.f32 %v1752_v21, %v1684_v46  ;;  %v1952_v51 = vmul.f32 %v3835_v35, %v4168_v39  ;;  %v634_v53 = vpop.f32.mrb[60].mxu0 }
 0x161   : > { %1129 = vst.msk [vmem:[#allocation2 + $0xa8] sm:$0xff] %vm1107_vm3, %v1074_v43  ;;  %v970_v14 = vadd.f32 1.0, %v3278_v41  ;;  %v1884_v58 = vadd.f32 %v1852_v3, %v1783_v31  ;;  %v1953_v25 = vmul.f32 %v3835_v35, %v4170_v63  ;;  %v893_v36 = vmul.f32 1.442695, %v811_v16  ;;  %v3001_v49 = vpop.f32.mrb[61].mxu0 }
 0x162   : > { %1170 = vst.msk [vmem:[#allocation2 + $0xa8] sm:$0x1] %vm1162_vm4, %v3484_v1  ;;  %3291 = vrcp.f32 %v969_v11  ;;  %v812_v4 = vmin.f32 %v758_v20, 60.0  ;;  %v1885_v61 = vadd.f32 %v1853_v34, %v1784_v7  ;;  %v2052_v37 = vmul.f32 %v4055_v8, %v4180_v30  ;;  %v637_v21 = vpop.f32.mrb[62].mxu0 }
 0x163   : > { %v3280_v38 = vpop.eup %3279  ;;  %3293 = vrcp.f32 %v970_v14  ;;  %v1984_v0 = vadd.f32 %v1952_v51, %v1884_v58  ;;  %v2053_v44 = vmul.f32 %v4055_v8, %v4182_v27  ;;  %v4197_v47 = vadd.f32 %v4027_v33, %v634_v53  ;;  %v3002_v11 = vpop.f32.mrb[63].mxu0 }
 0x164   : > { %v3282_v62 = vpop.eup %3281  ;;  %v1075_v29 = vmul.f32 %v3280_v38, %v4030_v9  ;;  %3295 = vpow2.f32 %v893_v36  ;;  %v895_v46 = vmul.f32 1.442695, %v812_v4  ;;  %v1985_v2 = vadd.f32 %v1953_v25, %v1885_v61 }
 0x165   : > { %v3284_v56 = vpop.eup %3283  ;;  %v2281_v54 = vadd.f32 1.0, %v3282_v62  ;;  %v2084_v43 = vadd.f32 %v2052_v37, %v1984_v0  ;;  %v1252_v31 = vmul.f32 %v4033_v24, %v3741_v10  ;;  %v759_v9 = vsub.f32 0.0, %v4197_v47 }
 0x166   : > { %v3286_v3 = vpop.eup %3285  ;;  %1130 = vst.msk [vmem:[#allocation2 + $0xb0] sm:$0xff] %vm1107_vm3, %v1075_v29  ;;  %v1076_v34 = vmul.f32 %v3284_v56, %v4038_v13  ;;  %3297 = vpow2.f32 %v895_v46  ;;  %v4205_v41 = vadd.f32 %v4027_v33, %v637_v21  ;;  %v2085_v7 = vadd.f32 %v2053_v44, %v1985_v2 }
 0x167   : > { %v3288_v16 = vpop.eup %3287  ;;  %v971_v20 = vadd.f32 1.0, %v3286_v3  ;;  %3299 = vrcp.f32 %v2281_v54  ;;  %v4208_v14 = vadd.f32 %v4091_v55, %v2084_v43  ;;  %v813_v51 = vmin.f32 %v759_v9, 60.0 }
 0x168   : > { %v3290_v24 = vpop.eup %3289  ;;  %1131 = vst.msk [vmem:[#allocation2 + $0xb8] sm:$0xff] %vm1107_vm3, %v1076_v34  ;;  %v2282_v58 = vadd.f32 1.0, %v3288_v16  ;;  %v760_v13 = vsub.f32 0.0, %v4205_v41  ;;  %v1253_v25 = vmul.f32 %v4040_v50, %v3741_v10  ;;  %v4217_v4 = vadd.f32 %v4091_v55, %v2085_v7  ;;  %v642_v44 = vpop.f32.mrb[64].mxu0 }
 0x169   : > { %1188 = vst.msk [vmem:[#allocation2 + $0xb9] sm:$0x1] %vm1162_vm4, %v3484_v1  ;;  %3301 = vrcp.f32 %v971_v20  ;;  %v972_v36 = vadd.f32 1.0, %v3290_v24  ;;  %v2155_v61 = vsub.f32 0.0, %v4208_v14  ;;  %v897_v38 = vmul.f32 1.442695, %v813_v51 }
 0x16a   : > { %3303 = vrcp.f32 %v2282_v58  ;;  %v814_v53 = vmin.f32 %v760_v13, 60.0  ;;  %v1352_v0 = vmul.f32 %v4048_v6, %v3744_v12  ;;  %v2156_v37 = vsub.f32 0.0, %v4217_v4  ;;  %v3005_v56 = vpop.f32.mrb[65].mxu0 }
 0x16b   : > { %3305 = vrcp.f32 %v972_v36  ;;  %v2187_v50 = vmin.f32 %v2155_v61, 60.0  ;;  %v1353_v62 = vmul.f32 %v4061_v18, %v3744_v12  ;;  %v4226_v49 = vadd.f32 %v4027_v33, %v642_v44  ;;  %v645_v3 = vpop.f32.mrb[66].mxu0 }
 0x16c   : > { %v3292_v29 = vpop.eup %3291  ;;  %3307 = vpow2.f32 %v897_v38  ;;  %v899_v46 = vmul.f32 1.442695, %v814_v53  ;;  %v1384_v54 = vadd.f32 %v1352_v0, %v1252_v31  ;;  %v2188_v6 = vmin.f32 %v2156_v37, 60.0  ;;  %v3006_v20 = vpop.f32.mrb[67].mxu0 }
 0x16d   : > { %v3294_v21 = vpop.eup %3293  ;;  %v1077_v2 = vmul.f32 %v3292_v29, %v4072_v15  ;;  %v2221_v43 = vmul.f32 1.442695, %v2187_v50  ;;  %v1385_v34 = vadd.f32 %v1353_v62, %v1253_v25  ;;  %v761_v18 = vsub.f32 0.0, %v4226_v49 }
 0x16e   : > { %v3296_v9 = vpop.eup %3295  ;;  %v1078_v11 = vmul.f32 %v3294_v21, %v4086_v23  ;;  %3309 = vpow2.f32 %v899_v46  ;;  %v4232_v16 = vadd.f32 %v4027_v33, %v645_v3  ;;  %v2223_v7 = vmul.f32 1.442695, %v2188_v6 }
 0x16f   : > { %1132 = vst.msk [vmem:[#allocation2 + $0xc0] sm:$0xff] %vm1107_vm3, %v1077_v2  ;;  %v973_v31 = vadd.f32 1.0, %v3296_v9  ;;  %3311 = vpow2.f32 %v2221_v43  ;;  %v1452_v15 = vmul.f32 %v4063_v28, %v3750_v19  ;;  %v815_v23 = vmin.f32 %v761_v18, 60.0  ;;  %v4257_v9 = vld [vmem:[#allocation2 + $0x60] sm:$0xff] }
 0x170   : > { %v3298_v24 = vpop.eup %3297  ;;  %1171 = vst.msk [vmem:[#allocation2 + $0xc0] sm:$0x1] %vm1162_vm4, %v3484_v1  ;;  %v762_v58 = vsub.f32 0.0, %v4232_v16  ;;  %v1453_v51 = vmul.f32 %v4074_v57, %v3750_v19  ;;  %v1553_v13 = vmul.f32 %v4155_v17, %v3756_v26  ;;  %v1554_v28 = vmul.f32 %v4157_v45, %v3756_v26  ;;  %v650_v50 = vpop.f32.mrb[68].mxu0 }
 0x171   : > { %1133 = vst.msk [vmem:[#allocation2 + $0xc8] sm:$0xff] %vm1107_vm3, %v1078_v11  ;;  %v3300_v25 = vpop.eup %3299  ;;  %3313 = vrcp.f32 %v973_v31  ;;  %v974_v36 = vadd.f32 1.0, %v3298_v24  ;;  %v1484_v61 = vadd.f32 %v1452_v15, %v1384_v54  ;;  %v901_v53 = vmul.f32 1.442695, %v815_v23  ;;  %v4265_v31 = vld [vmem:[#allocation2 + $0x68] sm:$0xff] }
 0x172   : > { %v2345_v38 = vmul.f32 %v3300_v25, %v4104_v32  ;;  %3315 = vpow2.f32 %v2223_v7  ;;  %v816_v0 = vmin.f32 %v762_v58, 60.0  ;;  %v1485_v44 = vadd.f32 %v1453_v51, %v1385_v34  ;;  %v3009_v32 = vpop.f32.mrb[69].mxu0  ;;  %v4277_v25 = vld [vmem:[#allocation2 + $0x61] sm:$0xff] }
 0x173   : > { %v3302_v37 = vpop.eup %3301  ;;  %3317 = vrcp.f32 %v974_v36  ;;  %v1585_v57 = vadd.f32 %v1553_v13, %v1484_v61  ;;  %v1653_v62 = vmul.f32 %v4168_v39, %v3771_v60  ;;  %v4252_v54 = vadd.f32 %v4027_v33, %v650_v50  ;;  %v653_v6 = vpop.f32.mrb[70].mxu0  ;;  %v4279_v36 = vld [vmem:[#allocation2 + $0x69] sm:$0xff] }
 0x174   : > { %v3304_v29 = vpop.eup %3303  ;;  %v1079_v46 = vmul.f32 %v3302_v37, %v4124_v40  ;;  %3319 = vpow2.f32 %v901_v53  ;;  %v903_v56 = vmul.f32 1.442695, %v816_v0  ;;  %v1586_v43 = vadd.f32 %v1554_v28, %v1485_v44  ;;  %v4292_v32 = vld [vmem:[#allocation2 + $0x6a] sm:$0xff] }
 0x175   : > { %v3306_v21 = vpop.eup %3305  ;;  %v2346_v2 = vmul.f32 %v3304_v29, %v4113_v22  ;;  %v1654_v3 = vmul.f32 %v4170_v63, %v3771_v60  ;;  %v1685_v34 = vadd.f32 %v1653_v62, %v1585_v57  ;;  %v763_v18 = vsub.f32 0.0, %v4252_v54  ;;  %v3010_v22 = vpop.f32.mrb[71].mxu0  ;;  %v4286_v57 = vld [vmem:[#allocation2 + $0x62] sm:$0xff] }
 0x176   : > { %v3308_v11 = vpop.eup %3307  ;;  %1134 = vst.msk [vmem:[#allocation2 + $0xd0] sm:$0xff] %vm1107_vm3, %v1079_v46  ;;  %v1080_v40 = vmul.f32 %v3306_v21, %v4131_v59  ;;  %3321 = vpow2.f32 %v903_v56  ;;  %v4263_v20 = vadd.f32 %v4027_v33, %v653_v6  ;;  %v1753_v23 = vmul.f32 %v4180_v30, %v3780_v5 }
 0x177   : > { %1189 = vst.msk [vmem:[#allocation2 + $0xd1] sm:$0x1] %vm1162_vm4, %v3484_v1  ;;  %v2377_v7 = vpack.c.bf16 %v2346_v2, %v2345_v38  ;;  %v975_v15 = vadd.f32 1.0, %v3308_v11  ;;  %v1686_v24 = vadd.f32 %v1654_v3, %v1586_v43  ;;  %v817_v59 = vmin.f32 %v763_v18, 60.0 }
 0x178   : > { %v3310_v58 = vpop.eup %3309  ;;  %1135 = vst.msk [vmem:[#allocation2 + $0xd8] sm:$0xff] %vm1107_vm3, %v1080_v40  ;;  %v764_v51 = vsub.f32 0.0, %v4263_v20  ;;  %v1754_v33 = vmul.f32 %v4182_v27, %v3780_v5  ;;  %v1854_v13 = vmul.f32 %v3798_v52, %v4257_v9  ;;  %v1785_v38 = vadd.f32 %v1753_v23, %v1685_v34 }
 0x179   : > { %v3312_v61 = vpop.eup %3311  ;;  %1172 = vst.msk [vmem:[#allocation2 + $0xd8] sm:$0x1] %vm1162_vm4, %v3484_v1  ;;  %3049 = vmatprep.mubr.msk.bf16.mxu1 %vm1107_vm3, %v2377_v7  ;;  %3323 = vrcp.f32 %v975_v15  ;;  %v976_v28 = vadd.f32 1.0, %v3310_v58  ;;  %v1855_v53 = vmul.f32 %v3798_v52, %v4265_v31  ;;  %v905_v37 = vmul.f32 1.442695, %v817_v59 }
 0x17a   : > { %v2283_v0 = vadd.f32 1.0, %v3312_v61  ;;  %v818_v50 = vmin.f32 %v764_v51, 60.0  ;;  %v1786_v44 = vadd.f32 %v1754_v33, %v1686_v24  ;;  %v1886_v29 = vadd.f32 %v1854_v13, %v1785_v38 }
 0x17b   : > { %v3314_v62 = vpop.eup %3313  ;;  %3325 = vrcp.f32 %v976_v28  ;;  %v1954_v46 = vmul.f32 %v3835_v35, %v4277_v25  ;;  %v1955_v56 = vmul.f32 %v3835_v35, %v4279_v36  ;;  %v2054_v40 = vmul.f32 %v4055_v8, %v4286_v57 }
 0x17c   : > { %v3316_v21 = vpop.eup %3315  ;;  %v1081_v2 = vmul.f32 %v3314_v62, %v4153_v42  ;;  %3327 = vrcp.f32 %v2283_v0  ;;  %v907_v6 = vmul.f32 1.442695, %v818_v50  ;;  %v1887_v43 = vadd.f32 %v1855_v53, %v1786_v44 }
 0x17d   : > { %v3318_v3 = vpop.eup %3317  ;;  %v2284_v34 = vadd.f32 1.0, %v3316_v21  ;;  %3329 = vpow2.f32 %v905_v37  ;;  %v1986_v11 = vadd.f32 %v1954_v46, %v1886_v29  ;;  %v2055_v42 = vmul.f32 %v4055_v8, %v4292_v32  ;;  %v4329_v29 = vld [vmem:[#allocation2 + $0x78] sm:$0xff] }
 0x17e   : > { %v3320_v18 = vpop.eup %3319  ;;  %1136 = vst.msk [vmem:[#allocation2 + $0xe0] sm:$0xff] %vm1107_vm3, %v1081_v2  ;;  %v1082_v22 = vmul.f32 %v3318_v3, %v4164_v48  ;;  %3331 = vpow2.f32 %v907_v6  ;;  %v1987_v7 = vadd.f32 %v1955_v56, %v1887_v43  ;;  %v1254_v23 = vmul.f32 %v4155_v17, %v3741_v10 }
 0x17f   : > { %3333 = vrcp.f32 %v2284_v34  ;;  %v977_v15 = vadd.f32 1.0, %v3320_v18  ;;  %v2086_v24 = vadd.f32 %v2054_v40, %v1986_v11  ;;  %v1255_v51 = vmul.f32 %v4157_v45, %v3741_v10  ;;  %v4339_v11 = vld [vmem:[#allocation2 + $0x80] sm:$0xff] }
 0x180   : > { %v3322_v58 = vpop.eup %3321  ;;  %1137 = vst.msk [vmem:[#allocation2 + $0xe8] sm:$0xff] %vm1107_vm3, %v1082_v22  ;;  %v2087_v59 = vadd.f32 %v2055_v42, %v1987_v7  ;;  %v1354_v48 = vmul.f32 %v4168_v39, %v3744_v12  ;;  %v1355_v33 = vmul.f32 %v4170_v63, %v3744_v12  ;;  %v1454_v61 = vmul.f32 %v4180_v30, %v3750_v19  ;;  %v4341_v40 = vld [vmem:[#allocation2 + $0x79] sm:$0xff] }
 0x181   : > { %1190 = vst.msk [vmem:[#allocation2 + $0xe9] sm:$0x1] %vm1162_vm4, %v3484_v1  ;;  %3335 = vrcp.f32 %v977_v15  ;;  %v978_v13 = vadd.f32 1.0, %v3322_v58  ;;  %v4313_v17 = vadd.f32 %v4091_v55, %v2086_v24  ;;  %v1455_v39 = vmul.f32 %v4182_v27, %v3750_v19 }
 0x182   : > { %v4318_v28 = vadd.f32 %v4091_v55, %v2087_v59  ;;  %v1386_v45 = vadd.f32 %v1354_v48, %v1254_v23  ;;  %v1387_v38 = vadd.f32 %v1355_v33, %v1255_v51  ;;  %v1555_v0 = vmul.f32 %v4257_v9, %v3756_v26  ;;  %v4351_v51 = vld [vmem:[#allocation2 + $0x81] sm:$0xff] }
 0x183   : > { %v3324_v63 = vpop.eup %3323  ;;  %3337 = vrcp.f32 %v978_v13  ;;  %v2157_v53 = vsub.f32 0.0, %v4313_v17  ;;  %v1556_v37 = vmul.f32 %v4265_v31, %v3756_v26  ;;  %v1655_v56 = vmul.f32 %v4277_v25, %v3771_v60  ;;  %v4353_v48 = vld [vmem:[#allocation2 + $0x7a] sm:$0xff]  ;;  %v4355_v33 = vld [vmem:[#allocation2 + $0x82] sm:$0xff] }
 0x184   : > { %v1083_v30 = vmul.f32 %v3324_v63, %v4197_v47  ;;  %v2158_v50 = vsub.f32 0.0, %v4318_v28  ;;  %v1486_v44 = vadd.f32 %v1454_v61, %v1386_v45  ;;  %v1487_v62 = vadd.f32 %v1455_v39, %v1387_v38 }
 0x185   : > { %v3326_v46 = vpop.eup %3325  ;;  %v2189_v27 = vmin.f32 %v2157_v53, 60.0  ;;  %v1656_v21 = vmul.f32 %v4279_v36, %v3771_v60  ;;  %v1755_v2 = vmul.f32 %v4286_v57, %v3780_v5  ;;  %v1756_v42 = vmul.f32 %v4292_v32, %v3780_v5 }
 0x186   : > { %v3328_v6 = vpop.eup %3327  ;;  %1138 = vst.msk [vmem:[#allocation2 + $0xf0] sm:$0xff] %vm1107_vm3, %v1083_v30  ;;  %v1084_v47 = vmul.f32 %v3326_v46, %v4205_v41  ;;  %v2190_v43 = vmin.f32 %v2158_v50, 60.0  ;;  %v1587_v3 = vadd.f32 %v1555_v0, %v1486_v44  ;;  %v1588_v34 = vadd.f32 %v1556_v37, %v1487_v62 }
 0x187   : > { %v3330_v18 = vpop.eup %3329  ;;  %1173 = vst.msk [vmem:[#allocation2 + $0xf0] sm:$0x1] %vm1162_vm4, %v3484_v1  ;;  %v2347_v22 = vmul.f32 %v3328_v6, %v4208_v14  ;;  %v2225_v7 = vmul.f32 1.442695, %v2189_v27  ;;  %v1856_v41 = vmul.f32 %v3798_v52, %v4329_v29  ;;  %v1857_v61 = vmul.f32 %v3798_v52, %v4339_v11 }
 0x188   : > { %v3332_v15 = vpop.eup %3331  ;;  %1139 = vst.msk [vmem:[#allocation2 + $0xf8] sm:$0xff] %vm1107_vm3, %v1084_v47  ;;  %v979_v24 = vadd.f32 1.0, %v3330_v18  ;;  %v2227_v23 = vmul.f32 1.442695, %v2190_v43  ;;  %v1687_v58 = vadd.f32 %v1655_v56, %v1587_v3  ;;  %v1688_v59 = vadd.f32 %v1656_v21, %v1588_v34  ;;  %v4388_v3 = vld [vmem:[#allocation2 + $0x90] sm:$0xff]  ;;  %v4395_v18 = vld [vmem:[#allocation2 + $0x98] sm:$0xff] }
 0x189   : > { %v3334_v14 = vpop.eup %3333  ;;  %v980_v13 = vadd.f32 1.0, %v3332_v15  ;;  %3339 = vpow2.f32 %v2225_v7  ;;  %v1956_v45 = vmul.f32 %v3835_v35, %v4341_v40  ;;  %v1957_v0 = vmul.f32 %v3835_v35, %v4351_v51  ;;  %v4405_v15 = vld [vmem:[#allocation2 + $0x99] sm:$0xff] }
 0x18a   : > { %v2348_v38 = vmul.f32 %v3334_v14, %v4217_v4  ;;  %3341 = vrcp.f32 %v979_v24  ;;  %v1787_v39 = vadd.f32 %v1755_v2, %v1687_v58  ;;  %v1788_v63 = vadd.f32 %v1756_v42, %v1688_v59  ;;  %v4414_v14 = vld [vmem:[#allocation2 + $0x92] sm:$0xff] }
 0x18b   : > { %v3336_v53 = vpop.eup %3335  ;;  %3343 = vrcp.f32 %v980_v13  ;;  %v2056_v37 = vmul.f32 %v4055_v8, %v4353_v48  ;;  %v2057_v30 = vmul.f32 %v4055_v8, %v4355_v33  ;;  %v1256_v27 = vmul.f32 %v4257_v9, %v3741_v10 }
 0x18c   : > { %v2378_v50 = vpack.c.bf16 %v2348_v38, %v2347_v22  ;;  %v1085_v44 = vmul.f32 %v3336_v53, %v4226_v49  ;;  %3345 = vpow2.f32 %v2227_v23  ;;  %v1888_v62 = vadd.f32 %v1856_v41, %v1787_v39  ;;  %v4397_v22 = vld [vmem:[#allocation2 + $0x91] sm:$0xff] }
 0x18d   : > { %v3338_v4 = vpop.eup %3337  ;;  %v1889_v46 = vadd.f32 %v1857_v61, %v1788_v63  ;;  %v1257_v56 = vmul.f32 %v4265_v31, %v3741_v10  ;;  %v1356_v21 = vmul.f32 %v4277_v25, %v3744_v12  ;;  %v1357_v6 = vmul.f32 %v4279_v36, %v3744_v12 }
 0x18e   : > { %3050 = vmatmul.mubr.msk.bf16.vlgmr.msra.gmra.mrb[36].mxu1 %vm1107_vm3, %v2378_v50  ;;  %1140 = vst.msk [vmem:[#allocation2 + $0x100] sm:$0xff] %vm1107_vm3, %v1085_v44  ;;  %v1086_v2 = vmul.f32 %v3338_v4, %v4232_v16  ;;  %v1988_v49 = vadd.f32 %v1956_v45, %v1888_v62  ;;  %v1456_v47 = vmul.f32 %v4286_v57, %v3750_v19  ;;  %v4426_v50 = vld [vmem:[#allocation2 + $0x9a] sm:$0xff] }
 0x18f   : > { %1191 = vst.msk [vmem:[#allocation2 + $0x101] sm:$0x1] %vm1162_vm4, %v3484_v1  ;;  %v1989_v9 = vadd.f32 %v1957_v0, %v1889_v46  ;;  %v1388_v31 = vadd.f32 %v1356_v21, %v1256_v27  ;;  %v1457_v25 = vmul.f32 %v4292_v32, %v3750_v19  ;;  %v1557_v43 = vmul.f32 %v4329_v29, %v3756_v26 }
 0x190   : > { %1141 = vst.msk [vmem:[#allocation2 + $0x108] sm:$0xff] %vm1107_vm3, %v1086_v2  ;;  %v2088_v16 = vadd.f32 %v2056_v37, %v1988_v49  ;;  %v1389_v36 = vadd.f32 %v1357_v6, %v1257_v56  ;;  %v1558_v57 = vmul.f32 %v4339_v11, %v3756_v26  ;;  %v1657_v34 = vmul.f32 %v4341_v40, %v3771_v60 }
 0x191   : > { %1174 = vst.msk [vmem:[#allocation2 + $0x108] sm:$0x1] %vm1162_vm4, %v3484_v1  ;;  %v2089_v32 = vadd.f32 %v2057_v30, %v1989_v9  ;;  %v1488_v7 = vadd.f32 %v1456_v47, %v1388_v31  ;;  %v1658_v42 = vmul.f32 %v4351_v51, %v3771_v60  ;;  %v1757_v41 = vmul.f32 %v4353_v48, %v3780_v5 }
 0x192   : > { %v4408_v24 = vadd.f32 %v4091_v55, %v2088_v16  ;;  %v1489_v23 = vadd.f32 %v1457_v25, %v1389_v36  ;;  %v1758_v58 = vmul.f32 %v4355_v33, %v3780_v5  ;;  %v1858_v59 = vmul.f32 %v3798_v52, %v4388_v3 }
 0x193   : > { %v3340_v13 = vpop.eup %3339  ;;  %v4417_v61 = vadd.f32 %v4091_v55, %v2089_v32  ;;  %v1589_v45 = vadd.f32 %v1557_v43, %v1488_v7  ;;  %v1859_v38 = vmul.f32 %v3798_v52, %v4395_v18  ;;  %v1958_v39 = vmul.f32 %v3835_v35, %v4397_v22 }
 0x194   : > { %v3342_v63 = vpop.eup %3341  ;;  %v2285_v53 = vadd.f32 1.0, %v3340_v13  ;;  %v2159_v0 = vsub.f32 0.0, %v4408_v24  ;;  %v1590_v37 = vadd.f32 %v1558_v57, %v1489_v23  ;;  %v1959_v30 = vmul.f32 %v3835_v35, %v4405_v15  ;;  %v4455_v23 = vld [vmem:[#allocation2 + $0xa8] sm:$0xff] }
 0x195   : > { %v3344_v44 = vpop.eup %3343  ;;  %v1087_v62 = vmul.f32 %v3342_v63, %v4252_v54  ;;  %v2160_v4 = vsub.f32 0.0, %v4417_v61  ;;  %v1689_v46 = vadd.f32 %v1657_v34, %v1589_v45  ;;  %v2058_v27 = vmul.f32 %v4055_v8, %v4414_v14  ;;  %v4463_v13 = vld [vmem:[#allocation2 + $0xa9] sm:$0xff]  ;;  %v4465_v45 = vld [vmem:[#allocation2 + $0xb1] sm:$0xff] }
 0x196   : > { %v3346_v56 = vpop.eup %3345  ;;  %v1088_v21 = vmul.f32 %v3344_v44, %v4263_v20  ;;  %3347 = vrcp.f32 %v2285_v53  ;;  %v2191_v2 = vmin.f32 %v2159_v0, 60.0  ;;  %v1690_v49 = vadd.f32 %v1658_v42, %v1590_v37  ;;  %v4471_v0 = vld [vmem:[#allocation2 + $0xaa] sm:$0xff] }
 0x197   : > { %1142 = vst.msk [vmem:[#allocation2 + $0x110] sm:$0xff] %vm1107_vm3, %v1087_v62  ;;  %v2286_v6 = vadd.f32 1.0, %v3346_v56  ;;  %v2192_v47 = vmin.f32 %v2160_v4, 60.0  ;;  %v1789_v9 = vadd.f32 %v1757_v41, %v1689_v46  ;;  %v2059_v54 = vmul.f32 %v4055_v8, %v4426_v50  ;;  %v4480_v4 = vld [vmem:[#allocation2 + $0xb2] sm:$0xff] }
 0x198   : > { %1143 = vst.msk [vmem:[#allocation2 + $0x118] sm:$0xff] %vm1107_vm3, %v1088_v21  ;;  %v2229_v31 = vmul.f32 1.442695, %v2191_v2  ;;  %v1790_v25 = vadd.f32 %v1758_v58, %v1690_v49  ;;  %v1258_v43 = vmul.f32 %v4329_v29, %v3741_v10  ;;  %v1259_v20 = vmul.f32 %v4339_v11, %v3741_v10 }
 0x199   : > { %1192 = vst.msk [vmem:[#allocation2 + $0x119] sm:$0x1] %vm1162_vm4, %v3484_v1  ;;  %3349 = vrcp.f32 %v2286_v6  ;;  %v2231_v16 = vmul.f32 1.442695, %v2192_v47  ;;  %v1890_v36 = vadd.f32 %v1858_v59, %v1789_v9  ;;  %v1358_v57 = vmul.f32 %v4341_v40, %v3744_v12  ;;  %v4494_v9 = vld [vmem:[%s5224_s3 + $0x8] ss:$0 sm:$0xff] }
 0x19a   : > { %3351 = vpow2.f32 %v2229_v31  ;;  %v1891_v8 = vadd.f32 %v1859_v38, %v1790_v25  ;;  %v1359_v34 = vmul.f32 %v4351_v51, %v3744_v12  ;;  %v1458_v29 = vmul.f32 %v4353_v48, %v3750_v19  ;;  %v4457_v51 = vld [vmem:[#allocation2 + $0xb0] sm:$0xff] }
 0x19b   : > { %3353 = vpow2.f32 %v2231_v16  ;;  %v1990_v32 = vadd.f32 %v1958_v39, %v1890_v36  ;;  %v1390_v11 = vadd.f32 %v1358_v57, %v1258_v43  ;;  %v1459_v1 = vmul.f32 %v4355_v33, %v3750_v19 }
 0x19c   : > { %v1991_v7 = vadd.f32 %v1959_v30, %v1891_v8  ;;  %v1391_v42 = vadd.f32 %v1359_v34, %v1259_v20  ;;  %v1559_v41 = vmul.f32 %v4388_v3, %v3756_v26  ;;  %v1560_v40 = vmul.f32 %v4395_v18, %v3756_v26 }
 0x19d   : > { %v2090_v58 = vadd.f32 %v2058_v27, %v1990_v32  ;;  %v1490_v48 = vadd.f32 %v1458_v29, %v1390_v11  ;;  %v1659_v59 = vmul.f32 %v4397_v22, %v3771_v60  ;;  %v1660_v33 = vmul.f32 %v4405_v15, %v3771_v60 }
 0x19e   : > { %v2091_v38 = vadd.f32 %v2059_v54, %v1991_v7  ;;  %v1491_v39 = vadd.f32 %v1459_v1, %v1391_v42  ;;  %v1759_v63 = vmul.f32 %v4414_v14, %v3780_v5  ;;  %v1760_v53 = vmul.f32 %v4426_v50, %v3780_v5 }
 0x19f   : > { %v4474_v37 = vadd.f32 %v4091_v55, %v2090_v58  ;;  %v1591_v30 = vadd.f32 %v1559_v41, %v1490_v48  ;;  %v1860_v44 = vmul.f32 %v3798_v52, %v4455_v23  ;;  %v1861_v62 = vmul.f32 %v3798_v52, %v4457_v51 }
 0x1a0   : > { %v3348_v46 = vpop.eup %3347  ;;  %v4483_v27 = vadd.f32 %v4091_v55, %v2091_v38  ;;  %v1592_v56 = vadd.f32 %v1560_v40, %v1491_v39  ;;  %v1960_v21 = vmul.f32 %v3835_v35, %v4463_v13  ;;  %v1961_v2 = vmul.f32 %v3835_v35, %v4465_v45 }
 0x1a1   : > { %v2349_v49 = vmul.f32 %v3348_v46, %v4313_v17  ;;  %v2161_v6 = vsub.f32 0.0, %v4474_v37  ;;  %v1691_v47 = vadd.f32 %v1659_v59, %v1591_v30  ;;  %v2060_v55 = vmul.f32 %v4494_v9, %v4471_v0  ;;  %v4519_v30 = vld [vmem:[#allocation2 + $0xc0] sm:$0xff]  ;;  %v4523_v46 = vld [vmem:[#allocation2 + $0xc8] sm:$0xff] }
 0x1a2   : > { %v2162_v54 = vsub.f32 0.0, %v4483_v27  ;;  %v1692_v31 = vadd.f32 %v1660_v33, %v1592_v56  ;;  %v2061_v25 = vmul.f32 %v4494_v9, %v4480_v4  ;;  %v1260_v17 = vmul.f32 %v4388_v3, %v3741_v10  ;;  %v4530_v56 = vld [vmem:[%s5225_s4] ss:$0 sm:$0xff] }
 0x1a3   : > { %v3350_v43 = vpop.eup %3349  ;;  %v2193_v20 = vmin.f32 %v2161_v6, 60.0  ;;  %v1791_v16 = vadd.f32 %v1759_v63, %v1691_v47  ;;  %v1261_v36 = vmul.f32 %v4395_v18, %v3741_v10  ;;  %v1360_v57 = vmul.f32 %v4397_v22, %v3744_v12  ;;  %v4539_v47 = vld [vmem:[#allocation2 + $0xc9] sm:$0xff] }
 0x1a4   : > { %v3352_v8 = vpop.eup %3351  ;;  %v2350_v34 = vmul.f32 %v3350_v43, %v4318_v28  ;;  %v2194_v29 = vmin.f32 %v2162_v54, 60.0  ;;  %v1792_v32 = vadd.f32 %v1760_v53, %v1692_v31  ;;  %v1361_v11 = vmul.f32 %v4405_v15, %v3744_v12  ;;  %v4550_v43 = vld [vmem:[#allocation2 + $0xca] sm:$0xff] }
 0x1a5   : > { %v3354_v1 = vpop.eup %3353  ;;  %v2287_v7 = vadd.f32 1.0, %v3352_v8  ;;  %v2233_v3 = vmul.f32 1.442695, %v2193_v20  ;;  %v1892_v42 = vadd.f32 %v1860_v44, %v1791_v16  ;;  %v1392_v41 = vadd.f32 %v1360_v57, %v1260_v17 }
 0x1a6   : > { %v2379_v40 = vpack.c.bf16 %v2350_v34, %v2349_v49  ;;  %v2288_v58 = vadd.f32 1.0, %v3354_v1  ;;  %v2235_v48 = vmul.f32 1.442695, %v2194_v29  ;;  %v1893_v18 = vadd.f32 %v1861_v62, %v1792_v32 }
 0x1a7   : > { %3355 = vrcp.f32 %v2287_v7  ;;  %v1992_v59 = vadd.f32 %v1960_v21, %v1892_v42  ;;  %v1393_v22 = vadd.f32 %v1361_v11, %v1261_v36  ;;  %v1460_v28 = vmul.f32 %v4414_v14, %v3750_v19 }
 0x1a8   : > { %3053 = vmatprep.mubr.msk.bf16.mxu1 %vm1107_vm3, %v2379_v40  ;;  %3357 = vrcp.f32 %v2288_v58  ;;  %v1993_v33 = vadd.f32 %v1961_v2, %v1893_v18  ;;  %v1461_v15 = vmul.f32 %v4426_v50, %v3750_v19  ;;  %v1561_v38 = vmul.f32 %v4455_v23, %v3756_v26  ;;  %v4525_v50 = vld [vmem:[#allocation2 + $0xc1] sm:$0xff] }
 0x1a9   : > { %3359 = vpow2.f32 %v2233_v3  ;;  %v2092_v39 = vadd.f32 %v2060_v55, %v1992_v59  ;;  %v1492_v63 = vadd.f32 %v1460_v28, %v1392_v41  ;;  %v1562_v53 = vmul.f32 %v4457_v51, %v3756_v26  ;;  %v4541_v55 = vld [vmem:[#allocation2 + $0xc2] sm:$0xff] }
 0x1aa   : > { %3361 = vpow2.f32 %v2235_v48  ;;  %v2093_v14 = vadd.f32 %v2061_v25, %v1993_v33  ;;  %v1493_v44 = vadd.f32 %v1461_v15, %v1393_v22  ;;  %v1661_v62 = vmul.f32 %v4463_v13, %v3771_v60 }
 0x1ab   : > { %v4533_v21 = vadd.f32 %v4530_v56, %v2092_v39  ;;  %v1593_v2 = vadd.f32 %v1561_v38, %v1492_v63  ;;  %v1662_v49 = vmul.f32 %v4465_v45, %v3771_v60  ;;  %v1761_v6 = vmul.f32 %v4471_v0, %v3780_v5 }
 0x1ac   : > { %v4544_v54 = vadd.f32 %v4530_v56, %v2093_v14  ;;  %v1594_v31 = vadd.f32 %v1562_v53, %v1493_v44  ;;  %v1762_v25 = vmul.f32 %v4480_v4, %v3780_v5  ;;  %v1862_v17 = vmul.f32 %v3798_v52, %v4519_v30 }
 0x1ad   : > { %v2163_v20 = vsub.f32 0.0, %v4533_v21  ;;  %v1693_v16 = vadd.f32 %v1661_v62, %v1593_v2  ;;  %v1863_v36 = vmul.f32 %v3798_v52, %v4523_v46  ;;  %v1962_v57 = vmul.f32 %v3835_v35, %v4525_v50 }
 0x1ae   : > { %v2164_v8 = vsub.f32 0.0, %v4544_v54  ;;  %v1694_v34 = vadd.f32 %v1662_v49, %v1594_v31  ;;  %v1963_v29 = vmul.f32 %v3835_v35, %v4539_v47  ;;  %v2062_v32 = vmul.f32 %v4494_v9, %v4541_v55 }
 0x1af   : > { %v2195_v11 = vmin.f32 %v2163_v20, 60.0  ;;  %v1793_v1 = vadd.f32 %v1761_v6, %v1693_v16  ;;  %v2063_v7 = vmul.f32 %v4494_v9, %v4550_v43  ;;  %v1262_v3 = vmul.f32 %v4455_v23, %v3741_v10  ;;  %v4590_v16 = vld [vmem:[#allocation2 + $0xe0] sm:$0xff] }
 0x1b0   : > { %v2196_v42 = vmin.f32 %v2164_v8, 60.0  ;;  %v1794_v41 = vadd.f32 %v1762_v25, %v1694_v34  ;;  %v1263_v40 = vmul.f32 %v4457_v51, %v3741_v10  ;;  %v1362_v58 = vmul.f32 %v4463_v13, %v3744_v12  ;;  %v4580_v25 = vld [vmem:[#allocation2 + $0xd8] sm:$0xff] }
 0x1b1   : > { %v3356_v48 = vpop.eup %3355  ;;  %v2237_v18 = vmul.f32 1.442695, %v2195_v11  ;;  %v1894_v59 = vadd.f32 %v1862_v17, %v1793_v1  ;;  %v1363_v22 = vmul.f32 %v4465_v45, %v3744_v12  ;;  %v1462_v28 = vmul.f32 %v4471_v0, %v3750_v19  ;;  %v4603_v11 = vld [vmem:[#allocation2 + $0xda] sm:$0xff] }
 0x1b2   : > { %v3358_v33 = vpop.eup %3357  ;;  %v2351_v23 = vmul.f32 %v3356_v48, %v4408_v24  ;;  %v2239_v15 = vmul.f32 1.442695, %v2196_v42  ;;  %v1895_v38 = vadd.f32 %v1863_v36, %v1794_v41  ;;  %v1394_v39 = vadd.f32 %v1362_v58, %v1262_v3  ;;  %v4592_v36 = vld [vmem:[#allocation2 + $0xd9] sm:$0xff]  ;;  %v4610_v41 = vld [vmem:[#allocation2 + $0xe2] sm:$0xff] }
 0x1b3   : > { %v3360_v63 = vpop.eup %3359  ;;  %v2352_v51 = vmul.f32 %v3358_v33, %v4417_v61  ;;  %3363 = vpow2.f32 %v2237_v18  ;;  %v1994_v13 = vadd.f32 %v1962_v57, %v1894_v59  ;;  %v1395_v53 = vadd.f32 %v1363_v22, %v1263_v40 }
 0x1b4   : > { %v3362_v14 = vpop.eup %3361  ;;  %v2289_v44 = vadd.f32 1.0, %v3360_v63  ;;  %3365 = vpow2.f32 %v2239_v15  ;;  %v1995_v62 = vadd.f32 %v1963_v29, %v1895_v38  ;;  %v1463_v45 = vmul.f32 %v4480_v4, %v3750_v19 }
 0x1b5   : > { %v2380_v0 = vpack.c.bf16 %v2352_v51, %v2351_v23  ;;  %v2290_v2 = vadd.f32 1.0, %v3362_v14  ;;  %v2094_v49 = vadd.f32 %v2062_v32, %v1994_v13  ;;  %v1494_v24 = vadd.f32 %v1462_v28, %v1394_v39  ;;  %v4601_v32 = vld [vmem:[#allocation2 + $0xe1] sm:$0xff] }
 0x1b6   : > { %3367 = vrcp.f32 %v2289_v44  ;;  %v2095_v6 = vadd.f32 %v2063_v7, %v1995_v62  ;;  %v1495_v31 = vadd.f32 %v1463_v45, %v1395_v53  ;;  %v1563_v61 = vmul.f32 %v4519_v30, %v3756_v26 }
 0x1b7   : > { %3054 = vmatmul.mubr.msk.bf16.gmra.mrb[40].mxu1 %vm1107_vm3, %v2380_v0  ;;  %3369 = vrcp.f32 %v2290_v2  ;;  %v4584_v17 = vadd.f32 %v4530_v56, %v2094_v49  ;;  %v1564_v4 = vmul.f32 %v4523_v46, %v3756_v26  ;;  %v1663_v20 = vmul.f32 %v4525_v50, %v3771_v60 }
 0x1b8   : > { %v4595_v57 = vadd.f32 %v4530_v56, %v2095_v6  ;;  %v1595_v8 = vadd.f32 %v1563_v61, %v1494_v24  ;;  %v1664_v34 = vmul.f32 %v4539_v47, %v3771_v60  ;;  %v1763_v29 = vmul.f32 %v4541_v55, %v3780_v5 }
 0x1b9   : > { %v2165_v1 = vsub.f32 0.0, %v4584_v17  ;;  %v1596_v7 = vadd.f32 %v1564_v4, %v1495_v31  ;;  %v1764_v3 = vmul.f32 %v4550_v43, %v3780_v5  ;;  %v1864_v42 = vmul.f32 %v3798_v52, %v4580_v25 }
 0x1ba   : > { %v2166_v40 = vsub.f32 0.0, %v4595_v57  ;;  %v1695_v58 = vadd.f32 %v1663_v20, %v1595_v8  ;;  %v1865_v48 = vmul.f32 %v3798_v52, %v4590_v16  ;;  %v1964_v18 = vmul.f32 %v3835_v35, %v4592_v36 }
 0x1bb   : > { %v2197_v59 = vmin.f32 %v2165_v1, 60.0  ;;  %v1696_v22 = vadd.f32 %v1664_v34, %v1596_v7  ;;  %v1965_v28 = vmul.f32 %v3835_v35, %v4601_v32  ;;  %v2064_v33 = vmul.f32 %v4494_v9, %v4603_v11 }
 0x1bc   : > { %v2198_v23 = vmin.f32 %v2166_v40, 60.0  ;;  %v1795_v15 = vadd.f32 %v1763_v29, %v1695_v58  ;;  %v2065_v38 = vmul.f32 %v4494_v9, %v4610_v41  ;;  %v1264_v39 = vmul.f32 %v4519_v30, %v3741_v10 }
 0x1bd   : > { %v3364_v63 = vpop.eup %3363  ;;  %v2241_v51 = vmul.f32 1.442695, %v2197_v59  ;;  %v1796_v13 = vadd.f32 %v1764_v3, %v1696_v22  ;;  %v1265_v53 = vmul.f32 %v4523_v46, %v3741_v10  ;;  %v1364_v14 = vmul.f32 %v4525_v50, %v3744_v12 }
 0x1be   : > { %v3366_v44 = vpop.eup %3365  ;;  %v2291_v62 = vadd.f32 1.0, %v3364_v63  ;;  %v2243_v45 = vmul.f32 1.442695, %v2198_v23  ;;  %v1896_v0 = vadd.f32 %v1864_v42, %v1795_v15  ;;  %v1365_v2 = vmul.f32 %v4539_v47, %v3744_v12  ;;  %v4641_v42 = vld [vmem:[#allocation2 + $0xf0] sm:$0xff]  ;;  %v4663_v15 = vld [vmem:[#allocation2 + $0xfa] sm:$0xff] }
 0x1bf   : > { %v2292_v49 = vadd.f32 1.0, %v3366_v44  ;;  %3371 = vpow2.f32 %v2241_v51  ;;  %v1897_v24 = vadd.f32 %v1865_v48, %v1796_v13  ;;  %v1396_v30 = vadd.f32 %v1364_v14, %v1264_v39  ;;  %v4652_v48 = vld [vmem:[#allocation2 + $0xf1] sm:$0xff] }
 0x1c0   : > { %v3368_v6 = vpop.eup %3367  ;;  %3373 = vrcp.f32 %v2291_v62  ;;  %v1996_v31 = vadd.f32 %v1964_v18, %v1896_v0  ;;  %v1397_v61 = vadd.f32 %v1365_v2, %v1265_v53  ;;  %v1464_v46 = vmul.f32 %v4541_v55, %v3750_v19  ;;  %v4661_v23 = vld [vmem:[#allocation2 + $0xf2] sm:$0xff] }
 0x1c1   : > { %v3370_v4 = vpop.eup %3369  ;;  %v2353_v50 = vmul.f32 %v3368_v6, %v4474_v37  ;;  %3375 = vrcp.f32 %v2292_v49  ;;  %v1997_v20 = vadd.f32 %v1965_v28, %v1897_v24  ;;  %v1465_v8 = vmul.f32 %v4550_v43, %v3750_v19  ;;  %v4643_v37 = vld [vmem:[#allocation2 + $0xf8] sm:$0xff] }
 0x1c2   : > { %v2354_v47 = vmul.f32 %v3370_v4, %v4483_v27  ;;  %3377 = vpow2.f32 %v2243_v45  ;;  %v2096_v34 = vadd.f32 %v2064_v33, %v1996_v31  ;;  %v1496_v29 = vadd.f32 %v1464_v46, %v1396_v30  ;;  %v4659_v33 = vld [vmem:[#allocation2 + $0xf9] sm:$0xff] }
 0x1c3   : > { %v2097_v1 = vadd.f32 %v2065_v38, %v1997_v20  ;;  %v1497_v7 = vadd.f32 %v1465_v8, %v1397_v61  ;;  %v1565_v3 = vmul.f32 %v4580_v25, %v3756_v26  ;;  %v1566_v55 = vmul.f32 %v4590_v16, %v3756_v26 }
 0x1c4   : > { %v2381_v40 = vpack.c.bf16 %v2354_v47, %v2353_v50  ;;  %v4646_v43 = vadd.f32 %v4530_v56, %v2096_v34  ;;  %v1665_v27 = vmul.f32 %v4592_v36, %v3771_v60  ;;  %v1666_v58 = vmul.f32 %v4601_v32, %v3771_v60 }
 0x1c5   : > { %v4655_v18 = vadd.f32 %v4530_v56, %v2097_v1  ;;  %v1597_v59 = vadd.f32 %v1565_v3, %v1496_v29  ;;  %v1598_v22 = vadd.f32 %v1566_v55, %v1497_v7  ;;  %v1765_v28 = vmul.f32 %v4603_v11, %v3780_v5 }
 0x1c6   : > { %3057 = vmatprep.mubr.msk.bf16.mxu1 %vm1107_vm3, %v2381_v40  ;;  %v2167_v38 = vsub.f32 0.0, %v4646_v43  ;;  %v1766_v39 = vmul.f32 %v4610_v41, %v3780_v5  ;;  %v1866_v63 = vmul.f32 %v3798_v52, %v4641_v42  ;;  %v1867_v51 = vmul.f32 %v3798_v52, %v4643_v37 }
 0x1c7   : > { %v2168_v13 = vsub.f32 0.0, %v4655_v18  ;;  %v1697_v53 = vadd.f32 %v1665_v27, %v1597_v59  ;;  %v1698_v14 = vadd.f32 %v1666_v58, %v1598_v22  ;;  %v1966_v44 = vmul.f32 %v3835_v35, %v4652_v48 }
 0x1c8   : > { %v2199_v62 = vmin.f32 %v2167_v38, 60.0  ;;  %v1967_v45 = vmul.f32 %v3835_v35, %v4659_v33  ;;  %v2066_v0 = vmul.f32 %v4494_v9, %v4661_v23  ;;  %v2067_v2 = vmul.f32 %v4494_v9, %v4663_v15 }
 0x1c9   : > { %v3372_v49 = vpop.eup %3371  ;;  %v2200_v24 = vmin.f32 %v2168_v13, 60.0  ;;  %v1797_v30 = vadd.f32 %v1765_v28, %v1697_v53  ;;  %v1798_v6 = vadd.f32 %v1766_v39, %v1698_v14  ;;  %v1266_v31 = vmul.f32 %v4580_v25, %v3741_v10  ;;  %v4696_v28 = vld [vmem:[#allocation2 + $0x108] sm:$0xff] }
 0x1ca   : > { %v3374_v61 = vpop.eup %3373  ;;  %v2293_v46 = vadd.f32 1.0, %v3372_v49  ;;  %v2245_v4 = vmul.f32 1.442695, %v2199_v62  ;;  %v1267_v50 = vmul.f32 %v4590_v16, %v3741_v10  ;;  %v1366_v20 = vmul.f32 %v4592_v36, %v3744_v12  ;;  %v4715_v14 = vld [vmem:[#allocation2 + $0x109] sm:$0xff] }
 0x1cb   : > { %v3376_v8 = vpop.eup %3375  ;;  %v2355_v47 = vmul.f32 %v3374_v61, %v4533_v21  ;;  %v2247_v34 = vmul.f32 1.442695, %v2200_v24  ;;  %v1898_v29 = vadd.f32 %v1866_v63, %v1797_v30  ;;  %v1899_v1 = vadd.f32 %v1867_v51, %v1798_v6  ;;  %v4705_v63 = vld [vmem:[#allocation2 + $0x110] sm:$0xff] }
 0x1cc   : > { %v3378_v7 = vpop.eup %3377  ;;  %v2356_v3 = vmul.f32 %v3376_v8, %v4544_v54  ;;  %3379 = vrcp.f32 %v2293_v46  ;;  %v1367_v25 = vmul.f32 %v4601_v32, %v3744_v12  ;;  %v1398_v55 = vadd.f32 %v1366_v20, %v1266_v31  ;;  %v4719_v62 = vld [vmem:[#allocation2 + $0x10a] sm:$0xff]  ;;  %v4727_v24 = vld [vmem:[#allocation2 + $0x112] sm:$0xff] }
 0x1cd   : > { %v2294_v40 = vadd.f32 1.0, %v3378_v7  ;;  %3381 = vpow2.f32 %v2245_v4  ;;  %v1998_v16 = vadd.f32 %v1966_v44, %v1898_v29  ;;  %v1999_v27 = vadd.f32 %v1967_v45, %v1899_v1  ;;  %v4717_v44 = vld [vmem:[#allocation2 + $0x111] sm:$0xff] }
 0x1ce   : > { %v2382_v58 = vpack.c.bf16 %v2356_v3, %v2355_v47  ;;  %3383 = vpow2.f32 %v2247_v34  ;;  %v1399_v36 = vadd.f32 %v1367_v25, %v1267_v50  ;;  %v1466_v21 = vmul.f32 %v4603_v11, %v3750_v19 }
 0x1cf   : > { %3385 = vrcp.f32 %v2294_v40  ;;  %v2098_v59 = vadd.f32 %v2066_v0, %v1998_v16  ;;  %v2099_v22 = vadd.f32 %v2067_v2, %v1999_v27  ;;  %v1467_v54 = vmul.f32 %v4610_v41, %v3750_v19 }
 0x1d0   : > { %3058 = vmatmul.mubr.msk.bf16.gmra.mrb[44].mxu1 %vm1107_vm3, %v2382_v58  ;;  %v1498_v32 = vadd.f32 %v1466_v21, %v1398_v55  ;;  %v1567_v38 = vmul.f32 %v4641_v42, %v3756_v26  ;;  %v1568_v39 = vmul.f32 %v4643_v37, %v3756_v26  ;;  %v1667_v11 = vmul.f32 %v4652_v48, %v3771_v60 }
 0x1d1   : > { %v4708_v51 = vadd.f32 %v4530_v56, %v2098_v59  ;;  %v4711_v41 = vadd.f32 %v4530_v56, %v2099_v22  ;;  %v1499_v13 = vadd.f32 %v1467_v54, %v1399_v36  ;;  %v1668_v53 = vmul.f32 %v4659_v33, %v3771_v60 }
 0x1d2   : > { %v1599_v45 = vadd.f32 %v1567_v38, %v1498_v32  ;;  %v1767_v0 = vmul.f32 %v4661_v23, %v3780_v5  ;;  %v1768_v2 = vmul.f32 %v4663_v15, %v3780_v5  ;;  %v1868_v49 = vmul.f32 %v3798_v52, %v4696_v28 }
 0x1d3   : > { %v2169_v30 = vsub.f32 0.0, %v4708_v51  ;;  %v2170_v6 = vsub.f32 0.0, %v4711_v41  ;;  %v1600_v31 = vadd.f32 %v1568_v39, %v1499_v13  ;;  %v1869_v61 = vmul.f32 %v3798_v52, %v4705_v63 }
 0x1d4   : > { %v1699_v46 = vadd.f32 %v1667_v11, %v1599_v45  ;;  %v1968_v4 = vmul.f32 %v3835_v35, %v4715_v14  ;;  %v1969_v50 = vmul.f32 %v3835_v35, %v4717_v44  ;;  %v2068_v20 = vmul.f32 %v4494_v9, %v4719_v62 }
 0x1d5   : > { %v2201_v8 = vmin.f32 %v2169_v30, 60.0  ;;  %v2202_v47 = vmin.f32 %v2170_v6, 60.0  ;;  %v1700_v34 = vadd.f32 %v1668_v53, %v1600_v31  ;;  %v2069_v29 = vmul.f32 %v4494_v9, %v4727_v24 }
 0x1d6   : > { %v3380_v1 = vpop.eup %3379  ;;  %v1799_v7 = vadd.f32 %v1767_v0, %v1699_v46  ;;  %v1268_v3 = vmul.f32 %v4641_v42, %v3741_v10  ;;  %v1269_v25 = vmul.f32 %v4643_v37, %v3741_v10  ;;  %v1368_v55 = vmul.f32 %v4652_v48, %v3744_v12  ;;  %v4769_v46 = vld [vmem:[#allocation2 + $0x120] sm:$0xff] }
 0x1d7   : > { %v3382_v40 = vpop.eup %3381  ;;  %v2357_v16 = vmul.f32 %v3380_v1, %v4584_v17  ;;  %v2249_v27 = vmul.f32 1.442695, %v2201_v8  ;;  %v2251_v58 = vmul.f32 1.442695, %v2202_v47  ;;  %v1800_v36 = vadd.f32 %v1768_v2, %v1700_v34  ;;  %v4776_v8 = vld [vmem:[#allocation2 + $0x128] sm:$0xff] }
 0x1d8   : > { %v3384_v21 = vpop.eup %3383  ;;  %v2295_v59 = vadd.f32 1.0, %v3382_v40  ;;  %v1900_v22 = vadd.f32 %v1868_v49, %v1799_v7  ;;  %v1369_v54 = vmul.f32 %v4659_v33, %v3744_v12  ;;  %v1400_v32 = vadd.f32 %v1368_v55, %v1268_v3  ;;  %v4780_v34 = vld [vmem:[#allocation2 + $0x121] sm:$0xff]  ;;  %v4785_v3 = vld [vmem:[#allocation2 + $0x129] sm:$0xff] }
 0x1d9   : > { %v3386_v42 = vpop.eup %3385  ;;  %v2296_v38 = vadd.f32 1.0, %v3384_v21  ;;  %3387 = vpow2.f32 %v2249_v27  ;;  %v1901_v37 = vadd.f32 %v1869_v61, %v1800_v36  ;;  %v1468_v48 = vmul.f32 %v4661_v23, %v3750_v19  ;;  %v4789_v55 = vld [vmem:[#allocation2 + $0x122] sm:$0xff] }
 0x1da   : > { %v2358_v39 = vmul.f32 %v3386_v42, %v4595_v57  ;;  %3389 = vrcp.f32 %v2295_v59  ;;  %v2000_v17 = vadd.f32 %v1968_v4, %v1900_v22  ;;  %v1401_v11 = vadd.f32 %v1369_v54, %v1269_v25 }
 0x1db   : > { %3391 = vrcp.f32 %v2296_v38  ;;  %v2001_v13 = vadd.f32 %v1969_v50, %v1901_v37  ;;  %v1469_v53 = vmul.f32 %v4663_v15, %v3750_v19  ;;  %v1500_v45 = vadd.f32 %v1468_v48, %v1400_v32 }
 0x1dc   : > { %v2383_v33 = vpack.c.bf16 %v2358_v39, %v2357_v16  ;;  %3393 = vpow2.f32 %v2251_v58  ;;  %v2100_v0 = vadd.f32 %v2068_v20, %v2000_v17  ;;  %v1569_v2 = vmul.f32 %v4696_v28, %v3756_v26  ;;  %v4794_v58 = vld [vmem:[#allocation2 + $0x12a] sm:$0xff] }
 0x1dd   : > { %v2101_v49 = vadd.f32 %v2069_v29, %v2001_v13  ;;  %v1501_v30 = vadd.f32 %v1469_v53, %v1401_v11  ;;  %v1570_v57 = vmul.f32 %v4705_v63, %v3756_v26  ;;  %v1669_v23 = vmul.f32 %v4715_v14, %v3771_v60 }
 0x1de   : > { %3061 = vmatprep.mubr.msk.bf16.mxu1 %vm1107_vm3, %v2383_v33  ;;  %v4763_v6 = vadd.f32 %v4530_v56, %v2100_v0  ;;  %v1601_v15 = vadd.f32 %v1569_v2, %v1500_v45  ;;  %v1670_v31 = vmul.f32 %v4717_v44, %v3771_v60  ;;  %v1769_v61 = vmul.f32 %v4719_v62, %v3780_v5 }
 0x1df   : > { %v4772_v4 = vadd.f32 %v4530_v56, %v2101_v49  ;;  %v1602_v50 = vadd.f32 %v1570_v57, %v1501_v30  ;;  %v1770_v20 = vmul.f32 %v4727_v24, %v3780_v5  ;;  %v1870_v47 = vmul.f32 %v3798_v52, %v4769_v46 }
 0x1e0   : > { %v2171_v29 = vsub.f32 0.0, %v4763_v6  ;;  %v1701_v1 = vadd.f32 %v1669_v23, %v1601_v15  ;;  %v1871_v7 = vmul.f32 %v3798_v52, %v4776_v8  ;;  %v1970_v25 = vmul.f32 %v3835_v35, %v4780_v34 }
 0x1e1   : > { %v2172_v40 = vsub.f32 0.0, %v4772_v4  ;;  %v1702_v16 = vadd.f32 %v1670_v31, %v1602_v50  ;;  %v1971_v27 = vmul.f32 %v3835_v35, %v4785_v3  ;;  %v2070_v36 = vmul.f32 %v4494_v9, %v4789_v55 }
 0x1e2   : > { %v2203_v21 = vmin.f32 %v2171_v29, 60.0  ;;  %v1801_v59 = vadd.f32 %v1769_v61, %v1701_v1  ;;  %v2071_v22 = vmul.f32 %v4494_v9, %v4794_v58  ;;  %v1270_v54 = vmul.f32 %v4696_v28, %v3741_v10 }
 0x1e3   : > { %v3388_v32 = vpop.eup %3387  ;;  %v2204_v42 = vmin.f32 %v2172_v40, 60.0  ;;  %v1802_v38 = vadd.f32 %v1770_v20, %v1702_v16  ;;  %v1271_v37 = vmul.f32 %v4705_v63, %v3741_v10  ;;  %v1370_v48 = vmul.f32 %v4715_v14, %v3744_v12  ;;  %v4831_v40 = vld [vmem:[#allocation2 + $0x138] sm:$0xff] }
 0x1e4   : > { %v3390_v39 = vpop.eup %3389  ;;  %v2297_v17 = vadd.f32 1.0, %v3388_v32  ;;  %v2253_v11 = vmul.f32 1.442695, %v2203_v21  ;;  %v1902_v13 = vadd.f32 %v1870_v47, %v1801_v59  ;;  %v1371_v53 = vmul.f32 %v4717_v44, %v3744_v12  ;;  %v4836_v21 = vld [vmem:[#allocation2 + $0x140] sm:$0xff] }
 0x1e5   : > { %v3392_v45 = vpop.eup %3391  ;;  %v2359_v33 = vmul.f32 %v3390_v39, %v4646_v43  ;;  %v2255_v28 = vmul.f32 1.442695, %v2204_v42  ;;  %v1903_v0 = vadd.f32 %v1871_v7, %v1802_v38  ;;  %v1402_v2 = vadd.f32 %v1370_v48, %v1270_v54  ;;  %v4845_v38 = vld [vmem:[#allocation2 + $0x141] sm:$0xff] }
 0x1e6   : > { %v3394_v49 = vpop.eup %3393  ;;  %v2360_v30 = vmul.f32 %v3392_v45, %v4655_v18  ;;  %3395 = vrcp.f32 %v2297_v17  ;;  %v2002_v63 = vadd.f32 %v1970_v25, %v1902_v13  ;;  %v1403_v57 = vadd.f32 %v1371_v53, %v1271_v37  ;;  %v4849_v48 = vld [vmem:[#allocation2 + $0x13a] sm:$0xff]  ;;  %v4853_v13 = vld [vmem:[#allocation2 + $0x142] sm:$0xff] }
 0x1e7   : > { %v2298_v14 = vadd.f32 1.0, %v3394_v49  ;;  %3397 = vpow2.f32 %v2253_v11  ;;  %v2003_v23 = vadd.f32 %v1971_v27, %v1903_v0  ;;  %v1470_v15 = vmul.f32 %v4719_v62, %v3750_v19 }
 0x1e8   : > { %v2384_v31 = vpack.c.bf16 %v2360_v30, %v2359_v33  ;;  %3399 = vpow2.f32 %v2255_v28  ;;  %v2102_v44 = vadd.f32 %v2070_v36, %v2002_v63  ;;  %v1471_v43 = vmul.f32 %v4727_v24, %v3750_v19 }
 0x1e9   : > { %3401 = vrcp.f32 %v2298_v14  ;;  %v2103_v61 = vadd.f32 %v2071_v22, %v2003_v23  ;;  %v1502_v50 = vadd.f32 %v1470_v15, %v1402_v2  ;;  %v1571_v18 = vmul.f32 %v4769_v46, %v3756_v26  ;;  %v4840_v22 = vld [vmem:[#allocation2 + $0x139] sm:$0xff] }
 0x1ea   : > { %3062 = vmatmul.mubr.msk.bf16.gmra.mrb[48].mxu1 %vm1107_vm3, %v2384_v31  ;;  %v4818_v20 = vadd.f32 %v4530_v56, %v2102_v44  ;;  %v1503_v47 = vadd.f32 %v1471_v43, %v1403_v57  ;;  %v1572_v62 = vmul.f32 %v4776_v8, %v3756_v26  ;;  %v1671_v29 = vmul.f32 %v4780_v34, %v3771_v60 }
 0x1eb   : > { %v4825_v24 = vadd.f32 %v4530_v56, %v2103_v61  ;;  %v1603_v1 = vadd.f32 %v1571_v18, %v1502_v50  ;;  %v1672_v7 = vmul.f32 %v4785_v3, %v3771_v60  ;;  %v1771_v25 = vmul.f32 %v4789_v55, %v3780_v5 }
 0x1ec   : > { %v2173_v16 = vsub.f32 0.0, %v4818_v20  ;;  %v1604_v27 = vadd.f32 %v1572_v62, %v1503_v47  ;;  %v1772_v36 = vmul.f32 %v4794_v58, %v3780_v5  ;;  %v1872_v59 = vmul.f32 %v3798_v52, %v4831_v40 }
 0x1ed   : > { %v2174_v54 = vsub.f32 0.0, %v4825_v24  ;;  %v1703_v32 = vadd.f32 %v1671_v29, %v1603_v1  ;;  %v1873_v42 = vmul.f32 %v3798_v52, %v4836_v21  ;;  %v1972_v37 = vmul.f32 %v3835_v35, %v4840_v22 }
 0x1ee   : > { %v2205_v39 = vmin.f32 %v2173_v16, 60.0  ;;  %v1704_v17 = vadd.f32 %v1672_v7, %v1604_v27  ;;  %v1973_v11 = vmul.f32 %v3835_v35, %v4845_v38  ;;  %v2072_v53 = vmul.f32 %v4494_v9, %v4849_v48 }
 0x1ef   : > { %v2206_v45 = vmin.f32 %v2174_v54, 60.0  ;;  %v1803_v33 = vadd.f32 %v1771_v25, %v1703_v32  ;;  %v2073_v28 = vmul.f32 %v4494_v9, %v4853_v13  ;;  %v1272_v0 = vmul.f32 %v4769_v46, %v3741_v10 }
 0x1f0   : > { %v3396_v2 = vpop.eup %3395  ;;  %v2257_v49 = vmul.f32 1.442695, %v2205_v39  ;;  %v1804_v30 = vadd.f32 %v1772_v36, %v1704_v17  ;;  %v1273_v63 = vmul.f32 %v4776_v8, %v3741_v10  ;;  %v1372_v57 = vmul.f32 %v4780_v34, %v3744_v12 }
 0x1f1   : > { %v3398_v14 = vpop.eup %3397  ;;  %v2361_v23 = vmul.f32 %v3396_v2, %v4708_v51  ;;  %v2259_v15 = vmul.f32 1.442695, %v2206_v45  ;;  %v1904_v31 = vadd.f32 %v1872_v59, %v1803_v33  ;;  %v1373_v44 = vmul.f32 %v4785_v3, %v3744_v12  ;;  %v4879_v59 = vld [vmem:[#allocation2 + $0x158] sm:$0xff] }
 0x1f2   : > { %v3400_v43 = vpop.eup %3399  ;;  %v2299_v61 = vadd.f32 1.0, %v3398_v14  ;;  %3403 = vpow2.f32 %v2257_v49  ;;  %v1905_v46 = vadd.f32 %v1873_v42, %v1804_v30  ;;  %v1404_v50 = vadd.f32 %v1372_v57, %v1272_v0  ;;  %v4888_v42 = vld [vmem:[#allocation2 + $0x151] sm:$0xff]  ;;  %v4902_v33 = vld [vmem:[#allocation2 + $0x15a] sm:$0xff] }
 0x1f3   : > { %v3402_v18 = vpop.eup %3401  ;;  %v2300_v47 = vadd.f32 1.0, %v3400_v43  ;;  %3405 = vpow2.f32 %v2259_v15  ;;  %v2004_v8 = vadd.f32 %v1972_v37, %v1904_v31  ;;  %v1405_v62 = vadd.f32 %v1373_v44, %v1273_v63  ;;  %v4890_v37 = vld [vmem:[#allocation2 + $0x159] sm:$0xff] }
 0x1f4   : > { %v2362_v34 = vmul.f32 %v3402_v18, %v4711_v41  ;;  %3407 = vrcp.f32 %v2299_v61  ;;  %v2005_v29 = vadd.f32 %v1973_v11, %v1905_v46  ;;  %v1472_v51 = vmul.f32 %v4789_v55, %v3750_v19  ;;  %v4877_v41 = vld [vmem:[#allocation2 + $0x150] sm:$0xff] }
 0x1f5   : > { %3409 = vrcp.f32 %v2300_v47  ;;  %v2104_v1 = vadd.f32 %v2072_v53, %v2004_v8  ;;  %v1473_v3 = vmul.f32 %v4794_v58, %v3750_v19  ;;  %v1573_v7 = vmul.f32 %v4831_v40, %v3756_v26  ;;  %v4900_v45 = vld [vmem:[#allocation2 + $0x152] sm:$0xff] }
 0x1f6   : > { %v2385_v25 = vpack.c.bf16 %v2362_v34, %v2361_v23  ;;  %v2105_v16 = vadd.f32 %v2073_v28, %v2005_v29  ;;  %v1504_v27 = vadd.f32 %v1472_v51, %v1404_v50  ;;  %v1574_v36 = vmul.f32 %v4836_v21, %v3756_v26 }
 0x1f7   : > { %v4882_v55 = vadd.f32 %v4530_v56, %v2104_v1  ;;  %v1505_v54 = vadd.f32 %v1473_v3, %v1405_v62  ;;  %v1673_v58 = vmul.f32 %v4840_v22, %v3771_v60  ;;  %v1674_v32 = vmul.f32 %v4845_v38, %v3771_v60 }
 0x1f8   : > { %3065 = vmatprep.mubr.msk.bf16.mxu1 %vm1107_vm3, %v2385_v25  ;;  %v4894_v39 = vadd.f32 %v4530_v56, %v2105_v16  ;;  %v1605_v17 = vadd.f32 %v1573_v7, %v1504_v27  ;;  %v1773_v11 = vmul.f32 %v4849_v48, %v3780_v5  ;;  %v1774_v53 = vmul.f32 %v4853_v13, %v3780_v5 }
 0x1f9   : > { %v2175_v28 = vsub.f32 0.0, %v4882_v55  ;;  %v1606_v0 = vadd.f32 %v1574_v36, %v1505_v54  ;;  %v1874_v2 = vmul.f32 %v3798_v52, %v4877_v41  ;;  %v1875_v49 = vmul.f32 %v3798_v52, %v4879_v59 }
 0x1fa   : > { %v2176_v30 = vsub.f32 0.0, %v4894_v39  ;;  %v1705_v63 = vadd.f32 %v1673_v58, %v1605_v17  ;;  %v1974_v57 = vmul.f32 %v3835_v35, %v4888_v42  ;;  %v1975_v14 = vmul.f32 %v3835_v35, %v4890_v37 }
 0x1fb   : > { %v2207_v23 = vmin.f32 %v2175_v28, 60.0  ;;  %v1706_v15 = vadd.f32 %v1674_v32, %v1606_v0  ;;  %v2074_v31 = vmul.f32 %v4494_v9, %v4900_v45  ;;  %v2075_v44 = vmul.f32 %v4494_v9, %v4902_v33 }
 0x1fc   : > { %v3404_v43 = vpop.eup %3403  ;;  %v2208_v61 = vmin.f32 %v2176_v30, 60.0  ;;  %v1805_v46 = vadd.f32 %v1773_v11, %v1705_v63  ;;  %v1274_v50 = vmul.f32 %v4831_v40, %v3741_v10  ;;  %v1275_v18 = vmul.f32 %v4836_v21, %v3741_v10 }
 0x1fd   : > { %v3406_v47 = vpop.eup %3405  ;;  %v2301_v8 = vadd.f32 1.0, %v3404_v43  ;;  %v2261_v62 = vmul.f32 1.442695, %v2207_v23  ;;  %v1806_v34 = vadd.f32 %v1774_v53, %v1706_v15  ;;  %v1374_v29 = vmul.f32 %v4840_v22, %v3744_v12  ;;  %v4959_v43 = vld [vmem:[#allocation2 + $0x16a] sm:$0xff] }
 0x1fe   : > { %v3408_v51 = vpop.eup %3407  ;;  %v2302_v1 = vadd.f32 1.0, %v3406_v47  ;;  %v2263_v3 = vmul.f32 1.442695, %v2208_v61  ;;  %v1906_v7 = vadd.f32 %v1874_v2, %v1805_v46  ;;  %v1375_v25 = vmul.f32 %v4845_v38, %v3744_v12  ;;  %v4936_v2 = vld [vmem:[#allocation2 + $0x168] sm:$0xff]  ;;  %v4961_v61 = vld [vmem:[#allocation2 + $0x172] sm:$0xff] }
 0x1ff   : > { %v3410_v16 = vpop.eup %3409  ;;  %v2363_v40 = vmul.f32 %v3408_v51, %v4763_v6  ;;  %3411 = vrcp.f32 %v2301_v8  ;;  %v1907_v27 = vadd.f32 %v1875_v49, %v1806_v34  ;;  %v1406_v21 = vadd.f32 %v1374_v29, %v1274_v50  ;;  %v4938_v49 = vld [vmem:[#allocation2 + $0x170] sm:$0xff] }
 0x200   : > { %v2364_v36 = vmul.f32 %v3410_v16, %v4772_v4  ;;  %3413 = vrcp.f32 %v2302_v1  ;;  %v2006_v54 = vadd.f32 %v1974_v57, %v1906_v7  ;;  %v1407_v58 = vadd.f32 %v1375_v25, %v1275_v18 }
 0x201   : > { %3415 = vpow2.f32 %v2261_v62  ;;  %v2007_v22 = vadd.f32 %v1975_v14, %v1907_v27  ;;  %v1474_v32 = vmul.f32 %v4849_v48, %v3750_v19  ;;  %v1475_v17 = vmul.f32 %v4853_v13, %v3750_v19  ;;  %v4940_v48 = vld [vmem:[#allocation2 + $0x169] sm:$0xff]  ;;  %v4952_v14 = vld [vmem:[#allocation2 + $0x171] sm:$0xff] }
 0x202   : > { %v2386_v38 = vpack.c.bf16 %v2364_v36, %v2363_v40  ;;  %3417 = vpow2.f32 %v2263_v3  ;;  %v2106_v11 = vadd.f32 %v2074_v31, %v2006_v54  ;;  %v1575_v6 = vmul.f32 %v4877_v41, %v3756_v26 }
 0x203   : > { %v2107_v53 = vadd.f32 %v2075_v44, %v2007_v22  ;;  %v1506_v28 = vadd.f32 %v1474_v32, %v1406_v21  ;;  %v1507_v4 = vadd.f32 %v1475_v17, %v1407_v58  ;;  %v1576_v0 = vmul.f32 %v4879_v59, %v3756_v26 }
 0x204   : > { %3066 = vmatmul.mubr.msk.bf16.gmra.mrb[52].mxu1 %vm1107_vm3, %v2386_v38  ;;  %v4944_v13 = vadd.f32 %v4530_v56, %v2106_v11  ;;  %v1675_v30 = vmul.f32 %v4888_v42, %v3771_v60  ;;  %v1676_v63 = vmul.f32 %v4890_v37, %v3771_v60  ;;  %v1775_v57 = vmul.f32 %v4900_v45, %v3780_v5 }
 0x205   : > { %v4955_v23 = vadd.f32 %v4530_v56, %v2107_v53  ;;  %v1607_v15 = vadd.f32 %v1575_v6, %v1506_v28  ;;  %v1608_v31 = vadd.f32 %v1576_v0, %v1507_v4  ;;  %v1776_v44 = vmul.f32 %v4902_v33, %v3780_v5 }
 0x206   : > { %v2177_v46 = vsub.f32 0.0, %v4944_v13  ;;  %v1876_v50 = vmul.f32 %v3798_v52, %v4936_v2  ;;  %v1877_v18 = vmul.f32 %v3798_v52, %v4938_v49  ;;  %v1976_v47 = vmul.f32 %v3835_v35, %v4940_v48 }
 0x207   : > { %v2178_v8 = vsub.f32 0.0, %v4955_v23  ;;  %v1707_v62 = vadd.f32 %v1675_v30, %v1607_v15  ;;  %v1708_v34 = vadd.f32 %v1676_v63, %v1608_v31  ;;  %v1977_v29 = vmul.f32 %v3835_v35, %v4952_v14  ;;  %v1842_v15 = vld [vmem:[#allocation2 + $0x180] sm:$0xff] }
 0x208   : > { %v2209_v51 = vmin.f32 %v2177_v46, 60.0  ;;  %v2076_v1 = vmul.f32 %v4494_v9, %v4959_v43  ;;  %v2077_v3 = vmul.f32 %v4494_v9, %v4961_v61  ;;  %v1276_v7 = vmul.f32 %v4877_v41, %v3741_v10 }
 0x209   : > { %v3412_v25 = vpop.eup %3411  ;;  %v2210_v16 = vmin.f32 %v2178_v8, 60.0  ;;  %v1807_v40 = vadd.f32 %v1775_v57, %v1707_v62  ;;  %v1808_v27 = vadd.f32 %v1776_v44, %v1708_v34  ;;  %v1277_v21 = vmul.f32 %v4879_v59, %v3741_v10 }
 0x20a   : > { %v3414_v36 = vpop.eup %3413  ;;  %v2365_v54 = vmul.f32 %v3412_v25, %v4818_v20  ;;  %v2265_v58 = vmul.f32 1.442695, %v2209_v51  ;;  %v1376_v22 = vmul.f32 %v4888_v42, %v3744_v12  ;;  %v1377_v9 = vmul.f32 %v4890_v37, %v3744_v12  ;;  %v2043_v25 = vld [vmem:[#allocation2 + $0x18a] sm:$0xff] }
 0x20b   : > { %v3416_v32 = vpop.eup %3415  ;;  %v2366_v41 = vmul.f32 %v3414_v36, %v4825_v24  ;;  %v2267_v17 = vmul.f32 1.442695, %v2210_v16  ;;  %v1908_v38 = vadd.f32 %v1876_v50, %v1807_v40  ;;  %v1909_v11 = vadd.f32 %v1877_v18, %v1808_v27  ;;  %v1843_v50 = vld [vmem:[#allocation2 + $0x188] sm:$0xff] }
 0x20c   : > { %v3418_v6 = vpop.eup %3417  ;;  %v2303_v53 = vadd.f32 1.0, %v3416_v32  ;;  %3419 = vpow2.f32 %v2265_v58  ;;  %v1408_v59 = vadd.f32 %v1376_v22, %v1276_v7  ;;  %v1409_v28 = vadd.f32 %v1377_v9, %v1277_v21  ;;  %v1942_v18 = vld [vmem:[#allocation2 + $0x181] sm:$0xff] }
 0x20d   : > { %v2387_v4 = vpack.c.bf16 %v2366_v41, %v2365_v54  ;;  %v2304_v20 = vadd.f32 1.0, %v3418_v6  ;;  %3421 = vpow2.f32 %v2267_v17  ;;  %v2008_v0 = vadd.f32 %v1976_v47, %v1908_v38 }
 0x20e   : > { %3423 = vrcp.f32 %v2303_v53  ;;  %v2009_v42 = vadd.f32 %v1977_v29, %v1909_v11  ;;  %v1476_v37 = vmul.f32 %v4900_v45, %v3750_v19  ;;  %v1477_v24 = vmul.f32 %v4902_v33, %v3750_v19  ;;  %v4998_v33 = vld [vmem:[#allocation2 + $0x189] sm:$0xff] }
 0x20f   : > { %3069 = vmatprep.mubr.msk.bf16.mxu1 %vm1107_vm3, %v2387_v4  ;;  %3425 = vrcp.f32 %v2304_v20  ;;  %v2108_v30 = vadd.f32 %v2076_v1, %v2008_v0  ;;  %v1577_v63 = vmul.f32 %v4936_v2, %v3756_v26  ;;  %v1578_v57 = vmul.f32 %v4938_v49, %v3756_v26  ;;  %v2042_v29 = vld [vmem:[#allocation2 + $0x182] sm:$0xff] }
 0x210   : > { %v2109_v31 = vadd.f32 %v2077_v3, %v2009_v42  ;;  %v1508_v44 = vadd.f32 %v1476_v37, %v1408_v59  ;;  %v1509_v46 = vadd.f32 %v1477_v24, %v1409_v28  ;;  %v1677_v45 = vmul.f32 %v4940_v48, %v3771_v60 }
 0x211   : > { %v5001_v47 = vadd.f32 %v4530_v56, %v2108_v30  ;;  %v1678_v8 = vmul.f32 %v4952_v14, %v3771_v60  ;;  %v1777_v62 = vmul.f32 %v4959_v43, %v3780_v5  ;;  %v1778_v34 = vmul.f32 %v4961_v61, %v3780_v5 }
 0x212   : > { %v5010_v51 = vadd.f32 %v4530_v56, %v2109_v31  ;;  %v1609_v1 = vadd.f32 %v1577_v63, %v1508_v44  ;;  %v1610_v3 = vadd.f32 %v1578_v57, %v1509_v46  ;;  %v1878_v7 = vmul.f32 %v3798_v52, %v1842_v15  ;;  %v5022_v56 = vld [vmem:[%s5224_s3 + $0x8] ss:$0 sm:$0xff] }
 0x213   : > { %v2179_v16 = vsub.f32 0.0, %v5001_v47  ;;  %v1879_v40 = vmul.f32 %v3798_v52, %v1843_v50  ;;  %v1978_v27 = vmul.f32 %v3835_v35, %v1942_v18  ;;  %v1979_v21 = vmul.f32 %v3835_v35, %v4998_v33 }
 0x214   : > { %v2180_v36 = vsub.f32 0.0, %v5010_v51  ;;  %v1709_v54 = vadd.f32 %v1677_v45, %v1609_v1  ;;  %v1710_v58 = vadd.f32 %v1678_v8, %v1610_v3  ;;  %v2078_v22 = vmul.f32 %v5022_v56, %v2042_v29 }
 0x215   : > { %v2211_v9 = vmin.f32 %v2179_v16, 60.0  ;;  %v2079_v32 = vmul.f32 %v5022_v56, %v2043_v25  ;;  %v1278_v41 = vmul.f32 %v4936_v2, %v3741_v10  ;;  %v1279_v17 = vmul.f32 %v4938_v49, %v3741_v10 }
 0x216   : > { %v3420_v38 = vpop.eup %3419  ;;  %v2212_v11 = vmin.f32 %v2180_v36, 60.0  ;;  %v1809_v6 = vadd.f32 %v1777_v62, %v1709_v54  ;;  %v1810_v53 = vadd.f32 %v1778_v34, %v1710_v58  ;;  %v1378_v59 = vmul.f32 %v4940_v48, %v3744_v12  ;;  %v1945_v58 = vld [vmem:[#allocation2 + $0x1a1] sm:$0xff] }
 0x217   : > { %v3422_v28 = vpop.eup %3421  ;;  %v2305_v4 = vadd.f32 1.0, %v3420_v38  ;;  %v2269_v20 = vmul.f32 1.442695, %v2211_v9  ;;  %v1379_v0 = vmul.f32 %v4952_v14, %v3744_v12  ;;  %v1478_v42 = vmul.f32 %v4959_v43, %v3750_v19 }
 0x218   : > { %v3424_v2 = vpop.eup %3423  ;;  %v2306_v37 = vadd.f32 1.0, %v3422_v28  ;;  %v2271_v24 = vmul.f32 1.442695, %v2212_v11  ;;  %v1910_v10 = vadd.f32 %v1878_v7, %v1809_v6  ;;  %v1911_v49 = vadd.f32 %v1879_v40, %v1810_v53  ;;  %v1845_v40 = vld [vmem:[#allocation2 + $0x1a0] sm:$0xff] }
 0x219   : > { %v3426_v30 = vpop.eup %3425  ;;  %v2367_v63 = vmul.f32 %v3424_v2, %v4882_v55  ;;  %3427 = vrcp.f32 %v2305_v4  ;;  %v1410_v57 = vadd.f32 %v1378_v59, %v1278_v41  ;;  %v1411_v48 = vadd.f32 %v1379_v0, %v1279_v17  ;;  %v1844_v55 = vld [vmem:[#allocation2 + $0x198] sm:$0xff]  ;;  %v2045_v17 = vld [vmem:[#allocation2 + $0x1a2] sm:$0xff] }
 0x21a   : > { %v2368_v31 = vmul.f32 %v3426_v30, %v4894_v39  ;;  %3429 = vrcp.f32 %v2306_v37  ;;  %v2010_v44 = vadd.f32 %v1978_v27, %v1910_v10  ;;  %v2011_v46 = vadd.f32 %v1979_v21, %v1911_v49 }
 0x21b   : > { %3431 = vpow2.f32 %v2269_v20  ;;  %v1479_v12 = vmul.f32 %v4961_v61, %v3750_v19  ;;  %v1510_v14 = vadd.f32 %v1478_v42, %v1410_v57  ;;  %v1579_v43 = vmul.f32 %v1842_v15, %v3756_v26  ;;  %v3459_v19 = vld [vmem:[%s5225_s4] ss:$0 sm:$0xff] }
 0x21c   : > { %v2388_v45 = vpack.c.bf16 %v2368_v31, %v2367_v63  ;;  %3433 = vpow2.f32 %v2271_v24  ;;  %v2110_v8 = vadd.f32 %v2078_v22, %v2010_v44  ;;  %v2111_v62 = vadd.f32 %v2079_v32, %v2011_v46 }
 0x21d   : > { %v1511_v34 = vadd.f32 %v1479_v12, %v1411_v48  ;;  %v1580_v1 = vmul.f32 %v1843_v50, %v3756_v26  ;;  %v1611_v3 = vadd.f32 %v1579_v43, %v1510_v14  ;;  %v1679_v39 = vmul.f32 %v1942_v18, %v3771_v60  ;;  %v1944_v26 = vld [vmem:[#allocation2 + $0x199] sm:$0xff] }
 0x21e   : > { %3070 = vmatmul.mubr.msk.bf16.gmra.mrb[56].mxu1 %vm1107_vm3, %v2388_v45  ;;  %v5047_v61 = vadd.f32 %v3459_v19, %v2110_v8  ;;  %v5049_v15 = vadd.f32 %v3459_v19, %v2111_v62  ;;  %v1680_v7 = vmul.f32 %v4998_v33, %v3771_v60  ;;  %v1779_v16 = vmul.f32 %v2042_v29, %v3780_v5  ;;  %v2044_v33 = vld [vmem:[#allocation2 + $0x19a] sm:$0xff] }
 0x21f   : > { %v1612_v50 = vadd.f32 %v1580_v1, %v1511_v34  ;;  %v1711_v27 = vadd.f32 %v1679_v39, %v1611_v3  ;;  %v1780_v18 = vmul.f32 %v2043_v25, %v3780_v5  ;;  %v1880_v21 = vmul.f32 %v3798_v52, %v1844_v55 }
 0x220   : > { %v2181_v36 = vsub.f32 0.0, %v5047_v61  ;;  %v2182_v54 = vsub.f32 0.0, %v5049_v15  ;;  %v1881_v32 = vmul.f32 %v3798_v52, %v1845_v40  ;;  %v1980_v60 = vmul.f32 %v3835_v35, %v1944_v26 }
 0x221   : > { %v1712_v22 = vadd.f32 %v1680_v7, %v1612_v50  ;;  %v1811_v9 = vadd.f32 %v1779_v16, %v1711_v27  ;;  %v1981_v25 = vmul.f32 %v3835_v35, %v1945_v58  ;;  %v2080_v4 = vmul.f32 %v5022_v56, %v2044_v33  ;;  %v2860_v33 = vld [vmem:[%s3559_s10 + $0x39] sm:$0xff] }
 0x222   : > { %v2213_v29 = vmin.f32 %v2181_v36, 60.0  ;;  %v2214_v41 = vmin.f32 %v2182_v54, 60.0  ;;  %v2081_v2 = vmul.f32 %v5022_v56, %v2045_v17  ;;  %v2859_v54 = vld [vmem:[%s3559_s10 + $0x31] sm:$0xff] }
 0x223   : > { %v3428_v38 = vpop.eup %3427  ;;  %v1812_v11 = vadd.f32 %v1780_v18, %v1712_v22  ;;  %v1912_v5 = vadd.f32 %v1880_v21, %v1811_v9  ;;  %v2857_v9 = vld [vmem:[%s3559_s10 + $0x19] sm:$0xff] }
 0x224   : > { %v3430_v6 = vpop.eup %3429  ;;  %v2369_v53 = vmul.f32 %v3428_v38, %v4944_v13  ;;  %v2273_v59 = vmul.f32 1.442695, %v2213_v29  ;;  %v2275_v28 = vmul.f32 1.442695, %v2214_v41  ;;  %v2858_v38 = vld [vmem:[%s3559_s10 + $0x21] sm:$0xff] }
 0x225   : > { %v3432_v20 = vpop.eup %3431  ;;  %v2370_v52 = vmul.f32 %v3430_v6, %v4955_v23  ;;  %v1913_v0 = vadd.f32 %v1881_v32, %v1812_v11  ;;  %v2012_v42 = vadd.f32 %v1980_v60, %v1912_v5 }
 0x226   : > { %v3434_v37 = vpop.eup %3433  ;;  %v2307_v24 = vadd.f32 1.0, %v3432_v20  ;;  %3435 = vpow2.f32 %v2273_v59  ;;  %v2863_v59 = vld [vmem:[%s3559_s10 + $0x61] sm:$0xff]  ;;  %v2861_v20 = vld [vmem:[%s3559_s10 + $0x49] sm:$0xff] }
 0x227   : > { %v2389_v10 = vpack.c.bf16 %v2370_v52, %v2369_v53  ;;  %v2308_v49 = vadd.f32 1.0, %v3434_v37  ;;  %3437 = vpow2.f32 %v2275_v28  ;;  %v2013_v35 = vadd.f32 %v1981_v25, %v1913_v0 }
 0x228   : > { %3439 = vrcp.f32 %v2307_v24  ;;  %v2112_v13 = vadd.f32 %v2080_v4, %v2012_v42  ;;  %v2864_v42 = vld [vmem:[%s3559_s10 + $0x69] sm:$0xff] }
 0x229   : > { %3073 = vmatprep.mubr.msk.bf16.mxu1 %vm1107_vm3, %v2389_v10  ;;  %3441 = vrcp.f32 %v2308_v49  ;;  %v2113_v30 = vadd.f32 %v2081_v2, %v2013_v35  ;;  %v2862_v10 = vld [vmem:[%s3559_s10 + $0x51] sm:$0xff] }
 0x22a   : > { %v2151_v63 = vadd.f32 %v3459_v19, %v2112_v13 }
 0x22b   : > { %v2152_v57 = vadd.f32 %v3459_v19, %v2113_v30 }
 0x22c   : > { %v2183_v23 = vsub.f32 0.0, %v2151_v63 }
 0x22d   : > { %v2184_v48 = vsub.f32 0.0, %v2152_v57 }
 0x22e   : > { %v2215_v31 = vmin.f32 %v2183_v23, 60.0 }
 0x22f   : > { %v2216_v44 = vmin.f32 %v2184_v48, 60.0 }
 0x230   : > { %v3436_v56 = vpop.eup %3435  ;;  %v2277_v46 = vmul.f32 1.442695, %v2215_v31  ;;  %v2865_v31 = vld [vmem:[%s3559_s10 + $0x79] sm:$0xff] }
 0x231   : > { %v3438_v12 = vpop.eup %3437  ;;  %v2309_v14 = vadd.f32 1.0, %v3436_v56  ;;  %v2279_v43 = vmul.f32 1.442695, %v2216_v44 }
 0x232   : > { %v3440_v45 = vpop.eup %3439  ;;  %v2310_v8 = vadd.f32 1.0, %v3438_v12  ;;  %3443 = vpow2.f32 %v2277_v46  ;;  %v2868_v46 = vld [vmem:[%s3559_s10 + $0x99] sm:$0xff] }
 0x233   : > { %v3442_v62 = vpop.eup %3441  ;;  %v2371_v55 = vmul.f32 %v3440_v45, %v5001_v47  ;;  %3445 = vrcp.f32 %v2309_v14  ;;  %v2866_v45 = vld [vmem:[%s3559_s10 + $0x81] sm:$0xff] }
 0x234   : > { %v2372_v34 = vmul.f32 %v3442_v62, %v5010_v51  ;;  %3447 = vrcp.f32 %v2310_v8 }
 0x235   : > { %3449 = vpow2.f32 %v2279_v43 }
 0x236   : > { %v2390_v1 = vpack.c.bf16 %v2372_v34, %v2371_v55 }
 0x238   : > { %3074 = vmatmul.mubr.msk.bf16.gmra.mrb[60].mxu1 %vm1107_vm3, %v2390_v1 }
 0x23c   : > { %v3444_v3 = vpop.eup %3443 }
 0x23d   : > { %v3446_v39 = vpop.eup %3445  ;;  %v2311_v19 = vadd.f32 1.0, %v3444_v3  ;;  %v2871_v3 = vld [vmem:[%s3559_s10 + $0xc1] sm:$0xff] }
 0x23e   : > { %v3448_v7 = vpop.eup %3447  ;;  %v2373_v16 = vmul.f32 %v3446_v39, %v5047_v61  ;;  %v5076_v61 = vld [vmem:[%s5227_s6] ss:$0 sm:$0xff] }
 0x23f   : > { %v3450_v40 = vpop.eup %3449  ;;  %v2374_v26 = vmul.f32 %v3448_v7, %v5049_v15  ;;  %3451 = vrcp.f32 %v2311_v19  ;;  %v2869_v7 = vld [vmem:[%s3559_s10 + $0xa9] sm:$0xff] }
 0x240   : > { %v2312_v47 = vadd.f32 1.0, %v3450_v40 }
 0x241   : > { %v2391_v51 = vpack.c.bf16 %v2374_v26, %v2373_v16  ;;  %v2872_v26 = vld [vmem:[%s3559_s10 + $0xc9] sm:$0xff] }
 0x242   : > { %3453 = vrcp.f32 %v2312_v47 }
 0x243   : > { %3077 = vmatprep.mubr.msk.bf16.mxu1 %vm1107_vm3, %v2391_v51 }
 0x249   : > { %v3452_v50 = vpop.eup %3451 }
 0x24a   : > { %v2375_v27 = vmul.f32 %v3452_v50, %v2151_v63 }
 0x24c   : > { %v3454_v18 = vpop.eup %3453 }
 0x24d   : > { %v2376_v21 = vmul.f32 %v3454_v18, %v2152_v57  ;;  %v2867_v57 = vld [vmem:[%s3559_s10 + $0x91] sm:$0xff] }
 0x24f   : > { %v2392_v36 = vpack.c.bf16 %v2376_v21, %v2375_v27  ;;  %v2870_v27 = vld [vmem:[%s3559_s10 + $0xb1] sm:$0xff] }
 0x251   : > { %3078 = vmatmul.mubr.msk.bf16.gmra.mrb[64].mxu1 %vm1107_vm3, %v2392_v36 }
 0x261   : > { %v3051_v15 = vpop.f32.mrb[36].mxu1 }
 0x262   : > { %v2499_v58 = vadd.f32 %v3051_v15, %v5076_v61  ;;  %v2490_v22 = vpop.f32.mrb[37].mxu1 }
 0x263   : > { %v2491_v32 = vadd.f32 %v5076_v61, %v2490_v22  ;;  %v3052_v60 = vpop.f32.mrb[38].mxu1 }
 0x264   : > { %v2652_v29 = vadd.f32 %v2859_v54, %v2499_v58  ;;  %v2502_v41 = vadd.f32 %v3052_v60, %v5076_v61  ;;  %v2493_v17 = vpop.f32.mrb[39].mxu1  ;;  %v2875_v58 = vld [vmem:[%s3559_s10 + $0xf1] sm:$0xff] }
 0x265   : > { %v2650_v11 = vadd.f32 %v2857_v9, %v2491_v32  ;;  %v2494_v5 = vadd.f32 %v5076_v61, %v2493_v17  ;;  %v2873_v32 = vld [vmem:[%s3559_s10 + $0xd9] sm:$0xff] }
 0x266   : > { %2684 = vst.msk [vmem:[%s5085_s18 + $0x10] sm:$0xff] %vm394_vm2, %v2652_v29  ;;  %v2653_v25 = vadd.f32 %v2860_v33, %v2502_v41  ;;  %v2876_v29 = vld [vmem:[%s3559_s10 + $0xf9] sm:$0xff] }
 0x267   : > { %2682 = vst.msk [vmem:[%s5085_s18] sm:$0xff] %vm394_vm2, %v2650_v11  ;;  %v2651_v6 = vadd.f32 %v2858_v38, %v2494_v5  ;;  %v2874_v11 = vld [vmem:[%s3559_s10 + $0xe1] sm:$0xff] }
 0x268   : > { %2685 = vst.msk [vmem:[%s5085_s18 + $0x18] sm:$0xff] %vm394_vm2, %v2653_v25 }
 0x269   : > { %2683 = vst.msk [vmem:[%s5085_s18 + $0x8] sm:$0xff] %vm394_vm2, %v2651_v6 }
 0x28a   : > { %v3055_v53 = vpop.f32.mrb[40].mxu1 }
 0x28b   : > { %v2515_v28 = vadd.f32 %v3055_v53, %v5076_v61  ;;  %v2506_v4 = vpop.f32.mrb[41].mxu1 }
 0x28c   : > { %v2507_v52 = vadd.f32 %v5076_v61, %v2506_v4  ;;  %v3056_v0 = vpop.f32.mrb[42].mxu1 }
 0x28d   : > { %v2656_v2 = vadd.f32 %v2863_v59, %v2515_v28  ;;  %v2518_v37 = vadd.f32 %v3056_v0, %v5076_v61  ;;  %v2509_v24 = vpop.f32.mrb[43].mxu1  ;;  %v2879_v28 = vld [vmem:[%s3559_s10 + $0x121] sm:$0xff] }
 0x28e   : > { %v2654_v49 = vadd.f32 %v2861_v20, %v2507_v52  ;;  %v2510_v35 = vadd.f32 %v5076_v61, %v2509_v24  ;;  %v2877_v52 = vld [vmem:[%s3559_s10 + $0x109] sm:$0xff] }
 0x28f   : > { %2688 = vst.msk [vmem:[%s5085_s18 + $0x30] sm:$0xff] %vm394_vm2, %v2656_v2  ;;  %v2657_v13 = vadd.f32 %v2864_v42, %v2518_v37  ;;  %v2880_v2 = vld [vmem:[%s3559_s10 + $0x129] sm:$0xff] }
 0x290   : > { %2686 = vst.msk [vmem:[%s5085_s18 + $0x20] sm:$0xff] %vm394_vm2, %v2654_v49  ;;  %v2655_v30 = vadd.f32 %v2862_v10, %v2510_v35  ;;  %v2878_v49 = vld [vmem:[%s3559_s10 + $0x111] sm:$0xff] }
 0x291   : > { %2689 = vst.msk [vmem:[%s5085_s18 + $0x38] sm:$0xff] %vm394_vm2, %v2657_v13 }
 0x292   : > { %2687 = vst.msk [vmem:[%s5085_s18 + $0x28] sm:$0xff] %vm394_vm2, %v2655_v30 }
 0x2a3   : > { %v3059_v63 = vpop.f32.mrb[44].mxu1 }
 0x2a4   : > { %v2531_v23 = vadd.f32 %v3059_v63, %v5076_v61  ;;  %v2522_v48 = vpop.f32.mrb[45].mxu1 }
 0x2a5   : > { %v2523_v44 = vadd.f32 %v5076_v61, %v2522_v48  ;;  %v3060_v56 = vpop.f32.mrb[46].mxu1 }
 0x2a6   : > { %v2660_v12 = vadd.f32 %v2867_v57, %v2531_v23  ;;  %v2534_v14 = vadd.f32 %v3060_v56, %v5076_v61  ;;  %v2525_v43 = vpop.f32.mrb[47].mxu1  ;;  %v2883_v23 = vld [vmem:[%s3559_s10 + $0x151] sm:$0xff] }
 0x2a7   : > { %v2658_v8 = vadd.f32 %v2865_v31, %v2523_v44  ;;  %v2526_v62 = vadd.f32 %v5076_v61, %v2525_v43  ;;  %v2881_v44 = vld [vmem:[%s3559_s10 + $0x139] sm:$0xff] }
 0x2a8   : > { %2692 = vst.msk [vmem:[%s5085_s18 + $0x50] sm:$0xff] %vm394_vm2, %v2660_v12  ;;  %v2661_v55 = vadd.f32 %v2868_v46, %v2534_v14  ;;  %v2884_v12 = vld [vmem:[%s3559_s10 + $0x159] sm:$0xff] }
 0x2a9   : > { %2690 = vst.msk [vmem:[%s5085_s18 + $0x40] sm:$0xff] %vm394_vm2, %v2658_v8  ;;  %v2659_v34 = vadd.f32 %v2866_v45, %v2526_v62  ;;  %v2882_v8 = vld [vmem:[%s3559_s10 + $0x141] sm:$0xff] }
 0x2aa   : > { %2693 = vst.msk [vmem:[%s5085_s18 + $0x58] sm:$0xff] %vm394_vm2, %v2661_v55 }
 0x2ab   : > { %2691 = vst.msk [vmem:[%s5085_s18 + $0x48] sm:$0xff] %vm394_vm2, %v2659_v34 }
 0x2bd   : > { %v3063_v1 = vpop.f32.mrb[48].mxu1 }
 0x2be   : > { %v2547_v39 = vadd.f32 %v3063_v1, %v5076_v61  ;;  %v2538_v19 = vpop.f32.mrb[49].mxu1 }
 0x2bf   : > { %v2539_v16 = vadd.f32 %v5076_v61, %v2538_v19  ;;  %v3064_v40 = vpop.f32.mrb[50].mxu1 }
 0x2c0   : > { %v2664_v47 = vadd.f32 %v2871_v3, %v2547_v39  ;;  %v2550_v51 = vadd.f32 %v3064_v40, %v5076_v61  ;;  %v2541_v50 = vpop.f32.mrb[51].mxu1  ;;  %v2887_v39 = vld [vmem:[%s3559_s10 + $0x181] sm:$0xff] }
 0x2c1   : > { %v2662_v18 = vadd.f32 %v2869_v7, %v2539_v16  ;;  %v2542_v21 = vadd.f32 %v5076_v61, %v2541_v50  ;;  %v2885_v16 = vld [vmem:[%s3559_s10 + $0x169] sm:$0xff] }
 0x2c2   : > { %2696 = vst.msk [vmem:[%s5085_s18 + $0x70] sm:$0xff] %vm394_vm2, %v2664_v47  ;;  %v2665_v36 = vadd.f32 %v2872_v26, %v2550_v51  ;;  %v2888_v47 = vld [vmem:[%s3559_s10 + $0x189] sm:$0xff] }
 0x2c3   : > { %2694 = vst.msk [vmem:[%s5085_s18 + $0x60] sm:$0xff] %vm394_vm2, %v2662_v18  ;;  %v2663_v15 = vadd.f32 %v2870_v27, %v2542_v21  ;;  %v2886_v18 = vld [vmem:[%s3559_s10 + $0x171] sm:$0xff] }
 0x2c4   : > { %2697 = vst.msk [vmem:[%s5085_s18 + $0x78] sm:$0xff] %vm394_vm2, %v2665_v36 }
 0x2c5   : > { %2695 = vst.msk [vmem:[%s5085_s18 + $0x68] sm:$0xff] %vm394_vm2, %v2663_v15 }
 0x2d7   : > { %v3067_v54 = vpop.f32.mrb[52].mxu1 }
 0x2d8   : > { %v2563_v22 = vadd.f32 %v3067_v54, %v5076_v61  ;;  %v2554_v9 = vpop.f32.mrb[53].mxu1 }
 0x2d9   : > { %v2555_v60 = vadd.f32 %v5076_v61, %v2554_v9  ;;  %v3068_v33 = vpop.f32.mrb[54].mxu1 }
 0x2da   : > { %v2668_v41 = vadd.f32 %v2875_v58, %v2563_v22  ;;  %v2566_v17 = vadd.f32 %v3068_v33, %v5076_v61  ;;  %v2557_v38 = vpop.f32.mrb[55].mxu1 }
 0x2db   : > { %v2666_v5 = vadd.f32 %v2873_v32, %v2555_v60  ;;  %v2558_v25 = vadd.f32 %v5076_v61, %v2557_v38 }
 0x2dc   : > { %2700 = vst.msk [vmem:[%s5085_s18 + $0x90] sm:$0xff] %vm394_vm2, %v2668_v41  ;;  %v2669_v6 = vadd.f32 %v2876_v29, %v2566_v17 }
 0x2dd   : > { %2698 = vst.msk [vmem:[%s5085_s18 + $0x80] sm:$0xff] %vm394_vm2, %v2666_v5  ;;  %v2667_v53 = vadd.f32 %v2874_v11, %v2558_v25 }
 0x2de   : > { %2701 = vst.msk [vmem:[%s5085_s18 + $0x98] sm:$0xff] %vm394_vm2, %v2669_v6 }
 0x2df   : > { %2699 = vst.msk [vmem:[%s5085_s18 + $0x88] sm:$0xff] %vm394_vm2, %v2667_v53 }
 0x2f1   : > { %v3071_v59 = vpop.f32.mrb[56].mxu1 }
 0x2f2   : > { %v2579_v4 = vadd.f32 %v3071_v59, %v5076_v61  ;;  %v2570_v20 = vpop.f32.mrb[57].mxu1 }
 0x2f3   : > { %v2571_v0 = vadd.f32 %v5076_v61, %v2570_v20  ;;  %v3072_v42 = vpop.f32.mrb[58].mxu1 }
 0x2f4   : > { %v2672_v37 = vadd.f32 %v2879_v28, %v2579_v4  ;;  %v2582_v24 = vadd.f32 %v3072_v42, %v5076_v61  ;;  %v2573_v10 = vpop.f32.mrb[59].mxu1 }
 0x2f5   : > { %v2670_v35 = vadd.f32 %v2877_v52, %v2571_v0  ;;  %v2574_v13 = vadd.f32 %v5076_v61, %v2573_v10 }
 0x2f6   : > { %2704 = vst.msk [vmem:[%s5085_s18 + $0xb0] sm:$0xff] %vm394_vm2, %v2672_v37  ;;  %v2673_v30 = vadd.f32 %v2880_v2, %v2582_v24 }
 0x2f7   : > { %2702 = vst.msk [vmem:[%s5085_s18 + $0xa0] sm:$0xff] %vm394_vm2, %v2670_v35  ;;  %v2671_v63 = vadd.f32 %v2878_v49, %v2574_v13 }
 0x2f8   : > { %2705 = vst.msk [vmem:[%s5085_s18 + $0xb8] sm:$0xff] %vm394_vm2, %v2673_v30 }
 0x2f9   : > { %2703 = vst.msk [vmem:[%s5085_s18 + $0xa8] sm:$0xff] %vm394_vm2, %v2671_v63 }
 0x30b   : > { %v3075_v57 = vpop.f32.mrb[60].mxu1 }
 0x30c   : > { %v2595_v48 = vadd.f32 %v3075_v57, %v5076_v61  ;;  %v2586_v31 = vpop.f32.mrb[61].mxu1 }
 0x30d   : > { %v2587_v56 = vadd.f32 %v5076_v61, %v2586_v31  ;;  %v3076_v46 = vpop.f32.mrb[62].mxu1 }
 0x30e   : > { %v2676_v14 = vadd.f32 %v2883_v23, %v2595_v48  ;;  %v2598_v43 = vadd.f32 %v3076_v46, %v5076_v61  ;;  %v2589_v45 = vpop.f32.mrb[63].mxu1 }
 0x30f   : > { %v2674_v62 = vadd.f32 %v2881_v44, %v2587_v56  ;;  %v2590_v55 = vadd.f32 %v5076_v61, %v2589_v45 }
 0x310   : > { %2708 = vst.msk [vmem:[%s5085_s18 + $0xd0] sm:$0xff] %vm394_vm2, %v2676_v14  ;;  %v2677_v34 = vadd.f32 %v2884_v12, %v2598_v43 }
 0x311   : > { %2706 = vst.msk [vmem:[%s5085_s18 + $0xc0] sm:$0xff] %vm394_vm2, %v2674_v62  ;;  %v2675_v1 = vadd.f32 %v2882_v8, %v2590_v55 }
 0x312   : > { %2709 = vst.msk [vmem:[%s5085_s18 + $0xd8] sm:$0xff] %vm394_vm2, %v2677_v34 }
 0x313   : > { %2707 = vst.msk [vmem:[%s5085_s18 + $0xc8] sm:$0xff] %vm394_vm2, %v2675_v1 }
 0x324   : > { %v3079_v3 = vpop.f32.mrb[64].mxu1 }
 0x325   : > { %v2611_v19 = vadd.f32 %v3079_v3, %v5076_v61  ;;  %v2602_v7 = vpop.f32.mrb[65].mxu1 }
 0x326   : > { %v2603_v40 = vadd.f32 %v5076_v61, %v2602_v7  ;;  %v3080_v26 = vpop.f32.mrb[66].mxu1 }
 0x327   : > { %v2680_v51 = vadd.f32 %v2887_v39, %v2611_v19  ;;  %v2614_v50 = vadd.f32 %v3080_v26, %v5076_v61  ;;  %v2605_v27 = vpop.f32.mrb[67].mxu1 }
 0x328   : > { %v2678_v21 = vadd.f32 %v2885_v16, %v2603_v40  ;;  %v2606_v36 = vadd.f32 %v5076_v61, %v2605_v27 }
 0x329   : > { %2712 = vst.msk [vmem:[%s5085_s18 + $0xf0] sm:$0xff] %vm394_vm2, %v2680_v51  ;;  %v2681_v15 = vadd.f32 %v2888_v47, %v2614_v50 }
 0x32a   : > { %2710 = vst.msk [vmem:[%s5085_s18 + $0xe0] sm:$0xff] %vm394_vm2, %v2678_v21  ;;  %v2679_v54 = vadd.f32 %v2886_v18, %v2606_v36 }
 0x32b   : > { %2713 = vst.msk [vmem:[%s5085_s18 + $0xf8] sm:$0xff] %vm394_vm2, %v2681_v15 }
 0x32c   : > { %2711 = vst.msk [vmem:[%s5085_s18 + $0xe8] sm:$0xff] %vm394_vm2, %v2679_v54 }
 0x32d PF: > { %s17_s26 = sadd.s32 1, %s3482_s26   ;;  %s5229_s24 = smov %s3478_s25 }
 0x32e   : > { %p14_p5 = scmp.ge.s32.totalorder %s17_s26, 4   ;;  %s5230_s25 = smov %s5232_s27 }
 0x330   :  { %16 = sbr.rel (!%p14_p5) target bundleno = 2 (0x2), region = 86 }

</bundles_post_ra>
